<compile_context>
chip_gen: v7x
topology: tpu7x:2x2x1
jax: 0.10.0
libtpu: 0.0.40
codegen_flags: <defaults>
</compile_context>

<pallas_src>
import jax
import jax.numpy as jnp
from jax.experimental import pallas as pl
from jax.experimental.pallas import tpu as pltpu

_C3_CHUNK = 512   # layer-3 output-channel chunk (1024 -> 2 chunks)


def _pointnet_kernel(x_ref, w1_ref, b1_ref, w2_ref, b2_ref, w3_ref,
                     o_ref, acc_ref):
    # x_ref: (1, TN, 8) bf16 point tile for one (batch, split) pair.
    n = pl.program_id(2)

    @pl.when(n == 0)
    def _init():
        acc_ref[...] = jnp.full_like(acc_ref, -jnp.inf)

    # ---- layer 1: 8(=3 zero-padded) -> 64 on the MXU ----
    h1 = jnp.dot(x_ref[0], w1_ref[...], preferred_element_type=jnp.float32)
    h1 = jnp.maximum(h1 + b1_ref[...], 0.0).astype(jnp.bfloat16)   # (TN, 64)

    # ---- layer 2: 64 -> 128 on the MXU ----
    h2 = jnp.dot(h1, w2_ref[...], preferred_element_type=jnp.float32)
    h2 = jnp.maximum(h2 + b2_ref[...], 0.0).astype(jnp.bfloat16)   # (TN, 128)

    # ---- layer 3: 128 -> 1024, chunked over Cout with a running max ----
    # b3 bias is hoisted to the wrapper (max over points commutes with it).
    tn = h2.shape[0]
    cout = acc_ref.shape[-1]
    for c in range(0, cout, _C3_CHUNK):
        h3_c = jnp.dot(h2, w3_ref[:, c:c + _C3_CHUNK],
                       preferred_element_type=jnp.float32)          # (TN, CH)
        # Full-vreg VPU maxes: reduce over sublane-aligned groups of 8 rows.
        part = jnp.max(h3_c.reshape(tn // 8, 8, _C3_CHUNK), axis=0)  # (8, CH)
        acc_ref[:, c:c + _C3_CHUNK] = jnp.maximum(
            acc_ref[:, c:c + _C3_CHUNK], part)

    @pl.when(n == pl.num_programs(2) - 1)
    def _store():
        # Keep 8 sublanes of partial maxes; collapsed (cheaply) in the wrapper.
        o_ref[...] = acc_ref[...].reshape(1, 8, cout)


def _round_up(a, m):
    return (a + m - 1) // m * m


def _pick_tile(n_per, tn_max):
    """Largest divisor of n_per that is a multiple of 128 and <= tn_max."""
    units = n_per // 128
    best = 1
    for d in range(1, units + 1):
        if units % d == 0 and d * 128 <= tn_max:
            best = d
    return best * 128


def _default_n_splits():
    # 2 TensorCores per chip only on v7x; splitting the point axis there keeps
    # both cores busy even at B == 1.  On v5e/v6e a split is pure overhead.
    try:
        kind = jax.devices()[0].device_kind.lower()
    except Exception:
        return 1
    return 2 if ("v7" in kind or "tpu7" in kind) else 1


def pointnet_feat(x_bcn, w1, b1, w2, b2, w3, b3, *, tn=2048, n_splits=None):
    """x_bcn: (B, 3, N) float32 (PyTorch NCW layout). Returns (B, 1024) f32."""
    B, C, N = x_bcn.shape
    assert C == 3
    if n_splits is None:
        n_splits = _default_n_splits()
    n_splits = max(1, int(n_splits))

    # Pad the point axis by duplicating the last point (max-invariant) so it
    # tiles evenly; pick the point tile as the largest 128-multiple divisor.
    n_pad_total = _round_up(max(N, 128 * n_splits), 128 * n_splits)
    n_per = n_pad_total // n_splits
    tn = _pick_tile(n_per, max(int(tn), 128))
    tiles = n_per // tn

    # One channels-last transpose + bf16 cast; zero-pad channels 3 -> 8 for
    # 16 B-aligned rows and an MXU-friendly layer 1.
    x_t = jnp.transpose(x_bcn, (0, 2, 1))                         # (B, N, 3)
    if n_pad_total > N:
        x_t = jnp.pad(x_t, ((0, 0), (0, n_pad_total - N), (0, 0)), mode="edge")
    x_t = jnp.pad(x_t, ((0, 0), (0, 0), (0, 8 - C)))
    x_t = x_t.astype(jnp.bfloat16)                                # (B, Np, 8)

    w1b = jnp.pad(w1, ((0, 8 - C), (0, 0))).astype(jnp.bfloat16)  # (8, 64)
    w2b = w2.astype(jnp.bfloat16)
    w3b = w3.astype(jnp.bfloat16)

    cout = w3.shape[-1]   # 1024
    full = lambda a: pl.BlockSpec(a.shape, lambda b, s, n: (0,) * a.ndim)

    flops = 2 * B * n_pad_total * (8 * 64 + 64 * 128 + 128 * cout)
    bytes_accessed = (x_t.size * 2
                      + (w1b.size + w2b.size + w3b.size) * 2
                      + (b1.size + b2.size) * 4
                      + B * n_splits * 8 * cout * 4)

    partial = pl.pallas_call(
        _pointnet_kernel,
        out_shape=jax.ShapeDtypeStruct((B * n_splits, 8, cout), jnp.float32),
        grid_spec=pltpu.PrefetchScalarGridSpec(
            num_scalar_prefetch=0,
            grid=(B, n_splits, tiles),
            in_specs=[
                pl.BlockSpec((1, tn, 8),
                             lambda b, s, n: (b, s * tiles + n, 0)),
                full(w1b), full(b1),     # layer 1 (BN folded)
                full(w2b), full(b2),     # layer 2 (BN folded)
                full(w3b),               # layer 3 weights (bias hoisted out)
            ],
            out_specs=pl.BlockSpec((1, 8, cout),
                                   lambda b, s, n: (b * n_splits + s, 0, 0)),
            scratch_shapes=[pltpu.VMEM((8, cout), jnp.float32)],
        ),
        compiler_params=pltpu.CompilerParams(
            dimension_semantics=("parallel", "parallel", "arbitrary")),
        cost_estimate=pl.CostEstimate(flops=flops, transcendentals=0,
                                      bytes_accessed=bytes_accessed),
    )(x_t, w1b, b1, w2b, b2, w3b)

    # Collapse the 8 sublane partials and the per-split partials in one small
    # reduce, then add the hoisted layer-3 bias exactly once.
    out = jnp.max(partial.reshape(B, n_splits * 8, cout), axis=1)
    return out + b3.reshape(1, cout)


def _init_layer(key, cin, cout):
    """Deterministic Conv1d(k=1) + BatchNorm1d params, returned folded."""
    kw, kb, kg, kbeta, km, kv = jax.random.split(key, 6)
    w = jax.random.normal(kw, (cin, cout), jnp.float32) * 0.05   # conv weight
    b = jax.random.normal(kb, (cout,), jnp.float32) * 0.05       # conv bias
    gamma = 1.0 + 0.1 * jax.random.normal(kg, (cout,), jnp.float32)
    beta = 0.1 * jax.random.normal(kbeta, (cout,), jnp.float32)
    mean = 0.1 * jax.random.normal(km, (cout,), jnp.float32)
    var = jnp.abs(1.0 + 0.1 * jax.random.normal(kv, (cout,), jnp.float32))
    eps = 1e-5
    scale = gamma / jnp.sqrt(var + eps)
    w_fold = w * scale[None, :]
    b_fold = (b - mean) * scale + beta
    return w_fold, b_fold[None, :]   # bias kept 2D (1, cout) for the kernel


def _reference(x_bcn, w1, b1, w2, b2, w3, b3):
    """Pure-JAX reference mirroring the kernel's bf16-in / f32-accum math."""
    dot = lambda a, b: jnp.dot(a.astype(jnp.bfloat16), b.astype(jnp.bfloat16),
                               preferred_element_type=jnp.float32)
    x = jnp.transpose(x_bcn, (0, 2, 1))                           # (B, N, 3)
    h1 = jnp.maximum(dot(x, w1) + b1, 0.0)
    h2 = jnp.maximum(dot(h1, w2) + b2, 0.0)
    h3 = dot(h2, w3)
    return jnp.max(h3, axis=1) + b3.reshape(1, -1)                # (B, 1024)


if __name__ == "__main__":
    key = jax.random.PRNGKey(0)
    kx, k1, k2, k3 = jax.random.split(key, 4)

    B, N = 2, 500                      # non-multiple N exercises point padding
    x = jax.random.normal(kx, (B, 3, N), jnp.float32)   # PyTorch NCW layout

    w1, b1 = _init_layer(k1, 3, 64)
    w2, b2 = _init_layer(k2, 64, 128)
    w3, b3 = _init_layer(k3, 128, 1024)

    out = jax.block_until_ready(pointnet_feat(x, w1, b1, w2, b2, w3, b3))
    ref = _reference(x, w1, b1, w2, b2, w3, b3)

    assert out.shape == (B, 1024)
    err = float(jnp.max(jnp.abs(out - ref)))
    assert jnp.allclose(out, ref, atol=1e-2, rtol=1e-2), err

    print("KERNEL_OK")
</pallas_src>

<mosaic_0001>
module attributes {stable_mosaic.version = 11 : i64} {
  func.func @_pointnet_kernel(%arg0: i32, %arg1: i32, %arg2: i32, %arg3: memref<1x512x8xbf16, #tpu.memory_space<vmem>>, %arg4: memref<8x64xbf16, #tpu.memory_space<vmem>>, %arg5: memref<1x64xf32, #tpu.memory_space<vmem>>, %arg6: memref<64x128xbf16, #tpu.memory_space<vmem>>, %arg7: memref<1x128xf32, #tpu.memory_space<vmem>>, %arg8: memref<128x1024xbf16, #tpu.memory_space<vmem>>, %arg9: memref<1x8x1024xf32, #tpu.memory_space<vmem>>, %arg10: memref<8x1024xf32, #tpu.memory_space<vmem>>) attributes {dimension_semantics = [#tpu.dimension_semantics<parallel>, #tpu.dimension_semantics<parallel>, #tpu.dimension_semantics<arbitrary>], iteration_bounds = array<i64: 2, 1, 1>, scalar_prefetch = 0 : i64, scratch_operands = 1 : i64, tpu.core_type = #tpu.core_type<tc>, window_params = [{transform_indices = @transform_0, window_bounds = array<i64: 1, 512, 8>}, {pipeline_mode = #tpu.pipeline_mode<synchronous>, transform_indices = @transform_1, window_bounds = array<i64: 8, 64>}, {pipeline_mode = #tpu.pipeline_mode<synchronous>, transform_indices = @transform_2, window_bounds = array<i64: 1, 64>}, {pipeline_mode = #tpu.pipeline_mode<synchronous>, transform_indices = @transform_3, window_bounds = array<i64: 64, 128>}, {pipeline_mode = #tpu.pipeline_mode<synchronous>, transform_indices = @transform_4, window_bounds = array<i64: 1, 128>}, {pipeline_mode = #tpu.pipeline_mode<synchronous>, transform_indices = @transform_5, window_bounds = array<i64: 128, 1024>}, {transform_indices = @transform_6, window_bounds = array<i64: 1, 8, 1024>}]} {
    %c0_i32 = arith.constant 0 : i32
    %0 = arith.cmpi eq, %arg2, %c0_i32 : i32
    %1 = arith.extui %0 : i1 to i32
    %c0_i32_0 = arith.constant 0 : i32
    %2 = arith.cmpi ne, %1, %c0_i32_0 : i32
    scf.if %2 {
      %cst_31 = arith.constant 0xFF800000 : f32
      %38 = vector.broadcast %cst_31 : f32 to vector<8x1024xf32>
      %c0_32 = arith.constant 0 : index
      %c0_33 = arith.constant 0 : index
      %39 = vector.load %arg10[%c0_32, %c0_33] : memref<8x1024xf32, #tpu.memory_space<vmem>>, vector<8x1024xf32>
      tpu.vector_store %arg10[%c0_32, %c0_33], %38 {strides = array<i32>} : memref<8x1024xf32, #tpu.memory_space<vmem>>, vector<8x1024xf32>,
    } else {
    }
    %c0 = arith.constant 0 : index
    %c0_1 = arith.constant 0 : index
    %c0_2 = arith.constant 0 : index
    %3 = vector.load %arg3[%c0, %c0_1, %c0_2] : memref<1x512x8xbf16, #tpu.memory_space<vmem>>, vector<1x512x8xbf16>
    %4 = vector.shape_cast %3 : vector<1x512x8xbf16> to vector<512x8xbf16>
    %c0_3 = arith.constant 0 : index
    %c0_4 = arith.constant 0 : index
    %5 = vector.load %arg4[%c0_3, %c0_4] : memref<8x64xbf16, #tpu.memory_space<vmem>>, vector<8x64xbf16>
    %cst = arith.constant dense<0.000000e+00> : vector<512x64xf32>
    %6 = tpu.matmul %4, %5, %cst {dimension_numbers = #tpu.dot_dimension_numbers<[1], [0], [0], [1], [0, 0, 1, 1], [], []>} : vector<512x8xbf16>, vector<8x64xbf16>, vector<512x64xf32> -> vector<512x64xf32>
    %c0_5 = arith.constant 0 : index
    %c0_6 = arith.constant 0 : index
    %7 = vector.load %arg5[%c0_5, %c0_6] : memref<1x64xf32, #tpu.memory_space<vmem>>, vector<1x64xf32>
    %8 = vector.broadcast %7 : vector<1x64xf32> to vector<512x64xf32>
    %9 = arith.addf %6, %8 : vector<512x64xf32>
    %cst_7 = arith.constant 0.000000e+00 : f32
    %10 = vector.broadcast %cst_7 : f32 to vector<512x64xf32>
    %11 = arith.maximumf %9, %10 : vector<512x64xf32>
    %12 = arith.truncf %11 : vector<512x64xf32> to vector<512x64xbf16>
    %c0_8 = arith.constant 0 : index
    %c0_9 = arith.constant 0 : index
    %13 = vector.load %arg6[%c0_8, %c0_9] : memref<64x128xbf16, #tpu.memory_space<vmem>>, vector<64x128xbf16>
    %cst_10 = arith.constant dense<0.000000e+00> : vector<512x128xf32>
    %14 = tpu.matmul %12, %13, %cst_10 {dimension_numbers = #tpu.dot_dimension_numbers<[1], [0], [0], [1], [0, 0, 1, 1], [], []>} : vector<512x64xbf16>, vector<64x128xbf16>, vector<512x128xf32> -> vector<512x128xf32>
    %c0_11 = arith.constant 0 : index
    %c0_12 = arith.constant 0 : index
    %15 = vector.load %arg7[%c0_11, %c0_12] : memref<1x128xf32, #tpu.memory_space<vmem>>, vector<1x128xf32>
    %16 = vector.broadcast %15 : vector<1x128xf32> to vector<512x128xf32>
    %17 = arith.addf %14, %16 : vector<512x128xf32>
    %cst_13 = arith.constant 0.000000e+00 : f32
    %18 = vector.broadcast %cst_13 : f32 to vector<512x128xf32>
    %19 = arith.maximumf %17, %18 : vector<512x128xf32>
    %20 = arith.truncf %19 : vector<512x128xf32> to vector<512x128xbf16>
    %c0_14 = arith.constant 0 : index
    %c0_15 = arith.constant 0 : index
    %21 = vector.load %arg8[%c0_14, %c0_15] : memref<128x1024xbf16, #tpu.memory_space<vmem>>, vector<128x512xbf16>
    %cst_16 = arith.constant dense<0.000000e+00> : vector<512x512xf32>
    %22 = tpu.matmul %20, %21, %cst_16 {dimension_numbers = #tpu.dot_dimension_numbers<[1], [0], [0], [1], [0, 0, 1, 1], [], []>} : vector<512x128xbf16>, vector<128x512xbf16>, vector<512x512xf32> -> vector<512x512xf32>
    %23 = vector.shape_cast %22 : vector<512x512xf32> to vector<64x8x512xf32>
    %cst_17 = arith.constant dense<0xFF800000> : vector<8x512xf32>
    %24 = vector.multi_reduction <maximumf>, %23, %cst_17 [0] : vector<64x8x512xf32> to vector<8x512xf32>
    %c0_18 = arith.constant 0 : index
    %c0_19 = arith.constant 0 : index
    %25 = vector.load %arg10[%c0_18, %c0_19] : memref<8x1024xf32, #tpu.memory_space<vmem>>, vector<8x512xf32>
    %26 = arith.maximumf %25, %24 : vector<8x512xf32>
    %c0_20 = arith.constant 0 : index
    %c0_21 = arith.constant 0 : index
    %27 = vector.load %arg10[%c0_20, %c0_21] : memref<8x1024xf32, #tpu.memory_space<vmem>>, vector<8x512xf32>
    tpu.vector_store %arg10[%c0_20, %c0_21], %26 {strides = array<i32>} : memref<8x1024xf32, #tpu.memory_space<vmem>>, vector<8x512xf32>,
    %c0_22 = arith.constant 0 : index
    %c512 = arith.constant 512 : index
    %28 = vector.load %arg8[%c0_22, %c512] : memref<128x1024xbf16, #tpu.memory_space<vmem>>, vector<128x512xbf16>
    %cst_23 = arith.constant dense<0.000000e+00> : vector<512x512xf32>
    %29 = tpu.matmul %20, %28, %cst_23 {dimension_numbers = #tpu.dot_dimension_numbers<[1], [0], [0], [1], [0, 0, 1, 1], [], []>} : vector<512x128xbf16>, vector<128x512xbf16>, vector<512x512xf32> -> vector<512x512xf32>
    %30 = vector.shape_cast %29 : vector<512x512xf32> to vector<64x8x512xf32>
    %cst_24 = arith.constant dense<0xFF800000> : vector<8x512xf32>
    %31 = vector.multi_reduction <maximumf>, %30, %cst_24 [0] : vector<64x8x512xf32> to vector<8x512xf32>
    %c0_25 = arith.constant 0 : index
    %c512_26 = arith.constant 512 : index
    %32 = vector.load %arg10[%c0_25, %c512_26] : memref<8x1024xf32, #tpu.memory_space<vmem>>, vector<8x512xf32>
    %33 = arith.maximumf %32, %31 : vector<8x512xf32>
    %c0_27 = arith.constant 0 : index
    %c512_28 = arith.constant 512 : index
    %34 = vector.load %arg10[%c0_27, %c512_28] : memref<8x1024xf32, #tpu.memory_space<vmem>>, vector<8x512xf32>
    tpu.vector_store %arg10[%c0_27, %c512_28], %33 {strides = array<i32>} : memref<8x1024xf32, #tpu.memory_space<vmem>>, vector<8x512xf32>,
    %c0_i32_29 = arith.constant 0 : i32
    %35 = arith.cmpi eq, %arg2, %c0_i32_29 : i32
    %36 = arith.extui %35 : i1 to i32
    %c0_i32_30 = arith.constant 0 : i32
    %37 = arith.cmpi ne, %36, %c0_i32_30 : i32
    scf.if %37 {
      %c0_31 = arith.constant 0 : index
      %c0_32 = arith.constant 0 : index
      %38 = vector.load %arg10[%c0_31, %c0_32] : memref<8x1024xf32, #tpu.memory_space<vmem>>, vector<8x1024xf32>
      %39 = vector.shape_cast %38 : vector<8x1024xf32> to vector<1x8x1024xf32>
      %c0_33 = arith.constant 0 : index
      %c0_34 = arith.constant 0 : index
      %c0_35 = arith.constant 0 : index
      %40 = vector.load %arg9[%c0_33, %c0_34, %c0_35] : memref<1x8x1024xf32, #tpu.memory_space<vmem>>, vector<1x8x1024xf32>
      tpu.vector_store %arg9[%c0_33, %c0_34, %c0_35], %39 {strides = array<i32>} : memref<1x8x1024xf32, #tpu.memory_space<vmem>>, vector<1x8x1024xf32>,
    } else {
    }
    return
  }
  func.func @transform_0(%arg0: i32, %arg1: i32, %arg2: i32) -> (i32, i32, i32) {
    %c1_i32 = arith.constant 1 : i32
    %0 = arith.muli %arg1, %c1_i32 : i32
    %1 = arith.addi %0, %arg2 : i32
    %c0_i32 = arith.constant 0 : i32
    %c0_i32_0 = arith.constant 0 : i32
    return %arg0, %1, %c0_i32 : i32, i32, i32
  }
  func.func @transform_1(%arg0: i32, %arg1: i32, %arg2: i32) -> (i32, i32) {
    %c0_i32 = arith.constant 0 : i32
    %c0_i32_0 = arith.constant 0 : i32
    %c0_i32_1 = arith.constant 0 : i32
    return %c0_i32, %c0_i32_0 : i32, i32
  }
  func.func @transform_2(%arg0: i32, %arg1: i32, %arg2: i32) -> (i32, i32) {
    %c0_i32 = arith.constant 0 : i32
    %c0_i32_0 = arith.constant 0 : i32
    %c0_i32_1 = arith.constant 0 : i32
    return %c0_i32, %c0_i32_0 : i32, i32
  }
  func.func @transform_3(%arg0: i32, %arg1: i32, %arg2: i32) -> (i32, i32) {
    %c0_i32 = arith.constant 0 : i32
    %c0_i32_0 = arith.constant 0 : i32
    %c0_i32_1 = arith.constant 0 : i32
    return %c0_i32, %c0_i32_0 : i32, i32
  }
  func.func @transform_4(%arg0: i32, %arg1: i32, %arg2: i32) -> (i32, i32) {
    %c0_i32 = arith.constant 0 : i32
    %c0_i32_0 = arith.constant 0 : i32
    %c0_i32_1 = arith.constant 0 : i32
    return %c0_i32, %c0_i32_0 : i32, i32
  }
  func.func @transform_5(%arg0: i32, %arg1: i32, %arg2: i32) -> (i32, i32) {
    %c0_i32 = arith.constant 0 : i32
    %c0_i32_0 = arith.constant 0 : i32
    %c0_i32_1 = arith.constant 0 : i32
    return %c0_i32, %c0_i32_0 : i32, i32
  }
  func.func @transform_6(%arg0: i32, %arg1: i32, %arg2: i32) -> (i32, i32, i32) {
    %c1_i32 = arith.constant 1 : i32
    %0 = arith.muli %arg0, %c1_i32 : i32
    %1 = arith.addi %0, %arg1 : i32
    %c0_i32 = arith.constant 0 : i32
    %c0_i32_0 = arith.constant 0 : i32
    %c0_i32_1 = arith.constant 0 : i32
    return %1, %c0_i32, %c0_i32_0 : i32, i32, i32
  }
}

</mosaic_0001>

<bundles_post_ra>
// kernel: tpu_custom_call.1
= control target key start
LH: loop header
LB: loop body
LE: loop exit
PB: predicated region body
PF: predicated region fallthrough
CT: control target
= control target key end

     0   :  { %11 = vsyncpa [#allocation4], 0  ;;  %s5504_s0 = inlined_call_operand.vmem [shape: bf16[2,512,8], index: 0, kind: input, shape index: {}]   ;;  %s5505_s1 = inlined_call_operand.vmem [shape: bf16[8,64], index: 1, kind: input, shape index: {}]   ;;  %s5506_s2 = inlined_call_operand.vmem [shape: f32[1,64], index: 2, kind: input, shape index: {}]   ;;  %s5507_s3 = inlined_call_operand.vmem [shape: bf16[64,128], index: 3, kind: input, shape index: {}]   ;;  %s5508_s4 = inlined_call_operand.vmem [shape: f32[1,128], index: 4, kind: input, shape index: {}]   ;;  %s5509_s5 = inlined_call_operand.vmem [shape: bf16[128,1024], index: 5, kind: input, shape index: {}]   ;;  %s5510_s6 = inlined_call_operand.hbm [shape: f32[2,8,1024], index: 6, kind: output, shape index: {}]  }
   0x1   :  { %13 = vsyncpa [#allocation4 + $0x1], 0  ;;  %s4581_s21 = smov 0   ;;  %s4583_s22 = smov 0  }
   0x2   :  { %s4585_s23 = smov 0   ;;  %s4587_s24 = smov 0  }
   0x3   :  { %s4589_s25 = smov 0   ;;  %s4591_s26 = smov 0  }
   0x4 LB: > { %s3983_s27 = sadd.s32 4294967295, %s4542_s26   ;;  %s3984_s28 = sadd.s32 4294967294, %s4542_s26   ;;  %s4542_s26 = sphi %s4591_s26, %s19_s26   ;;  %s4538_s25 = sphi %s4589_s25, %s5517_s25   ;;  %s4534_s24 = sphi %s4587_s24, %s5516_s24   ;;  %s4530_s23 = sphi %s4585_s23, %s5515_s23   ;;  %s4526_s22 = sphi %s4583_s22, %s5514_s22   ;;  %s4522_s21 = sphi %s4581_s21, %s5513_s21  }
   0x5   : > { %s38_s29 = sadd.s32 1, %s4538_s25  ;;  %s182_s30 = sadd.s32 1, %s4530_s23 }
   0x6   : > { %p40_p0 = scmp.ge.s32.totalorder %s38_s29, 2  ;;  %p192_p1 = scmp.ne.s32.totalorder %s4530_s23, %s4526_s22 }
   0x7   : > { %p193_p2 = scmp.eq.s32.totalorder %s3983_s27, 1  ;;  %p198_p3 = scmp.ne.s32.totalorder %s4526_s22, %s4522_s21 }
   0x8   : > { %s5519_s29 = smov (%p40_p0, %s38_s29), 0  ;;  %p199_p5 = scmp.eq.s32.totalorder %s3984_s28, 1 }
   0x9   : > { %p4621_p4 = por %p193_p2, %p192_p1  ;;  %s179_s8 = ssub.s32 %s4538_s25, %s5519_s29 }
   0xa   : > { %p3987_p6 = scmp.ge.s32.totalorder %s4542_s26, 1  ;;  %p180_p7 = scmp.eq.s32.totalorder %s179_s8, 0 }
   0xb   : > { %p4628_p8 = por %p199_p5, %p198_p3  ;;  %p247_p9 = scmp.lt.s32.totalorder %s4542_s26, 3 }
   0xc   : > { %s4634_s10 = scalar_select %p180_p7, %s4530_s23, %s182_s30  }
   0xd   : > { %p248_p10 = pnand %p3987_p6, %p247_p9 }
   0xe   : > { %v372_v0 = vld [vmem:[%s5505_s1] sm:$0xf] (!%p248_p10)  ;;  %vm637_vm0 = vcmask (!%p248_p10), 1043456   ;;  %p284_p11 = scmp.lt.s32.totalorder (!%p248_p10), %s4534_s24, 1  ;;  %v4461_v3 = vld [vmem:[%s5507_s3 + $0x8] sm:$0xff] (!%p248_p10)   ;;  %vm540_vm1 = vcmask (!%p248_p10), 64512  }
   0xf   : > { %251 = sbr.rel (%p248_p10) target bundleno = 1206 (0x4b6), region = 44  ;;  %4371 = vmatprep.subr.msk.bf16.mxu0 (!%p248_p10), %vm637_vm0, %v372_v0  ;;  %v639_v1 = vsel (!%p248_p10), %vm637_vm0, %v372_v0, 0  ;;  %v4460_v2 = vld [vmem:[%s5507_s3] sm:$0xff] (!%p248_p10)   ;;  %v4462_v28 = vld [vmem:[%s5507_s3 + $0x10] sm:$0xff] (!%p248_p10)   ;;  %v4463_v30 = vld [vmem:[%s5507_s3 + $0x18] sm:$0xff] (!%p248_p10)   ;;  %vm1065_vm2 = vcmask (!%p248_p10), 523264  }
  0x10   : > { %4234 = vmatpush3.bf16.msra.mxu0 (!%p248_p10), %v639_v1  ;;  %4299 = vmatprep.subr.bf16.mxu1 (!%p248_p10), %v4460_v2  ;;  %v1547_v38 = vld [vmem:[%s5509_s5] sm:$0xff] (!%p248_p10)  ;;  %v4731_v40 = vld [vmem:[%s5509_s5 + $0x8] sm:$0xff] (!%p248_p10)  ;;  %s4545_s13 = smov (!%p248_p10), [#allocation3]  }
  0x11   : > { %4300 = vmatpush3.bf16.msra.mxu1 (!%p248_p10), %v4460_v2  ;;  %v1549_v39 = vld [vmem:[%s5509_s5 + $0x20] sm:$0xff] (!%p248_p10)  ;;  %v4736_v43 = vld [vmem:[%s5509_s5 + $0x28] sm:$0xff] (!%p248_p10)  ;;  %s4468_s14 = sshll.u32 (!%p248_p10), %s4545_s13, 4  ;;  %s4469_s14 = int_to_ptr.vmem [resolvable:$false] %s4468_s14 }
  0x12   : > { %4301 = vmatprep.subr.bf16.mxu1 (!%p248_p10), %v4461_v3  ;;  %v4093_v41 = vcombine.low (!%p248_p10), %v1547_v38, %v1549_v39  ;;  %v4094_v42 = vcombine.high (!%p248_p10), %v1547_v38, %v1549_v39  ;;  %v4095_v44 = vcombine.low (!%p248_p10), %v4731_v40, %v4736_v43  ;;  %v4096_v45 = vcombine.high (!%p248_p10), %v4731_v40, %v4736_v43  ;;  %v1551_v46 = vld [vmem:[%s5509_s5 + $0x40] sm:$0xff] (!%p248_p10) }
  0x13   : > { %v1553_v47 = vld [vmem:[%s5509_s5 + $0x60] sm:$0xff] (!%p248_p10) }
  0x14   : > { %1739 = vmatprep.subr.bf16.mxu0 (!%p248_p10), %v4094_v42  ;;  %v4097_v48 = vcombine.low (!%p248_p10), %v1551_v46, %v1553_v47  ;;  %v4098_v49 = vcombine.high (!%p248_p10), %v1551_v46, %v1553_v47  ;;  %v1555_v50 = vld [vmem:[%s5509_s5 + $0x80] sm:$0xff] (!%p248_p10)  ;;  %v1560_v47 = vld [vmem:[%s5509_s5 + $0xc8] sm:$0xff] (!%p248_p10) }
  0x15   : > { %4302 = vmatpush3.bf16.msra.mxu1 (!%p248_p10), %v4461_v3  ;;  %v1557_v51 = vld [vmem:[%s5509_s5 + $0xa0] sm:$0xff] (!%p248_p10) }
  0x16   : > { %s285_s15 = scalar_select %p284_p11, %s4534_s24, 1  ;;  %4303 = vmatprep.subr.bf16.mxu1 %v4462_v28  ;;  %v4101_v52 = vcombine.low %v1555_v50, %v1557_v51  ;;  %v4102_v53 = vcombine.high %v1555_v50, %v1557_v51  ;;  %v1559_v54 = vld [vmem:[%s5509_s5 + $0xc0] sm:$0xff] }
  0x17   : > { %v1561_v55 = vld [vmem:[%s5509_s5 + $0xe0] sm:$0xff] }
  0x18   : > { %s4162_s18 = sshll.u32 %s285_s15, 8  ;;  %v4105_v56 = vcombine.low %v1559_v54, %v1561_v55  ;;  %v4106_v57 = vcombine.high %v1559_v54, %v1561_v55  ;;  %v1563_v58 = vld [vmem:[%s5509_s5 + $0x100] sm:$0xff]  ;;  %v1564_v55 = vld [vmem:[%s5509_s5 + $0x108] sm:$0xff]  ;;  %s4470_s15 = scalar_lea.vmem %s4469_s14, 2048 }
  0x19   : > { %s4650_s27 = scalar_lea.vmem %s5504_s0, %s4162_s18  ;;  %4304 = vmatpush3.bf16.msra.mxu1 %v4462_v28  ;;  %v1565_v59 = vld [vmem:[%s5509_s5 + $0x120] sm:$0xff]  ;;  %s279_s18 = sand.u32 1, %s4526_s22  }
  0x1a   : > { %v4428_v4 = vld [vmem:[%s4650_s27] sm:$0xff]   ;;  %v4429_v5 = vld [vmem:[%s4650_s27 + $0x8] sm:$0xff]   ;;  %v4430_v6 = vld [vmem:[%s4650_s27 + $0x10] sm:$0xff]   ;;  %4305 = vmatprep.subr.bf16.mxu1 %v4463_v30  ;;  %v4109_v60 = vcombine.low %v1563_v58, %v1565_v59  ;;  %v4110_v61 = vcombine.high %v1563_v58, %v1565_v59  ;;  %s3988_s19 = sshll.u32 %s279_s18, 6 }
  0x1b   : > { %4235 = vmatprep.mubr.msk.bf16.mxu0 %vm540_vm1, %v4428_v4  ;;  %v4431_v7 = vld [vmem:[%s4650_s27 + $0x18] sm:$0xff]   ;;  %v4432_v8 = vld [vmem:[%s4650_s27 + $0x20] sm:$0xff]   ;;  %v4433_v9 = vld [vmem:[%s4650_s27 + $0x28] sm:$0xff]   ;;  %s5418_s20 = scalar_lea.vmem [#allocation3], %s3988_s19 }
  0x1c   : > { %4236 = vmatmul.mubr.msk.bf16.vlgmr.msra.gmra.mrb[0].mxu0 %vm540_vm1, %v4429_v5  ;;  %v4434_v10 = vld [vmem:[%s4650_s27 + $0x30] sm:$0xff]   ;;  %v4435_v11 = vld [vmem:[%s4650_s27 + $0x38] sm:$0xff]   ;;  %v4436_v12 = vld [vmem:[%s4650_s27 + $0x40] sm:$0xff]   ;;  %s3906_s28 = sshll.u32 %s5418_s20, 4  ;;  %s5453_s28 = int_to_ptr.vmem [resolvable:$true] %s3906_s28 }
  0x1d   : > { %4239 = vmatprep.mubr.msk.bf16.mxu0 %vm540_vm1, %v4430_v6  ;;  %v4437_v13 = vld [vmem:[%s4650_s27 + $0x48] sm:$0xff]   ;;  %v4438_v14 = vld [vmem:[%s4650_s27 + $0x50] sm:$0xff]   ;;  %v4439_v15 = vld [vmem:[%s4650_s27 + $0x58] sm:$0xff]   ;;  %4306 = vmatpush3.bf16.msra.mxu1 %v4463_v30  ;;  %s4464_s12 = scalar_lea.vmem %s5453_s28, 1024  ;;  %p4471_p1 = scmp.lt.s32.totalorder %s5453_s28, %s4469_s14 }
  0x1e   : > { %v4440_v16 = vld [vmem:[%s4650_s27 + $0x60] sm:$0xff]   ;;  %v4441_v17 = vld [vmem:[%s4650_s27 + $0x68] sm:$0xff]   ;;  %v4442_v18 = vld [vmem:[%s4650_s27 + $0x70] sm:$0xff]   ;;  %2092 = vmatprep.subr.bf16.mxu1 %v4096_v45  ;;  %1740 = vmatpush1.bf16.msra.mxu0 %v4093_v41  ;;  %p4465_p12 = scmp.ne.s32.totalorder %s5453_s28, %s4464_s12  ;;  %p4472_p2 = scmp.lt.s32.totalorder %s4470_s15, %s4464_s12 }
  0x1f   : > { %v4443_v19 = vld [vmem:[%s4650_s27 + $0x78] sm:$0xff]   ;;  %v4444_v20 = vld [vmem:[%s4650_s27 + $0x80] sm:$0xff]   ;;  %v4445_v21 = vld [vmem:[%s4650_s27 + $0x88] sm:$0xff]   ;;  %1741 = vmatprep.subr.bf16.mxu0 %v4098_v49 }
  0x20   : > { %v4446_v22 = vld [vmem:[%s4650_s27 + $0x90] sm:$0xff]   ;;  %v4447_v23 = vld [vmem:[%s4650_s27 + $0x98] sm:$0xff]   ;;  %v4448_v24 = vld [vmem:[%s4650_s27 + $0xa0] sm:$0xff]   ;;  %p4466_p13 = pnand %p4465_p12, %p4621_p4  ;;  %p4473_p3 = por %p4472_p2, %p4471_p1 }
  0x21   : > { %v4449_v25 = vld [vmem:[%s4650_s27 + $0xa8] sm:$0xff]   ;;  %v4450_v26 = vld [vmem:[%s4650_s27 + $0xb0] sm:$0xff]   ;;  %v4451_v27 = vld [vmem:[%s4650_s27 + $0xb8] sm:$0xff]  }
  0x22   : > { %v4452_v29 = vld [vmem:[%s4650_s27 + $0xc0] sm:$0xff]   ;;  %v4453_v31 = vld [vmem:[%s4650_s27 + $0xc8] sm:$0xff]   ;;  %v4454_v32 = vld [vmem:[%s4650_s27 + $0xd0] sm:$0xff]   ;;  %1742 = vmatpush1.bf16.msra.mxu0 %v4097_v48  ;;  %p4467_p0 = pneg %p4466_p13 }
  0x23   : > { %v4455_v33 = vld [vmem:[%s4650_s27 + $0xd8] sm:$0xff]   ;;  %v4456_v34 = vld [vmem:[%s4650_s27 + $0xe0] sm:$0xff]   ;;  %v4457_v35 = vld [vmem:[%s4650_s27 + $0xe8] sm:$0xff]   ;;  %1743 = vmatprep.subr.bf16.mxu0 %v4102_v53 }
  0x24   : > { %4240 = vmatmul.mubr.msk.bf16.gmra.mrb[4].mxu0 %vm540_vm1, %v4431_v7  ;;  %v4458_v36 = vld [vmem:[%s4650_s27 + $0xf0] sm:$0xff]   ;;  %v4459_v37 = vld [vmem:[%s4650_s27 + $0xf8] sm:$0xff]   ;;  %v1567_v62 = vld [vmem:[%s5509_s5 + $0x140] sm:$0xff]  ;;  %s4163_s27 = sshll.u32 %s4534_s24, 10  ;;  %s3891_s24 = scalar_lea.sflag [#allocation4], %s279_s18 }
  0x25   : > { %4243 = vmatprep.mubr.msk.bf16.mxu0 %vm540_vm1, %v4432_v8  ;;  %v1569_v63 = vld [vmem:[%s5509_s5 + $0x160] sm:$0xff]  ;;  %v1562_v48 = vld [vmem:[%s5509_s5 + $0xe8] sm:$0xff]  ;;  %s5451_s11 = scalar_lea.hbm %s5510_s6, %s4163_s27  ;;  %p4474_p5 = pnand %p4473_p3, %p4467_p0 }
  0x26   : > { %1744 = vmatpush1.bf16.msra.mxu0 %v4101_v52  ;;  %v4113_v0 = vcombine.low %v1567_v62, %v1569_v63  ;;  %v4114_v1 = vcombine.high %v1567_v62, %v1569_v63  ;;  %v1571_v2 = vld [vmem:[%s5509_s5 + $0x180] sm:$0xff]  ;;  %v4107_v62 = vcombine.low %v1560_v47, %v1562_v48 }
  0x27   : > { %1745 = vmatprep.subr.bf16.mxu0 %v4106_v57  ;;  %v1573_v3 = vld [vmem:[%s5509_s5 + $0x1a0] sm:$0xff] }
  0x28   : > { %v4117_v4 = vcombine.low %v1571_v2, %v1573_v3  ;;  %v4118_v5 = vcombine.high %v1571_v2, %v1573_v3  ;;  %v4781_v6 = vld [vmem:[%s5506_s2] ss:$0 sm:$0xff]  ;;  %v1568_v2 = vld [vmem:[%s5509_s5 + $0x148] sm:$0xff] }
  0x29   : > { %v1575_v8 = vld [vmem:[%s5509_s5 + $0x1c0] sm:$0xff]  ;;  %v1570_v3 = vld [vmem:[%s5509_s5 + $0x168] sm:$0xff] }
  0x2a   : > { %1746 = vmatpush1.bf16.msra.mxu0 %v4105_v56  ;;  %v1566_v56 = vld [vmem:[%s5509_s5 + $0x128] sm:$0xff] }
  0x2b   : > { %1747 = vmatprep.subr.bf16.mxu0 %v4110_v61 }
  0x2c   : > { %4244 = vmatmul.mubr.msk.bf16.gmra.mrb[8].mxu0 %vm540_vm1, %v4433_v9  ;;  %v1577_v9 = vld [vmem:[%s5509_s5 + $0x1e0] sm:$0xff] }
  0x2d   : > { %4247 = vmatprep.mubr.msk.bf16.mxu0 %vm540_vm1, %v4434_v10 }
  0x2e   : > { %1748 = vmatpush1.bf16.msra.mxu0 %v4109_v60 }
  0x2f   : > { %1749 = vmatprep.subr.bf16.mxu0 %v4114_v1 }
  0x32   : > { %1750 = vmatpush1.bf16.msra.mxu0 %v4113_v0  ;;  %v4112_v0 = vcombine.high %v1564_v55, %v1566_v56 }
  0x33   : > { %1751 = vmatprep.subr.bf16.mxu0 %v4118_v5 }
  0x34   : > { %4248 = vmatmul.mubr.msk.bf16.gmra.mrb[12].mxu0 %vm540_vm1, %v4435_v11 }
  0x35   : > { %4251 = vmatprep.mubr.msk.bf16.mxu0 %vm540_vm1, %v4436_v12  ;;  %v4121_v12 = vcombine.low %v1575_v8, %v1577_v9 }
  0x36   : > { %1752 = vmatpush1.bf16.msra.mxu0 %v4117_v4 }
  0x3c   : > { %4252 = vmatmul.mubr.msk.bf16.gmra.mrb[16].mxu0 %vm540_vm1, %v4437_v13  ;;  %v4122_v13 = vcombine.high %v1575_v8, %v1577_v9  ;;  %v4111_v8 = vcombine.low %v1564_v55, %v1566_v56 }
  0x3d   : > { %4255 = vmatprep.mubr.msk.bf16.mxu0 %vm540_vm1, %v4438_v14 }
  0x3e   : > { %1753 = vmatprep.subr.bf16.mxu0 %v4122_v13 }
  0x3f   : > { %1754 = vmatpush1.bf16.msra.mxu0 %v4121_v12 }
  0x44   : > { %4256 = vmatmul.mubr.msk.bf16.gmra.mrb[20].mxu0 %vm540_vm1, %v4439_v15 }
  0x45   : > { %4259 = vmatprep.mubr.msk.bf16.mxu0 %vm540_vm1, %v4440_v16 }
  0x4c   : > { %4260 = vmatmul.mubr.msk.bf16.gmra.mrb[24].mxu0 %vm540_vm1, %v4441_v17 }
  0x4d   : > { %4263 = vmatprep.mubr.msk.bf16.mxu0 %vm540_vm1, %v4442_v18 }
  0x54   : > { %4264 = vmatmul.mubr.msk.bf16.gmra.mrb[28].mxu0 %vm540_vm1, %v4443_v19 }
  0x55   : > { %4267 = vmatprep.mubr.msk.bf16.mxu0 %vm540_vm1, %v4444_v20 }
  0x5c   : > { %4268 = vmatmul.mubr.msk.bf16.gmra.mrb[32].mxu0 %vm540_vm1, %v4445_v21 }
  0x5d   : > { %4271 = vmatprep.mubr.msk.bf16.mxu0 %vm540_vm1, %v4446_v22 }
  0x64   : > { %4272 = vmatmul.mubr.msk.bf16.gmra.mrb[36].mxu0 %vm540_vm1, %v4447_v23  ;;  %v1552_v23 = vld [vmem:[%s5509_s5 + $0x48] sm:$0xff] }
  0x65   : > { %4275 = vmatprep.mubr.msk.bf16.mxu0 %vm540_vm1, %v4448_v24  ;;  %v1554_v24 = vld [vmem:[%s5509_s5 + $0x68] sm:$0xff] }
  0x66   : > { %v4100_v30 = vcombine.high %v1552_v23, %v1554_v24  ;;  %v4099_v41 = vcombine.low %v1552_v23, %v1554_v24 }
  0x6c   : > { %4276 = vmatmul.mubr.msk.bf16.gmra.mrb[40].mxu0 %vm540_vm1, %v4449_v25 }
  0x6d   : > { %4279 = vmatprep.mubr.msk.bf16.mxu0 %vm540_vm1, %v4450_v26 }
  0x74   : > { %4280 = vmatmul.mubr.msk.bf16.gmra.mrb[44].mxu0 %vm540_vm1, %v4451_v27 }
  0x75   : > { %4283 = vmatprep.mubr.msk.bf16.mxu0 %vm540_vm1, %v4452_v29 }
  0x7c   : > { %4284 = vmatmul.mubr.msk.bf16.gmra.mrb[48].mxu0 %vm540_vm1, %v4453_v31 }
  0x7d   : > { %4287 = vmatprep.mubr.msk.bf16.mxu0 %vm540_vm1, %v4454_v32 }
  0x84   : > { %4288 = vmatmul.mubr.msk.bf16.gmra.mrb[52].mxu0 %vm540_vm1, %v4455_v33  ;;  %v1556_v33 = vld [vmem:[%s5509_s5 + $0x88] sm:$0xff] }
  0x85   : > { %4291 = vmatprep.mubr.msk.bf16.mxu0 %vm540_vm1, %v4456_v34  ;;  %v1558_v34 = vld [vmem:[%s5509_s5 + $0xa8] sm:$0xff] }
  0x86   : > { %v4104_v45 = vcombine.high %v1556_v33, %v1558_v34  ;;  %v4103_v52 = vcombine.low %v1556_v33, %v1558_v34 }
  0x8c   : > { %4292 = vmatmul.mubr.msk.bf16.gmra.mrb[56].mxu0 %vm540_vm1, %v4457_v35 }
  0x8d   : > { %4295 = vmatprep.mubr.msk.bf16.mxu0 %vm540_vm1, %v4458_v36 }
  0x94   : > { %4296 = vmatmul.mubr.msk.bf16.gmra.mrb[60].mxu0 %vm540_vm1, %v4459_v37 }
  0xef   : > { %v4237_v7 = vpop.f32.mrb[0].mxu0 }
  0xf0   : > { %v684_v10 = vadd.f32 %v4237_v7, %v4781_v6  ;;  %v675_v11 = vpop.f32.mrb[1].mxu0 }
  0xf1   : > { %v676_v14 = vadd.f32 %v4781_v6, %v675_v11  ;;  %v4238_v15 = vpop.f32.mrb[2].mxu0  ;;  %v4116_v11 = vcombine.high %v1568_v2, %v1570_v3 }
  0xf2   : > { %v687_v16 = vadd.f32 %v4238_v15, %v4781_v6  ;;  %v678_v17 = vpop.f32.mrb[3].mxu0  ;;  %v932_v19 = vmax.f32 %v684_v10, 0.0  ;;  %v1574_v15 = vld [vmem:[%s5509_s5 + $0x1a8] sm:$0xff] }
  0xf3   : > { %v679_v18 = vadd.f32 %v4781_v6, %v678_v17  ;;  %v930_v21 = vmax.f32 %v676_v14, 0.0  ;;  %v1572_v14 = vld [vmem:[%s5509_s5 + $0x188] sm:$0xff] }
  0xf4   : > { %v933_v20 = vmax.f32 %v687_v16, 0.0  ;;  %v4120_v23 = vcombine.high %v1572_v14, %v1574_v15 }
  0xf5   : > { %v931_v22 = vmax.f32 %v679_v18, 0.0 }
  0xf6   : > { %v995_v25 = vpack.c.bf16 %v933_v20, %v932_v19 }
  0xf7   : > { %v4241_v26 = vpop.f32.mrb[4].mxu0  ;;  %v994_v27 = vpack.c.bf16 %v931_v22, %v930_v21  ;;  %v4115_v21 = vcombine.low %v1568_v2, %v1570_v3 }
  0xf8   : > { %v700_v28 = vadd.f32 %v4241_v26, %v4781_v6  ;;  %v691_v29 = vpop.f32.mrb[5].mxu0  ;;  %v1578_v26 = vld [vmem:[%s5509_s5 + $0x1e8] sm:$0xff] }
  0xf9   : > { %v692_v31 = vadd.f32 %v4781_v6, %v691_v29  ;;  %4307 = vmatprep.mubr.msk.bf16.mxu1 %vm1065_vm2, %v994_v27  ;;  %v4242_v32 = vpop.f32.mrb[6].mxu0 }
  0xfa   : > { %v936_v35 = vmax.f32 %v700_v28, 0.0  ;;  %v703_v36 = vadd.f32 %v4242_v32, %v4781_v6  ;;  %4308 = vmatmul.mubr.msk.bf16.vlgmr.msra.gmra.mrb[0].mxu1 %vm1065_vm2, %v995_v25  ;;  %v694_v37 = vpop.f32.mrb[7].mxu0  ;;  %v1576_v25 = vld [vmem:[%s5509_s5 + $0x1c8] sm:$0xff] }
  0xfb   : > { %v934_v38 = vmax.f32 %v692_v31, 0.0  ;;  %v695_v39 = vadd.f32 %v4781_v6, %v694_v37  ;;  %2093 = vmatpush1.bf16.msra.mxu1 %v4095_v44  ;;  %v4108_v44 = vcombine.high %v1560_v47, %v1562_v48  ;;  %v4124_v33 = vcombine.high %v1576_v25, %v1578_v26 }
  0xfc   : > { %v937_v42 = vmax.f32 %v703_v36, 0.0  ;;  %2094 = vmatprep.subr.bf16.mxu1 %v4100_v30  ;;  %v4119_v30 = vcombine.low %v1572_v14, %v1574_v15 }
  0xfd   : > { %v935_v46 = vmax.f32 %v695_v39, 0.0 }
  0xfe   : > { %v997_v49 = vpack.c.bf16 %v937_v42, %v936_v35  ;;  %v4123_v42 = vcombine.low %v1576_v25, %v1578_v26 }
  0xff   : > { %v996_v50 = vpack.c.bf16 %v935_v46, %v934_v38  ;;  %v4245_v51 = vpop.f32.mrb[8].mxu0  ;;  %2095 = vmatpush1.bf16.msra.mxu1 %v4099_v41 }
 0x100   : > { %v716_v40 = vadd.f32 %v4245_v51, %v4781_v6  ;;  %v707_v43 = vpop.f32.mrb[9].mxu0  ;;  %2096 = vmatprep.subr.bf16.mxu1 %v4104_v45 }
 0x101   : > { %4311 = vmatprep.mubr.msk.bf16.mxu1 %vm1065_vm2, %v996_v50  ;;  %v708_v53 = vadd.f32 %v4781_v6, %v707_v43  ;;  %v4246_v54 = vpop.f32.mrb[10].mxu0 }
 0x102   : > { %4312 = vmatmul.mubr.msk.bf16.gmra.mrb[4].mxu1 %vm1065_vm2, %v997_v49  ;;  %v940_v57 = vmax.f32 %v716_v40, 0.0  ;;  %v719_v58 = vadd.f32 %v4246_v54, %v4781_v6  ;;  %v710_v59 = vpop.f32.mrb[11].mxu0 }
 0x103   : > { %v938_v60 = vmax.f32 %v708_v53, 0.0  ;;  %v711_v61 = vadd.f32 %v4781_v6, %v710_v59  ;;  %2097 = vmatpush1.bf16.msra.mxu1 %v4103_v52 }
 0x104   : > { %v941_v63 = vmax.f32 %v719_v58, 0.0  ;;  %2098 = vmatprep.subr.bf16.mxu1 %v4108_v44 }
 0x105   : > { %v939_v1 = vmax.f32 %v711_v61, 0.0 }
 0x106   : > { %v999_v4 = vpack.c.bf16 %v941_v63, %v940_v57 }
 0x107   : > { %v998_v5 = vpack.c.bf16 %v939_v1, %v938_v60  ;;  %v4249_v7 = vpop.f32.mrb[12].mxu0  ;;  %2099 = vmatpush1.bf16.msra.mxu1 %v4107_v62 }
 0x108   : > { %v732_v9 = vadd.f32 %v4249_v7, %v4781_v6  ;;  %v723_v10 = vpop.f32.mrb[13].mxu0  ;;  %2100 = vmatprep.subr.bf16.mxu1 %v4112_v0 }
 0x109   : > { %4315 = vmatprep.mubr.msk.bf16.mxu1 %vm1065_vm2, %v998_v5  ;;  %v724_v12 = vadd.f32 %v4781_v6, %v723_v10  ;;  %v4250_v13 = vpop.f32.mrb[14].mxu0 }
 0x10a   : > { %4316 = vmatmul.mubr.msk.bf16.gmra.mrb[8].mxu1 %vm1065_vm2, %v999_v4  ;;  %v944_v16 = vmax.f32 %v732_v9, 0.0  ;;  %v735_v17 = vadd.f32 %v4250_v13, %v4781_v6  ;;  %v726_v18 = vpop.f32.mrb[15].mxu0 }
 0x10b   : > { %v942_v19 = vmax.f32 %v724_v12, 0.0  ;;  %v727_v20 = vadd.f32 %v4781_v6, %v726_v18  ;;  %2101 = vmatpush1.bf16.msra.mxu1 %v4111_v8 }
 0x10c   : > { %v945_v22 = vmax.f32 %v735_v17, 0.0  ;;  %2102 = vmatprep.subr.bf16.mxu1 %v4116_v11 }
 0x10d   : > { %v943_v24 = vmax.f32 %v727_v20, 0.0 }
 0x10e   : > { %v1001_v27 = vpack.c.bf16 %v945_v22, %v944_v16 }
 0x10f   : > { %v1000_v28 = vpack.c.bf16 %v943_v24, %v942_v19  ;;  %v4253_v29 = vpop.f32.mrb[16].mxu0  ;;  %2103 = vmatpush1.bf16.msra.mxu1 %v4115_v21 }
 0x110   : > { %v748_v31 = vadd.f32 %v4253_v29, %v4781_v6  ;;  %v739_v32 = vpop.f32.mrb[17].mxu0  ;;  %2104 = vmatprep.subr.bf16.mxu1 %v4120_v23 }
 0x111   : > { %4319 = vmatprep.mubr.msk.bf16.mxu1 %vm1065_vm2, %v1000_v28  ;;  %v740_v34 = vadd.f32 %v4781_v6, %v739_v32  ;;  %v4254_v35 = vpop.f32.mrb[18].mxu0 }
 0x112   : > { %4320 = vmatmul.mubr.msk.bf16.gmra.mrb[12].mxu1 %vm1065_vm2, %v1001_v27  ;;  %v948_v36 = vmax.f32 %v748_v31, 0.0  ;;  %v751_v37 = vadd.f32 %v4254_v35, %v4781_v6  ;;  %v742_v38 = vpop.f32.mrb[19].mxu0 }
 0x113   : > { %v946_v39 = vmax.f32 %v740_v34, 0.0  ;;  %v743_v41 = vadd.f32 %v4781_v6, %v742_v38  ;;  %2105 = vmatpush1.bf16.msra.mxu1 %v4119_v30 }
 0x114   : > { %v949_v45 = vmax.f32 %v751_v37, 0.0  ;;  %2106 = vmatprep.subr.bf16.mxu1 %v4124_v33 }
 0x115   : > { %v947_v46 = vmax.f32 %v743_v41, 0.0 }
 0x116   : > { %v1003_v47 = vpack.c.bf16 %v949_v45, %v948_v36 }
 0x117   : > { %v1002_v48 = vpack.c.bf16 %v947_v46, %v946_v39  ;;  %v4257_v49 = vpop.f32.mrb[20].mxu0  ;;  %2107 = vmatpush1.bf16.msra.mxu1 %v4123_v42 }
 0x118   : > { %v764_v50 = vadd.f32 %v4257_v49, %v4781_v6  ;;  %v755_v51 = vpop.f32.mrb[21].mxu0 }
 0x119   : > { %4323 = vmatprep.mubr.msk.bf16.mxu1 %vm1065_vm2, %v1002_v48  ;;  %v756_v52 = vadd.f32 %v4781_v6, %v755_v51  ;;  %v4258_v40 = vpop.f32.mrb[22].mxu0 }
 0x11a   : > { %4324 = vmatmul.mubr.msk.bf16.gmra.mrb[16].mxu1 %vm1065_vm2, %v1003_v47  ;;  %v952_v43 = vmax.f32 %v764_v50, 0.0  ;;  %v767_v44 = vadd.f32 %v4258_v40, %v4781_v6  ;;  %v758_v53 = vpop.f32.mrb[23].mxu0 }
 0x11b   : > { %v950_v54 = vmax.f32 %v756_v52, 0.0  ;;  %v759_v55 = vadd.f32 %v4781_v6, %v758_v53 }
 0x11c   : > { %v953_v56 = vmax.f32 %v767_v44, 0.0 }
 0x11d   : > { %v951_v57 = vmax.f32 %v759_v55, 0.0 }
 0x11e   : > { %v1005_v58 = vpack.c.bf16 %v953_v56, %v952_v43 }
 0x11f   : > { %v1004_v59 = vpack.c.bf16 %v951_v57, %v950_v54  ;;  %v4261_v60 = vpop.f32.mrb[24].mxu0 }
 0x120   : > { %v780_v61 = vadd.f32 %v4261_v60, %v4781_v6  ;;  %v771_v62 = vpop.f32.mrb[25].mxu0 }
 0x121   : > { %4327 = vmatprep.mubr.msk.bf16.mxu1 %vm1065_vm2, %v1004_v59  ;;  %v772_v63 = vadd.f32 %v4781_v6, %v771_v62  ;;  %v4262_v0 = vpop.f32.mrb[26].mxu0 }
 0x122   : > { %4328 = vmatmul.mubr.msk.bf16.gmra.mrb[20].mxu1 %vm1065_vm2, %v1005_v58  ;;  %v956_v1 = vmax.f32 %v780_v61, 0.0  ;;  %v783_v2 = vadd.f32 %v4262_v0, %v4781_v6  ;;  %v774_v3 = vpop.f32.mrb[27].mxu0 }
 0x123   : > { %v954_v4 = vmax.f32 %v772_v63, 0.0  ;;  %v775_v5 = vadd.f32 %v4781_v6, %v774_v3 }
 0x124   : > { %v957_v7 = vmax.f32 %v783_v2, 0.0 }
 0x125   : > { %v955_v8 = vmax.f32 %v775_v5, 0.0 }
 0x126   : > { %v1007_v9 = vpack.c.bf16 %v957_v7, %v956_v1 }
 0x127   : > { %v1006_v10 = vpack.c.bf16 %v955_v8, %v954_v4  ;;  %v4265_v11 = vpop.f32.mrb[28].mxu0 }
 0x128   : > { %v796_v12 = vadd.f32 %v4265_v11, %v4781_v6  ;;  %v787_v13 = vpop.f32.mrb[29].mxu0 }
 0x129   : > { %4331 = vmatprep.mubr.msk.bf16.mxu1 %vm1065_vm2, %v1006_v10  ;;  %v788_v14 = vadd.f32 %v4781_v6, %v787_v13  ;;  %v4266_v15 = vpop.f32.mrb[30].mxu0 }
 0x12a   : > { %4332 = vmatmul.mubr.msk.bf16.gmra.mrb[24].mxu1 %vm1065_vm2, %v1007_v9  ;;  %v960_v16 = vmax.f32 %v796_v12, 0.0  ;;  %v799_v17 = vadd.f32 %v4266_v15, %v4781_v6  ;;  %v790_v18 = vpop.f32.mrb[31].mxu0 }
 0x12b   : > { %v958_v19 = vmax.f32 %v788_v14, 0.0  ;;  %v791_v20 = vadd.f32 %v4781_v6, %v790_v18 }
 0x12c   : > { %v961_v21 = vmax.f32 %v799_v17, 0.0 }
 0x12d   : > { %v959_v22 = vmax.f32 %v791_v20, 0.0 }
 0x12e   : > { %v1009_v23 = vpack.c.bf16 %v961_v21, %v960_v16 }
 0x12f   : > { %v1008_v24 = vpack.c.bf16 %v959_v22, %v958_v19  ;;  %v4269_v25 = vpop.f32.mrb[32].mxu0 }
 0x130   : > { %v812_v26 = vadd.f32 %v4269_v25, %v4781_v6  ;;  %v803_v27 = vpop.f32.mrb[33].mxu0 }
 0x131   : > { %4335 = vmatprep.mubr.msk.bf16.mxu1 %vm1065_vm2, %v1008_v24  ;;  %v804_v28 = vadd.f32 %v4781_v6, %v803_v27  ;;  %v4270_v29 = vpop.f32.mrb[34].mxu0 }
 0x132   : > { %4336 = vmatmul.mubr.msk.bf16.gmra.mrb[28].mxu1 %vm1065_vm2, %v1009_v23  ;;  %v964_v30 = vmax.f32 %v812_v26, 0.0  ;;  %v815_v31 = vadd.f32 %v4270_v29, %v4781_v6  ;;  %v806_v32 = vpop.f32.mrb[35].mxu0 }
 0x133   : > { %v962_v33 = vmax.f32 %v804_v28, 0.0  ;;  %v807_v34 = vadd.f32 %v4781_v6, %v806_v32 }
 0x134   : > { %v965_v35 = vmax.f32 %v815_v31, 0.0  ;;  %v4544_v31 = vmov 0  }
 0x135   : > { %v963_v36 = vmax.f32 %v807_v34, 0.0  ;;  %1771 = vmatprep.mubr.bf16.mxu0 %v4544_v31 }
 0x136   : > { %v1011_v37 = vpack.c.bf16 %v965_v35, %v964_v30 }
 0x137   : > { %v1010_v38 = vpack.c.bf16 %v963_v36, %v962_v33  ;;  %v4273_v39 = vpop.f32.mrb[36].mxu0  ;;  %v4915_v36 = vld [vmem:[%s5509_s5 + $0x10] sm:$0xff] }
 0x138   : > { %v828_v41 = vadd.f32 %v4273_v39, %v4781_v6  ;;  %v819_v42 = vpop.f32.mrb[37].mxu0 }
 0x139   : > { %4339 = vmatprep.mubr.msk.bf16.mxu1 %vm1065_vm2, %v1010_v38  ;;  %v820_v45 = vadd.f32 %v4781_v6, %v819_v42  ;;  %v4274_v46 = vpop.f32.mrb[38].mxu0  ;;  %v4925_v38 = vld [vmem:[%s5509_s5 + $0x18] sm:$0xff] }
 0x13a   : > { %4340 = vmatmul.mubr.msk.bf16.gmra.mrb[32].mxu1 %vm1065_vm2, %v1011_v37  ;;  %v968_v47 = vmax.f32 %v828_v41, 0.0  ;;  %v831_v48 = vadd.f32 %v4274_v46, %v4781_v6  ;;  %v822_v49 = vpop.f32.mrb[39].mxu0  ;;  %v4920_v37 = vld [vmem:[%s5509_s5 + $0x30] sm:$0xff]  ;;  %v4936_v46 = vld [vmem:[%s5509_s5 + $0x38] sm:$0xff] }
 0x13b   : > { %v966_v50 = vmax.f32 %v820_v45, 0.0  ;;  %v823_v51 = vadd.f32 %v4781_v6, %v822_v49  ;;  %v4125_v42 = vcombine.low %v4915_v36, %v4920_v37  ;;  %v4126_v45 = vcombine.high %v4915_v36, %v4920_v37  ;;  %v2721_v37 = vld [vmem:[%s5509_s5 + $0xd0] sm:$0xff] }
 0x13c   : > { %v969_v52 = vmax.f32 %v831_v48, 0.0 }
 0x13d   : > { %v967_v40 = vmax.f32 %v823_v51, 0.0  ;;  %v4128_v51 = vcombine.high %v4925_v38, %v4936_v46  ;;  %2901 = vmatprep.subr.bf16.mxu0 %v4126_v45 }
 0x13e   : > { %v1013_v43 = vpack.c.bf16 %v969_v52, %v968_v47 }
 0x13f   : > { %v1012_v44 = vpack.c.bf16 %v967_v40, %v966_v50  ;;  %v4277_v53 = vpop.f32.mrb[40].mxu0  ;;  %v4127_v50 = vcombine.low %v4925_v38, %v4936_v46  ;;  %3254 = vmatprep.subr.bf16.mxu1 %v4128_v51  ;;  %v2722_v46 = vld [vmem:[%s5509_s5 + $0xd8] sm:$0xff] }
 0x140   : > { %v844_v54 = vadd.f32 %v4277_v53, %v4781_v6  ;;  %v835_v55 = vpop.f32.mrb[41].mxu0 }
 0x141   : > { %4343 = vmatprep.mubr.msk.bf16.mxu1 %vm1065_vm2, %v1012_v44  ;;  %v836_v56 = vadd.f32 %v4781_v6, %v835_v55  ;;  %v4278_v57 = vpop.f32.mrb[42].mxu0 }
 0x142   : > { %4344 = vmatmul.mubr.msk.bf16.gmra.mrb[36].mxu1 %vm1065_vm2, %v1013_v43  ;;  %v972_v58 = vmax.f32 %v844_v54, 0.0  ;;  %v847_v59 = vadd.f32 %v4278_v57, %v4781_v6  ;;  %v838_v60 = vpop.f32.mrb[43].mxu0 }
 0x143   : > { %v970_v61 = vmax.f32 %v836_v56, 0.0  ;;  %v839_v62 = vadd.f32 %v4781_v6, %v838_v60 }
 0x144   : > { %v973_v63 = vmax.f32 %v847_v59, 0.0 }
 0x145   : > { %v971_v0 = vmax.f32 %v839_v62, 0.0 }
 0x146   : > { %v1015_v1 = vpack.c.bf16 %v973_v63, %v972_v58 }
 0x147   : > { %v1014_v2 = vpack.c.bf16 %v971_v0, %v970_v61  ;;  %v4281_v3 = vpop.f32.mrb[44].mxu0 }
 0x148   : > { %v860_v4 = vadd.f32 %v4281_v3, %v4781_v6  ;;  %v851_v5 = vpop.f32.mrb[45].mxu0 }
 0x149   : > { %4347 = vmatprep.mubr.msk.bf16.mxu1 %vm1065_vm2, %v1014_v2  ;;  %v852_v7 = vadd.f32 %v4781_v6, %v851_v5  ;;  %v4282_v8 = vpop.f32.mrb[46].mxu0 }
 0x14a   : > { %4348 = vmatmul.mubr.msk.bf16.gmra.mrb[40].mxu1 %vm1065_vm2, %v1015_v1  ;;  %v976_v9 = vmax.f32 %v860_v4, 0.0  ;;  %v863_v10 = vadd.f32 %v4282_v8, %v4781_v6  ;;  %v854_v11 = vpop.f32.mrb[47].mxu0 }
 0x14b   : > { %v974_v12 = vmax.f32 %v852_v7, 0.0  ;;  %v855_v13 = vadd.f32 %v4781_v6, %v854_v11 }
 0x14c   : > { %v977_v14 = vmax.f32 %v863_v10, 0.0 }
 0x14d   : > { %v975_v15 = vmax.f32 %v855_v13, 0.0 }
 0x14e   : > { %v1017_v16 = vpack.c.bf16 %v977_v14, %v976_v9 }
 0x14f   : > { %v1016_v17 = vpack.c.bf16 %v975_v15, %v974_v12  ;;  %v4285_v18 = vpop.f32.mrb[48].mxu0 }
 0x150   : > { %v876_v19 = vadd.f32 %v4285_v18, %v4781_v6  ;;  %v867_v20 = vpop.f32.mrb[49].mxu0 }
 0x151   : > { %4351 = vmatprep.mubr.msk.bf16.mxu1 %vm1065_vm2, %v1016_v17  ;;  %v868_v21 = vadd.f32 %v4781_v6, %v867_v20  ;;  %v4286_v22 = vpop.f32.mrb[50].mxu0  ;;  %v4963_v20 = vld [vmem:[%s5508_s4] ss:$0 sm:$0xff] }
 0x152   : > { %4352 = vmatmul.mubr.msk.bf16.gmra.mrb[44].mxu1 %vm1065_vm2, %v1017_v16  ;;  %v980_v23 = vmax.f32 %v876_v19, 0.0  ;;  %v879_v24 = vadd.f32 %v4286_v22, %v4781_v6  ;;  %v870_v25 = vpop.f32.mrb[51].mxu0 }
 0x153   : > { %v978_v26 = vmax.f32 %v868_v21, 0.0  ;;  %v871_v27 = vadd.f32 %v4781_v6, %v870_v25 }
 0x154   : > { %v981_v28 = vmax.f32 %v879_v24, 0.0 }
 0x155   : > { %v979_v29 = vmax.f32 %v871_v27, 0.0 }
 0x156   : > { %v1019_v30 = vpack.c.bf16 %v981_v28, %v980_v23 }
 0x157   : > { %v1018_v32 = vpack.c.bf16 %v979_v29, %v978_v26  ;;  %v4289_v33 = vpop.f32.mrb[52].mxu0 }
 0x158   : > { %v892_v34 = vadd.f32 %v4289_v33, %v4781_v6  ;;  %v883_v35 = vpop.f32.mrb[53].mxu0 }
 0x159   : > { %v884_v39 = vadd.f32 %v4781_v6, %v883_v35  ;;  %v4290_v41 = vpop.f32.mrb[54].mxu0  ;;  %4355 = vmatprep.mubr.msk.bf16.mxu1 %vm1065_vm2, %v1018_v32  ;;  %v2714_v35 = vld [vmem:[%s5509_s5 + $0x58] sm:$0xff] }
 0x15a   : > { %v984_v47 = vmax.f32 %v892_v34, 0.0  ;;  %v895_v48 = vadd.f32 %v4290_v41, %v4781_v6  ;;  %v886_v49 = vpop.f32.mrb[55].mxu0  ;;  %4356 = vmatmul.mubr.msk.bf16.gmra.mrb[48].mxu1 %vm1065_vm2, %v1019_v30  ;;  %v2713_v30 = vld [vmem:[%s5509_s5 + $0x50] sm:$0xff] }
 0x15b   : > { %v982_v52 = vmax.f32 %v884_v39, 0.0  ;;  %v887_v40 = vadd.f32 %v4781_v6, %v886_v49  ;;  %v2715_v34 = vld [vmem:[%s5509_s5 + $0x70] sm:$0xff]  ;;  %v2716_v39 = vld [vmem:[%s5509_s5 + $0x78] sm:$0xff] }
 0x15c   : > { %v985_v43 = vmax.f32 %v895_v48, 0.0  ;;  %v2717_v48 = vld [vmem:[%s5509_s5 + $0x90] sm:$0xff] }
 0x15d   : > { %v983_v44 = vmax.f32 %v887_v40, 0.0  ;;  %v4132_v40 = vcombine.high %v2714_v35, %v2716_v39 }
 0x15e   : > { %v1021_v53 = vpack.c.bf16 %v985_v43, %v984_v47  ;;  %v2719_v43 = vld [vmem:[%s5509_s5 + $0xb0] sm:$0xff] }
 0x15f   : > { %v1020_v54 = vpack.c.bf16 %v983_v44, %v982_v52  ;;  %v4293_v55 = vpop.f32.mrb[56].mxu0  ;;  %v4130_v52 = vcombine.high %v2713_v30, %v2715_v34  ;;  %v2718_v44 = vld [vmem:[%s5509_s5 + $0x98] sm:$0xff] }
 0x160   : > { %v908_v56 = vadd.f32 %v4293_v55, %v4781_v6  ;;  %v899_v57 = vpop.f32.mrb[57].mxu0 }
 0x161   : > { %v900_v58 = vadd.f32 %v4781_v6, %v899_v57  ;;  %v4294_v59 = vpop.f32.mrb[58].mxu0  ;;  %4359 = vmatprep.mubr.msk.bf16.mxu1 %vm1065_vm2, %v1020_v54 }
 0x162   : > { %v988_v60 = vmax.f32 %v908_v56, 0.0  ;;  %v911_v61 = vadd.f32 %v4294_v59, %v4781_v6  ;;  %v902_v62 = vpop.f32.mrb[59].mxu0  ;;  %4360 = vmatmul.mubr.msk.bf16.gmra.mrb[52].mxu1 %vm1065_vm2, %v1021_v53  ;;  %v2720_v53 = vld [vmem:[%s5509_s5 + $0xb8] sm:$0xff]  ;;  %v4129_v59 = vcombine.low %v2713_v30, %v2715_v34 }
 0x163   : > { %v986_v63 = vmax.f32 %v900_v58, 0.0  ;;  %v903_v0 = vadd.f32 %v4781_v6, %v902_v62 }
 0x164   : > { %v989_v1 = vmax.f32 %v911_v61, 0.0 }
 0x165   : > { %v987_v2 = vmax.f32 %v903_v0, 0.0  ;;  %v4136_v0 = vcombine.high %v2718_v44, %v2720_v53 }
 0x166   : > { %v1023_v3 = vpack.c.bf16 %v989_v1, %v988_v60  ;;  %v4131_v60 = vcombine.low %v2714_v35, %v2716_v39 }
 0x167   : > { %v1022_v4 = vpack.c.bf16 %v987_v2, %v986_v63  ;;  %v4297_v5 = vpop.f32.mrb[60].mxu0  ;;  %v4134_v63 = vcombine.high %v2717_v48, %v2719_v43 }
 0x168   : > { %v924_v7 = vadd.f32 %v4297_v5, %v4781_v6  ;;  %v915_v8 = vpop.f32.mrb[61].mxu0  ;;  %v4135_v5 = vcombine.low %v2718_v44, %v2720_v53 }
 0x169   : > { %v916_v9 = vadd.f32 %v4781_v6, %v915_v8  ;;  %v4298_v10 = vpop.f32.mrb[62].mxu0  ;;  %4363 = vmatprep.mubr.msk.bf16.mxu1 %vm1065_vm2, %v1022_v4  ;;  %v4133_v4 = vcombine.low %v2717_v48, %v2719_v43 }
 0x16a   : > { %v992_v11 = vmax.f32 %v924_v7, 0.0  ;;  %v927_v12 = vadd.f32 %v4298_v10, %v4781_v6  ;;  %v918_v13 = vpop.f32.mrb[63].mxu0  ;;  %4364 = vmatmul.mubr.msk.bf16.gmra.mrb[56].mxu1 %vm1065_vm2, %v1023_v3 }
 0x16b   : > { %v990_v14 = vmax.f32 %v916_v9, 0.0  ;;  %v919_v15 = vadd.f32 %v4781_v6, %v918_v13 }
 0x16c   : > { %v993_v16 = vmax.f32 %v927_v12, 0.0 }
 0x16d   : > { %v991_v17 = vmax.f32 %v919_v15, 0.0  ;;  %v2726_v15 = vld [vmem:[%s5509_s5 + $0x118] sm:$0xff] }
 0x16e   : > { %v1025_v18 = vpack.c.bf16 %v993_v16, %v992_v11  ;;  %v2725_v11 = vld [vmem:[%s5509_s5 + $0x110] sm:$0xff]  ;;  %v2728_v16 = vld [vmem:[%s5509_s5 + $0x138] sm:$0xff] }
 0x16f   : > { %v1024_v19 = vpack.c.bf16 %v991_v17, %v990_v14  ;;  %v2727_v14 = vld [vmem:[%s5509_s5 + $0x130] sm:$0xff] }
 0x171   : > { %4367 = vmatprep.mubr.msk.bf16.mxu1 %vm1065_vm2, %v1024_v19 }
 0x172   : > { %4368 = vmatmul.mubr.msk.bf16.gmra.mrb[60].mxu1 %vm1065_vm2, %v1025_v18 }
 0x173   : > { %2124 = vmatprep.mubr.bf16.mxu1 %v4544_v31 }
 0x1cd   : > { %v4309_v21 = vpop.f32.mrb[0].mxu1 }
 0x1ce   : > { %v1205_v22 = vadd.f32 %v4309_v21, %v4963_v20  ;;  %v1196_v23 = vpop.f32.mrb[1].mxu1 }
 0x1cf   : > { %v1197_v6 = vadd.f32 %v4963_v20, %v1196_v23  ;;  %v4310_v24 = vpop.f32.mrb[2].mxu1 }
 0x1d0   : > { %v1208_v25 = vadd.f32 %v4310_v24, %v4963_v20  ;;  %v1199_v26 = vpop.f32.mrb[3].mxu1  ;;  %v1453_v28 = vmax.f32 %v1205_v22, 0.0 }
 0x1d1   : > { %v1200_v27 = vadd.f32 %v4963_v20, %v1199_v26  ;;  %v1451_v32 = vmax.f32 %v1197_v6, 0.0  ;;  %v4144_v26 = vcombine.high %v2726_v15, %v2728_v16 }
 0x1d2   : > { %v1454_v29 = vmax.f32 %v1208_v25, 0.0  ;;  %v4142_v25 = vcombine.high %v2725_v11, %v2727_v14 }
 0x1d3   : > { %v1452_v33 = vmax.f32 %v1200_v27, 0.0 }
 0x1d4   : > { %v4981_v41 = vpack.c.bf16 %v1454_v29, %v1453_v28 }
 0x1d5   : > { %v4983_v45 = vpack.c.bf16 %v1452_v33, %v1451_v32  ;;  %v4313_v47 = vpop.f32.mrb[4].mxu1  ;;  %v4141_v32 = vcombine.low %v2725_v11, %v2727_v14  ;;  %v4143_v33 = vcombine.low %v2726_v15, %v2728_v16 }
 0x1d6   : > { %v1221_v49 = vadd.f32 %v4313_v47, %v4963_v20  ;;  %v1212_v51 = vpop.f32.mrb[5].mxu1 }
 0x1d7   : > { %v1213_v54 = vadd.f32 %v4963_v20, %v1212_v51  ;;  %1772 = vmatmul.mubr.bf16.vlgmr.msra.gmra.mrb[64].mxu0 %v4983_v45  ;;  %2125 = vmatmul.mubr.bf16.vlgmr.msra.gmra.mrb[64].mxu1 %v4983_v45  ;;  %v4314_v55 = vpop.f32.mrb[6].mxu1 }
 0x1d8   : > { %v1457_v56 = vmax.f32 %v1221_v49, 0.0  ;;  %2902 = vmatpush1.bf16.msra.mxu0 %v4125_v42  ;;  %3255 = vmatpush1.bf16.msra.mxu1 %v4127_v50  ;;  %v1224_v57 = vadd.f32 %v4314_v55, %v4963_v20  ;;  %v1215_v58 = vpop.f32.mrb[7].mxu1  ;;  %v2723_v42 = vld [vmem:[%s5509_s5 + $0xf0] sm:$0xff]  ;;  %v2724_v50 = vld [vmem:[%s5509_s5 + $0xf8] sm:$0xff] }
 0x1d9   : > { %v1455_v61 = vmax.f32 %v1213_v54, 0.0  ;;  %v1216_v62 = vadd.f32 %v4963_v20, %v1215_v58  ;;  %1781 = vmatprep.mubr.bf16.mxu0 %v4544_v31  ;;  %2134 = vmatprep.mubr.bf16.mxu1 %v4544_v31  ;;  %v4138_v9 = vcombine.high %v2721_v37, %v2723_v42  ;;  %v4140_v10 = vcombine.high %v2722_v46, %v2724_v50 }
 0x1da   : > { %v1458_v36 = vmax.f32 %v1224_v57, 0.0  ;;  %2903 = vmatprep.subr.bf16.mxu0 %v4130_v52  ;;  %3256 = vmatprep.subr.bf16.mxu1 %v4132_v40  ;;  %v4137_v23 = vcombine.low %v2721_v37, %v2723_v42  ;;  %v4139_v6 = vcombine.low %v2722_v46, %v2724_v50  ;;  %v2732_v50 = vld [vmem:[%s5509_s5 + $0x178] sm:$0xff] }
 0x1db   : > { %v1456_v38 = vmax.f32 %v1216_v62, 0.0 }
 0x1dc   : > { %v5023_v1 = vpack.c.bf16 %v1458_v36, %v1457_v56  ;;  %2904 = vmatpush1.bf16.msra.mxu0 %v4129_v59  ;;  %3257 = vmatpush1.bf16.msra.mxu1 %v4131_v60  ;;  %v2730_v36 = vld [vmem:[%s5509_s5 + $0x158] sm:$0xff] }
 0x1dd   : > { %v5025_v2 = vpack.c.bf16 %v1456_v38, %v1455_v61  ;;  %v4317_v3 = vpop.f32.mrb[8].mxu1  ;;  %2905 = vmatprep.subr.bf16.mxu0 %v4134_v63  ;;  %3258 = vmatprep.subr.bf16.mxu1 %v4136_v0  ;;  %v2729_v63 = vld [vmem:[%s5509_s5 + $0x150] sm:$0xff] }
 0x1de   : > { %v1237_v7 = vadd.f32 %v4317_v3, %v4963_v20  ;;  %v1228_v8 = vpop.f32.mrb[9].mxu1  ;;  %v2731_v0 = vld [vmem:[%s5509_s5 + $0x170] sm:$0xff] }
 0x1df   : > { %1782 = vmatmul.mubr.bf16.gmra.mrb[68].mxu0 %v4981_v41  ;;  %2135 = vmatmul.mubr.bf16.gmra.mrb[68].mxu1 %v4981_v41  ;;  %v1229_v12 = vadd.f32 %v4963_v20, %v1228_v8  ;;  %v4318_v13 = vpop.f32.mrb[10].mxu1  ;;  %v4145_v42 = vcombine.low %v2729_v63, %v2731_v0  ;;  %v4146_v46 = vcombine.high %v2729_v63, %v2731_v0 }
 0x1e0   : > { %v1461_v17 = vmax.f32 %v1237_v7, 0.0  ;;  %1791 = vmatprep.mubr.bf16.mxu0 %v4544_v31  ;;  %2144 = vmatprep.mubr.bf16.mxu1 %v4544_v31  ;;  %v1240_v18 = vadd.f32 %v4318_v13, %v4963_v20  ;;  %v1231_v19 = vpop.f32.mrb[11].mxu1 }
 0x1e1   : > { %v1459_v21 = vmax.f32 %v1229_v12, 0.0  ;;  %v1232_v22 = vadd.f32 %v4963_v20, %v1231_v19  ;;  %2906 = vmatpush1.bf16.msra.mxu0 %v4133_v4  ;;  %3259 = vmatpush1.bf16.msra.mxu1 %v4135_v5  ;;  %v4147_v4 = vcombine.low %v2730_v36, %v2732_v50  ;;  %v4148_v5 = vcombine.high %v2730_v36, %v2732_v50 }
 0x1e2   : > { %v1462_v24 = vmax.f32 %v1240_v18, 0.0  ;;  %2907 = vmatprep.subr.bf16.mxu0 %v4138_v9  ;;  %3260 = vmatprep.subr.bf16.mxu1 %v4140_v10 }
 0x1e3   : > { %v1460_v27 = vmax.f32 %v1232_v22, 0.0 }
 0x1e4   : > { %v5047_v28 = vpack.c.bf16 %v1462_v24, %v1461_v17 }
 0x1e5   : > { %v5049_v29 = vpack.c.bf16 %v1460_v27, %v1459_v21  ;;  %v4321_v30 = vpop.f32.mrb[12].mxu1  ;;  %2908 = vmatpush1.bf16.msra.mxu0 %v4137_v23  ;;  %3261 = vmatpush1.bf16.msra.mxu1 %v4139_v6 }
 0x1e6   : > { %v1253_v34 = vadd.f32 %v4321_v30, %v4963_v20  ;;  %v1244_v35 = vpop.f32.mrb[13].mxu1  ;;  %2909 = vmatprep.subr.bf16.mxu0 %v4142_v25  ;;  %3262 = vmatprep.subr.bf16.mxu1 %v4144_v26 }
 0x1e7   : > { %1792 = vmatmul.mubr.bf16.gmra.mrb[72].mxu0 %v5025_v2  ;;  %2145 = vmatmul.mubr.bf16.gmra.mrb[72].mxu1 %v5025_v2  ;;  %v1245_v39 = vadd.f32 %v4963_v20, %v1244_v35  ;;  %v4322_v47 = vpop.f32.mrb[14].mxu1 }
 0x1e8   : > { %1801 = vmatprep.mubr.bf16.mxu0 %v4544_v31  ;;  %2154 = vmatprep.mubr.bf16.mxu1 %v4544_v31  ;;  %v1465_v48 = vmax.f32 %v1253_v34, 0.0  ;;  %v1256_v49 = vadd.f32 %v4322_v47, %v4963_v20  ;;  %v1247_v51 = vpop.f32.mrb[15].mxu1 }
 0x1e9   : > { %v1463_v52 = vmax.f32 %v1245_v39, 0.0  ;;  %v1248_v40 = vadd.f32 %v4963_v20, %v1247_v51  ;;  %2910 = vmatpush1.bf16.msra.mxu0 %v4141_v32  ;;  %3263 = vmatpush1.bf16.msra.mxu1 %v4143_v33 }
 0x1ea   : > { %v1466_v43 = vmax.f32 %v1256_v49, 0.0  ;;  %2911 = vmatprep.subr.bf16.mxu0 %v4146_v46  ;;  %3264 = vmatprep.subr.bf16.mxu1 %v4148_v5  ;;  %v2733_v5 = vld [vmem:[%s5509_s5 + $0x190] sm:$0xff] }
 0x1eb   : > { %v1464_v44 = vmax.f32 %v1248_v40, 0.0 }
 0x1ec   : > { %v5059_v53 = vpack.c.bf16 %v1466_v43, %v1465_v48 }
 0x1ed   : > { %v5061_v54 = vpack.c.bf16 %v1464_v44, %v1463_v52  ;;  %v4325_v55 = vpop.f32.mrb[16].mxu1  ;;  %2912 = vmatpush1.bf16.msra.mxu0 %v4145_v42  ;;  %3265 = vmatpush1.bf16.msra.mxu1 %v4147_v4 }
 0x1ee   : > { %v1269_v56 = vadd.f32 %v4325_v55, %v4963_v20  ;;  %v1260_v57 = vpop.f32.mrb[17].mxu1 }
 0x1ef   : > { %1802 = vmatmul.mubr.bf16.gmra.mrb[76].mxu0 %v5023_v1  ;;  %2155 = vmatmul.mubr.bf16.gmra.mrb[76].mxu1 %v5023_v1  ;;  %v1261_v58 = vadd.f32 %v4963_v20, %v1260_v57  ;;  %v4326_v59 = vpop.f32.mrb[18].mxu1 }
 0x1f0   : > { %1811 = vmatprep.mubr.bf16.mxu0 %v4544_v31  ;;  %2164 = vmatprep.mubr.bf16.mxu1 %v4544_v31  ;;  %v1469_v60 = vmax.f32 %v1269_v56, 0.0  ;;  %v1272_v61 = vadd.f32 %v4326_v59, %v4963_v20  ;;  %v1263_v62 = vpop.f32.mrb[19].mxu1 }
 0x1f1   : > { %v1467_v37 = vmax.f32 %v1261_v58, 0.0  ;;  %v1264_v38 = vadd.f32 %v4963_v20, %v1263_v62 }
 0x1f2   : > { %v1470_v3 = vmax.f32 %v1272_v61, 0.0 }
 0x1f3   : > { %v1468_v7 = vmax.f32 %v1264_v38, 0.0 }
 0x1f4   : > { %v5083_v8 = vpack.c.bf16 %v1470_v3, %v1469_v60 }
 0x1f5   : > { %v5085_v9 = vpack.c.bf16 %v1468_v7, %v1467_v37  ;;  %v4329_v10 = vpop.f32.mrb[20].mxu1  ;;  %v2735_v7 = vld [vmem:[%s5509_s5 + $0x1b0] sm:$0xff] }
 0x1f6   : > { %v1285_v11 = vadd.f32 %v4329_v10, %v4963_v20  ;;  %v1276_v12 = vpop.f32.mrb[21].mxu1  ;;  %v2734_v10 = vld [vmem:[%s5509_s5 + $0x198] sm:$0xff] }
 0x1f7   : > { %1812 = vmatmul.mubr.bf16.gmra.mrb[80].mxu0 %v5049_v29  ;;  %2165 = vmatmul.mubr.bf16.gmra.mrb[80].mxu1 %v5049_v29  ;;  %v1277_v13 = vadd.f32 %v4963_v20, %v1276_v12  ;;  %v4330_v14 = vpop.f32.mrb[22].mxu1 }
 0x1f8   : > { %1821 = vmatprep.mubr.bf16.mxu0 %v4544_v31  ;;  %2174 = vmatprep.mubr.bf16.mxu1 %v4544_v31  ;;  %v1473_v15 = vmax.f32 %v1285_v11, 0.0  ;;  %v1288_v16 = vadd.f32 %v4330_v14, %v4963_v20  ;;  %v1279_v17 = vpop.f32.mrb[23].mxu1  ;;  %v4150_v14 = vcombine.high %v2733_v5, %v2735_v7 }
 0x1f9   : > { %v1471_v18 = vmax.f32 %v1277_v13, 0.0  ;;  %v1280_v19 = vadd.f32 %v4963_v20, %v1279_v17  ;;  %v4149_v13 = vcombine.low %v2733_v5, %v2735_v7 }
 0x1fa   : > { %v1474_v21 = vmax.f32 %v1288_v16, 0.0  ;;  %2913 = vmatprep.subr.bf16.mxu0 %v4150_v14 }
 0x1fb   : > { %v1472_v22 = vmax.f32 %v1280_v19, 0.0  ;;  %2914 = vmatpush1.bf16.msra.mxu0 %v4149_v13 }
 0x1fc   : > { %v5095_v23 = vpack.c.bf16 %v1474_v21, %v1473_v15  ;;  %v2736_v15 = vld [vmem:[%s5509_s5 + $0x1b8] sm:$0xff] }
 0x1fd   : > { %v5097_v6 = vpack.c.bf16 %v1472_v22, %v1471_v18  ;;  %v4333_v24 = vpop.f32.mrb[24].mxu1  ;;  %v4151_v17 = vcombine.low %v2734_v10, %v2736_v15  ;;  %v4152_v18 = vcombine.high %v2734_v10, %v2736_v15 }
 0x1fe   : > { %v1301_v25 = vadd.f32 %v4333_v24, %v4963_v20  ;;  %v1292_v26 = vpop.f32.mrb[25].mxu1 }
 0x1ff   : > { %1822 = vmatmul.mubr.bf16.gmra.mrb[84].mxu0 %v5047_v28  ;;  %2175 = vmatmul.mubr.bf16.gmra.mrb[84].mxu1 %v5047_v28  ;;  %v1293_v27 = vadd.f32 %v4963_v20, %v1292_v26  ;;  %v4334_v30 = vpop.f32.mrb[26].mxu1 }
 0x200   : > { %1831 = vmatprep.mubr.bf16.mxu0 %v4544_v31  ;;  %2184 = vmatprep.mubr.bf16.mxu1 %v4544_v31  ;;  %v1477_v32 = vmax.f32 %v1301_v25, 0.0  ;;  %v1304_v33 = vadd.f32 %v4334_v30, %v4963_v20  ;;  %v1295_v34 = vpop.f32.mrb[27].mxu1 }
 0x201   : > { %v1475_v35 = vmax.f32 %v1293_v27, 0.0  ;;  %v1296_v39 = vadd.f32 %v4963_v20, %v1295_v34  ;;  %3266 = vmatprep.subr.bf16.mxu1 %v4152_v18 }
 0x202   : > { %v1478_v47 = vmax.f32 %v1304_v33, 0.0  ;;  %3267 = vmatpush1.bf16.msra.mxu1 %v4151_v17 }
 0x203   : > { %v1476_v48 = vmax.f32 %v1296_v39, 0.0 }
 0x204   : > { %v5107_v49 = vpack.c.bf16 %v1478_v47, %v1477_v32 }
 0x205   : > { %v5109_v51 = vpack.c.bf16 %v1476_v48, %v1475_v35  ;;  %v4337_v52 = vpop.f32.mrb[28].mxu1 }
 0x206   : > { %v1317_v40 = vadd.f32 %v4337_v52, %v4963_v20  ;;  %v1308_v43 = vpop.f32.mrb[29].mxu1 }
 0x207   : > { %1832 = vmatmul.mubr.bf16.gmra.mrb[88].mxu0 %v5061_v54  ;;  %2185 = vmatmul.mubr.bf16.gmra.mrb[88].mxu1 %v5061_v54  ;;  %v1309_v44 = vadd.f32 %v4963_v20, %v1308_v43  ;;  %v4338_v55 = vpop.f32.mrb[30].mxu1 }
 0x208   : > { %1841 = vmatprep.mubr.bf16.mxu0 %v4544_v31  ;;  %2194 = vmatprep.mubr.bf16.mxu1 %v4544_v31  ;;  %v1481_v56 = vmax.f32 %v1317_v40, 0.0  ;;  %v1320_v57 = vadd.f32 %v4338_v55, %v4963_v20  ;;  %v1311_v58 = vpop.f32.mrb[31].mxu1 }
 0x209   : > { %v1479_v59 = vmax.f32 %v1309_v44, 0.0  ;;  %v1312_v60 = vadd.f32 %v4963_v20, %v1311_v58 }
 0x20a   : > { %v1482_v61 = vmax.f32 %v1320_v57, 0.0 }
 0x20b   : > { %v1480_v62 = vmax.f32 %v1312_v60, 0.0 }
 0x20c   : > { %v5119_v63 = vpack.c.bf16 %v1482_v61, %v1481_v56 }
 0x20d   : > { %v5121_v0 = vpack.c.bf16 %v1480_v62, %v1479_v59  ;;  %v4341_v36 = vpop.f32.mrb[32].mxu1 }
 0x20e   : > { %v1333_v37 = vadd.f32 %v4341_v36, %v4963_v20  ;;  %v1324_v38 = vpop.f32.mrb[33].mxu1 }
 0x20f   : > { %1842 = vmatmul.mubr.bf16.gmra.mrb[92].mxu0 %v5059_v53  ;;  %2195 = vmatmul.mubr.bf16.gmra.mrb[92].mxu1 %v5059_v53  ;;  %v1325_v42 = vadd.f32 %v4963_v20, %v1324_v38  ;;  %v4342_v46 = vpop.f32.mrb[34].mxu1 }
 0x210   : > { %1851 = vmatprep.mubr.bf16.mxu0 %v4544_v31  ;;  %2204 = vmatprep.mubr.bf16.mxu1 %v4544_v31  ;;  %v1485_v50 = vmax.f32 %v1333_v37, 0.0  ;;  %v1336_v3 = vadd.f32 %v4342_v46, %v4963_v20  ;;  %v1327_v4 = vpop.f32.mrb[35].mxu1 }
 0x211   : > { %v1483_v11 = vmax.f32 %v1325_v42, 0.0  ;;  %v1328_v12 = vadd.f32 %v4963_v20, %v1327_v4 }
 0x212   : > { %v1486_v16 = vmax.f32 %v1336_v3, 0.0 }
 0x213   : > { %v1484_v19 = vmax.f32 %v1328_v12, 0.0 }
 0x214   : > { %v5143_v21 = vpack.c.bf16 %v1486_v16, %v1485_v50 }
 0x215   : > { %v5145_v22 = vpack.c.bf16 %v1484_v19, %v1483_v11  ;;  %v4345_v24 = vpop.f32.mrb[36].mxu1 }
 0x216   : > { %v1349_v25 = vadd.f32 %v4345_v24, %v4963_v20  ;;  %v1340_v26 = vpop.f32.mrb[37].mxu1 }
 0x217   : > { %1852 = vmatmul.mubr.bf16.gmra.mrb[96].mxu0 %v5085_v9  ;;  %2205 = vmatmul.mubr.bf16.gmra.mrb[96].mxu1 %v5085_v9  ;;  %v1341_v27 = vadd.f32 %v4963_v20, %v1340_v26  ;;  %v4346_v30 = vpop.f32.mrb[38].mxu1 }
 0x218   : > { %1861 = vmatprep.mubr.bf16.mxu0 %v4544_v31  ;;  %2214 = vmatprep.mubr.bf16.mxu1 %v4544_v31  ;;  %v1489_v32 = vmax.f32 %v1349_v25, 0.0  ;;  %v1352_v33 = vadd.f32 %v4346_v30, %v4963_v20  ;;  %v1343_v34 = vpop.f32.mrb[39].mxu1 }
 0x219   : > { %v1487_v35 = vmax.f32 %v1341_v27, 0.0  ;;  %v1344_v39 = vadd.f32 %v4963_v20, %v1343_v34 }
 0x21a   : > { %v1490_v47 = vmax.f32 %v1352_v33, 0.0 }
 0x21b   : > { %v1488_v48 = vmax.f32 %v1344_v39, 0.0 }
 0x21c   : > { %v5155_v52 = vpack.c.bf16 %v1490_v47, %v1489_v32 }
 0x21d   : > { %v5157_v40 = vpack.c.bf16 %v1488_v48, %v1487_v35  ;;  %v4349_v43 = vpop.f32.mrb[40].mxu1 }
 0x21e   : > { %v1365_v44 = vadd.f32 %v4349_v43, %v4963_v20  ;;  %v1356_v55 = vpop.f32.mrb[41].mxu1 }
 0x21f   : > { %1862 = vmatmul.mubr.bf16.gmra.mrb[100].mxu0 %v5083_v8  ;;  %2215 = vmatmul.mubr.bf16.gmra.mrb[100].mxu1 %v5083_v8  ;;  %v1357_v56 = vadd.f32 %v4963_v20, %v1356_v55  ;;  %v4350_v57 = vpop.f32.mrb[42].mxu1 }
 0x220   : > { %1871 = vmatprep.mubr.bf16.mxu0 %v4544_v31  ;;  %2224 = vmatprep.mubr.bf16.mxu1 %v4544_v31  ;;  %v1493_v58 = vmax.f32 %v1365_v44, 0.0  ;;  %v1368_v59 = vadd.f32 %v4350_v57, %v4963_v20  ;;  %v1359_v60 = vpop.f32.mrb[43].mxu1  ;;  %v2739_v57 = vld [vmem:[%s5509_s5 + $0x1f0] sm:$0xff] }
 0x221   : > { %v1491_v61 = vmax.f32 %v1357_v56, 0.0  ;;  %v1360_v62 = vadd.f32 %v4963_v20, %v1359_v60  ;;  %v2737_v56 = vld [vmem:[%s5509_s5 + $0x1d0] sm:$0xff] }
 0x222   : > { %v1494_v36 = vmax.f32 %v1368_v59, 0.0 }
 0x223   : > { %v1492_v37 = vmax.f32 %v1360_v62, 0.0  ;;  %v4154_v62 = vcombine.high %v2737_v56, %v2739_v57 }
 0x224   : > { %v5167_v38 = vpack.c.bf16 %v1494_v36, %v1493_v58  ;;  %v2738_v58 = vld [vmem:[%s5509_s5 + $0x1d8] sm:$0xff] }
 0x225   : > { %v5169_v42 = vpack.c.bf16 %v1492_v37, %v1491_v61  ;;  %v4353_v46 = vpop.f32.mrb[44].mxu1  ;;  %v4153_v61 = vcombine.low %v2737_v56, %v2739_v57  ;;  %v2740_v36 = vld [vmem:[%s5509_s5 + $0x1f8] sm:$0xff]  ;;  %2915 = vmatprep.subr.bf16.mxu0 %v4154_v62 }
 0x226   : > { %v1381_v50 = vadd.f32 %v4353_v46, %v4963_v20  ;;  %v1372_v3 = vpop.f32.mrb[45].mxu1 }
 0x227   : > { %1872 = vmatmul.mubr.bf16.gmra.mrb[104].mxu0 %v5097_v6  ;;  %2225 = vmatmul.mubr.bf16.gmra.mrb[104].mxu1 %v5097_v6  ;;  %v1373_v4 = vadd.f32 %v4963_v20, %v1372_v3  ;;  %v4354_v5 = vpop.f32.mrb[46].mxu1  ;;  %v4155_v3 = vcombine.low %v2738_v58, %v2740_v36 }
 0x228   : > { %1881 = vmatprep.mubr.bf16.mxu0 %v4544_v31  ;;  %2234 = vmatprep.mubr.bf16.mxu1 %v4544_v31  ;;  %v1497_v7 = vmax.f32 %v1381_v50, 0.0  ;;  %v1384_v10 = vadd.f32 %v4354_v5, %v4963_v20  ;;  %v1375_v11 = vpop.f32.mrb[47].mxu1 }
 0x229   : > { %v1495_v12 = vmax.f32 %v1373_v4, 0.0  ;;  %v1376_v13 = vadd.f32 %v4963_v20, %v1375_v11  ;;  %v4156_v4 = vcombine.high %v2738_v58, %v2740_v36  ;;  %2916 = vmatpush1.bf16.msra.mxu0 %v4153_v61 }
 0x22a   : > { %v1498_v14 = vmax.f32 %v1384_v10, 0.0 }
 0x22b   : > { %v1496_v15 = vmax.f32 %v1376_v13, 0.0  ;;  %3268 = vmatprep.subr.bf16.mxu1 %v4156_v4 }
 0x22c   : > { %v5179_v16 = vpack.c.bf16 %v1498_v14, %v1497_v7  ;;  %3269 = vmatpush1.bf16.msra.mxu1 %v4155_v3 }
 0x22d   : > { %v5181_v17 = vpack.c.bf16 %v1496_v15, %v1495_v12  ;;  %v4357_v18 = vpop.f32.mrb[48].mxu1 }
 0x22e   : > { %v1397_v19 = vadd.f32 %v4357_v18, %v4963_v20  ;;  %v1388_v24 = vpop.f32.mrb[49].mxu1 }
 0x22f   : > { %1882 = vmatmul.mubr.bf16.gmra.mrb[108].mxu0 %v5095_v23  ;;  %2235 = vmatmul.mubr.bf16.gmra.mrb[108].mxu1 %v5095_v23  ;;  %v1389_v25 = vadd.f32 %v4963_v20, %v1388_v24  ;;  %v4358_v26 = vpop.f32.mrb[50].mxu1 }
 0x230   : > { %1891 = vmatprep.mubr.bf16.mxu0 %v4544_v31  ;;  %2244 = vmatprep.mubr.bf16.mxu1 %v4544_v31  ;;  %v1501_v27 = vmax.f32 %v1397_v19, 0.0  ;;  %v1400_v30 = vadd.f32 %v4358_v26, %v4963_v20  ;;  %v1391_v32 = vpop.f32.mrb[51].mxu1 }
 0x231   : > { %v1499_v33 = vmax.f32 %v1389_v25, 0.0  ;;  %v1392_v34 = vadd.f32 %v4963_v20, %v1391_v32 }
 0x232   : > { %v1502_v35 = vmax.f32 %v1400_v30, 0.0 }
 0x233   : > { %v1500_v39 = vmax.f32 %v1392_v34, 0.0 }
 0x234   : > { %v5191_v47 = vpack.c.bf16 %v1502_v35, %v1501_v27 }
 0x235   : > { %v5193_v48 = vpack.c.bf16 %v1500_v39, %v1499_v33  ;;  %v4361_v43 = vpop.f32.mrb[52].mxu1 }
 0x236   : > { %v1413_v44 = vadd.f32 %v4361_v43, %v4963_v20  ;;  %v1404_v55 = vpop.f32.mrb[53].mxu1 }
 0x237   : > { %1892 = vmatmul.mubr.bf16.gmra.mrb[112].mxu0 %v5109_v51  ;;  %2245 = vmatmul.mubr.bf16.gmra.mrb[112].mxu1 %v5109_v51  ;;  %v1405_v59 = vadd.f32 %v4963_v20, %v1404_v55  ;;  %v4362_v60 = vpop.f32.mrb[54].mxu1 }
 0x238   : > { %1901 = vmatprep.mubr.bf16.mxu0 %v4544_v31  ;;  %2254 = vmatprep.mubr.bf16.mxu1 %v4544_v31  ;;  %v1505_v37 = vmax.f32 %v1413_v44, 0.0  ;;  %v1416_v46 = vadd.f32 %v4362_v60, %v4963_v20  ;;  %v1407_v50 = vpop.f32.mrb[55].mxu1 }
 0x239   : > { %v1503_v5 = vmax.f32 %v1405_v59, 0.0  ;;  %v1408_v7 = vadd.f32 %v4963_v20, %v1407_v50 }
 0x23a   : > { %v1506_v10 = vmax.f32 %v1416_v46, 0.0 }
 0x23b   : > { %v1504_v11 = vmax.f32 %v1408_v7, 0.0 }
 0x23c   : > { %v5215_v12 = vpack.c.bf16 %v1506_v10, %v1505_v37 }
 0x23d   : > { %v5217_v13 = vpack.c.bf16 %v1504_v11, %v1503_v5  ;;  %v4365_v14 = vpop.f32.mrb[56].mxu1 }
 0x23e   : > { %v1429_v15 = vadd.f32 %v4365_v14, %v4963_v20  ;;  %v1420_v18 = vpop.f32.mrb[57].mxu1 }
 0x23f   : > { %1902 = vmatmul.mubr.bf16.gmra.mrb[116].mxu0 %v5107_v49  ;;  %2255 = vmatmul.mubr.bf16.gmra.mrb[116].mxu1 %v5107_v49  ;;  %v1421_v19 = vadd.f32 %v4963_v20, %v1420_v18  ;;  %v4366_v24 = vpop.f32.mrb[58].mxu1 }
 0x240   : > { %1911 = vmatprep.mubr.bf16.mxu0 %v4544_v31  ;;  %2264 = vmatprep.mubr.bf16.mxu1 %v4544_v31  ;;  %v1509_v25 = vmax.f32 %v1429_v15, 0.0  ;;  %v1432_v26 = vadd.f32 %v4366_v24, %v4963_v20  ;;  %v1423_v27 = vpop.f32.mrb[59].mxu1 }
 0x241   : > { %v1507_v30 = vmax.f32 %v1421_v19, 0.0  ;;  %v1424_v32 = vadd.f32 %v4963_v20, %v1423_v27 }
 0x242   : > { %v1510_v33 = vmax.f32 %v1432_v26, 0.0 }
 0x243   : > { %v1508_v34 = vmax.f32 %v1424_v32, 0.0 }
 0x244   : > { %v5227_v35 = vpack.c.bf16 %v1510_v33, %v1509_v25 }
 0x245   : > { %v5229_v39 = vpack.c.bf16 %v1508_v34, %v1507_v30  ;;  %v4369_v43 = vpop.f32.mrb[60].mxu1 }
 0x246   : > { %v1445_v44 = vadd.f32 %v4369_v43, %v4963_v20  ;;  %v1436_v55 = vpop.f32.mrb[61].mxu1 }
 0x247   : > { %1912 = vmatmul.mubr.bf16.gmra.mrb[120].mxu0 %v5121_v0  ;;  %2265 = vmatmul.mubr.bf16.gmra.mrb[120].mxu1 %v5121_v0  ;;  %v1437_v56 = vadd.f32 %v4963_v20, %v1436_v55  ;;  %v4370_v57 = vpop.f32.mrb[62].mxu1 }
 0x248   : > { %1921 = vmatprep.mubr.bf16.mxu0 %v4544_v31  ;;  %2274 = vmatprep.mubr.bf16.mxu1 %v4544_v31  ;;  %v1513_v58 = vmax.f32 %v1445_v44, 0.0  ;;  %v1448_v59 = vadd.f32 %v4370_v57, %v4963_v20  ;;  %v1439_v60 = vpop.f32.mrb[63].mxu1 }
 0x249   : > { %v1511_v61 = vmax.f32 %v1437_v56, 0.0  ;;  %v1440_v62 = vadd.f32 %v4963_v20, %v1439_v60 }
 0x24a   : > { %v1514_v36 = vmax.f32 %v1448_v59, 0.0 }
 0x24b   : > { %v1512_v37 = vmax.f32 %v1440_v62, 0.0 }
 0x24c   : > { %v5239_v46 = vpack.c.bf16 %v1514_v36, %v1513_v58 }
 0x24d   : > { %v5241_v50 = vpack.c.bf16 %v1512_v37, %v1511_v61 }
 0x24f   : > { %1922 = vmatmul.mubr.bf16.gmra.mrb[124].mxu0 %v5119_v63  ;;  %2275 = vmatmul.mubr.bf16.gmra.mrb[124].mxu1 %v5119_v63 }
 0x250   : > { %1931 = vmatprep.mubr.bf16.mxu0 %v4544_v31  ;;  %2284 = vmatprep.mubr.bf16.mxu1 %v4544_v31 }
 0x257   : > { %1932 = vmatmul.mubr.bf16.gmra.mrb[128].mxu0 %v5145_v22  ;;  %2285 = vmatmul.mubr.bf16.gmra.mrb[128].mxu1 %v5145_v22 }
 0x258   : > { %1941 = vmatprep.mubr.bf16.mxu0 %v4544_v31  ;;  %2294 = vmatprep.mubr.bf16.mxu1 %v4544_v31 }
 0x25f   : > { %1942 = vmatmul.mubr.bf16.gmra.mrb[132].mxu0 %v5143_v21  ;;  %2295 = vmatmul.mubr.bf16.gmra.mrb[132].mxu1 %v5143_v21 }
 0x260   : > { %1951 = vmatprep.mubr.bf16.mxu0 %v4544_v31  ;;  %2304 = vmatprep.mubr.bf16.mxu1 %v4544_v31 }
 0x267   : > { %1952 = vmatmul.mubr.bf16.gmra.mrb[136].mxu0 %v5157_v40  ;;  %2305 = vmatmul.mubr.bf16.gmra.mrb[136].mxu1 %v5157_v40 }
 0x268   : > { %1961 = vmatprep.mubr.bf16.mxu0 %v4544_v31  ;;  %2314 = vmatprep.mubr.bf16.mxu1 %v4544_v31 }
 0x26f   : > { %1962 = vmatmul.mubr.bf16.gmra.mrb[140].mxu0 %v5155_v52  ;;  %2315 = vmatmul.mubr.bf16.gmra.mrb[140].mxu1 %v5155_v52 }
 0x270   : > { %1971 = vmatprep.mubr.bf16.mxu0 %v4544_v31  ;;  %2324 = vmatprep.mubr.bf16.mxu1 %v4544_v31 }
 0x277   : > { %1972 = vmatmul.mubr.bf16.gmra.mrb[144].mxu0 %v5169_v42  ;;  %2325 = vmatmul.mubr.bf16.gmra.mrb[144].mxu1 %v5169_v42 }
 0x278   : > { %1981 = vmatprep.mubr.bf16.mxu0 %v4544_v31  ;;  %2334 = vmatprep.mubr.bf16.mxu1 %v4544_v31 }
 0x27f   : > { %1982 = vmatmul.mubr.bf16.gmra.mrb[148].mxu0 %v5167_v38  ;;  %2335 = vmatmul.mubr.bf16.gmra.mrb[148].mxu1 %v5167_v38 }
 0x280   : > { %1991 = vmatprep.mubr.bf16.mxu0 %v4544_v31  ;;  %2344 = vmatprep.mubr.bf16.mxu1 %v4544_v31 }
 0x287   : > { %1992 = vmatmul.mubr.bf16.gmra.mrb[152].mxu0 %v5181_v17  ;;  %2345 = vmatmul.mubr.bf16.gmra.mrb[152].mxu1 %v5181_v17 }
 0x288   : > { %2001 = vmatprep.mubr.bf16.mxu0 %v4544_v31  ;;  %2354 = vmatprep.mubr.bf16.mxu1 %v4544_v31 }
 0x28f   : > { %2002 = vmatmul.mubr.bf16.gmra.mrb[156].mxu0 %v5179_v16  ;;  %2355 = vmatmul.mubr.bf16.gmra.mrb[156].mxu1 %v5179_v16 }
 0x290   : > { %2011 = vmatprep.mubr.bf16.mxu0 %v4544_v31  ;;  %2364 = vmatprep.mubr.bf16.mxu1 %v4544_v31 }
 0x297   : > { %2012 = vmatmul.mubr.bf16.gmra.mrb[160].mxu0 %v5193_v48  ;;  %2365 = vmatmul.mubr.bf16.gmra.mrb[160].mxu1 %v5193_v48 }
 0x298   : > { %2021 = vmatprep.mubr.bf16.mxu0 %v4544_v31  ;;  %2374 = vmatprep.mubr.bf16.mxu1 %v4544_v31 }
 0x29f   : > { %2022 = vmatmul.mubr.bf16.gmra.mrb[164].mxu0 %v5191_v47  ;;  %2375 = vmatmul.mubr.bf16.gmra.mrb[164].mxu1 %v5191_v47 }
 0x2a0   : > { %2031 = vmatprep.mubr.bf16.mxu0 %v4544_v31  ;;  %2384 = vmatprep.mubr.bf16.mxu1 %v4544_v31 }
 0x2a7   : > { %2032 = vmatmul.mubr.bf16.gmra.mrb[168].mxu0 %v5217_v13  ;;  %2385 = vmatmul.mubr.bf16.gmra.mrb[168].mxu1 %v5217_v13 }
 0x2a8   : > { %2041 = vmatprep.mubr.bf16.mxu0 %v4544_v31  ;;  %2394 = vmatprep.mubr.bf16.mxu1 %v4544_v31 }
 0x2aa   : > { %v1773_v20 = vpop.f32.mrb[64].mxu0  ;;  %v2126_v3 = vpop.f32.mrb[64].mxu1 }
 0x2ab   : > { %v1775_v4 = vpop.f32.mrb[65].mxu0  ;;  %v2128_v5 = vpop.f32.mrb[65].mxu1 }
 0x2ac   : > { %v1777_v7 = vpop.f32.mrb[66].mxu0  ;;  %v2130_v10 = vpop.f32.mrb[66].mxu1 }
 0x2ad   : > { %v2445_v11 = vmax.f32 %v1773_v20, %v1777_v7  ;;  %v2571_v14 = vmax.f32 %v2126_v3, %v2130_v10  ;;  %v1779_v15 = vpop.f32.mrb[67].mxu0  ;;  %v2132_v18 = vpop.f32.mrb[67].mxu1 }
 0x2ae   : > { %v2508_v19 = vmax.f32 %v1775_v4, %v1779_v15  ;;  %v2634_v24 = vmax.f32 %v2128_v5, %v2132_v18 }
 0x2af   : > { %2042 = vmatmul.mubr.bf16.gmra.mrb[172].mxu0 %v5215_v12  ;;  %2395 = vmatmul.mubr.bf16.gmra.mrb[172].mxu1 %v5215_v12 }
 0x2b0   : > { %2051 = vmatprep.mubr.bf16.mxu0 %v4544_v31  ;;  %2404 = vmatprep.mubr.bf16.mxu1 %v4544_v31 }
 0x2b2   : > { %v1783_v25 = vpop.f32.mrb[68].mxu0  ;;  %v2136_v26 = vpop.f32.mrb[68].mxu1 }
 0x2b3   : > { %v2446_v27 = vmax.f32 %v2445_v11, %v1783_v25  ;;  %v2572_v30 = vmax.f32 %v2571_v14, %v2136_v26  ;;  %v1785_v32 = vpop.f32.mrb[69].mxu0  ;;  %v2138_v33 = vpop.f32.mrb[69].mxu1 }
 0x2b4   : > { %v2509_v34 = vmax.f32 %v2508_v19, %v1785_v32  ;;  %v2635_v43 = vmax.f32 %v2634_v24, %v2138_v33  ;;  %v1787_v44 = vpop.f32.mrb[70].mxu0  ;;  %v2140_v55 = vpop.f32.mrb[70].mxu1 }
 0x2b5   : > { %v2447_v56 = vmax.f32 %v2446_v27, %v1787_v44  ;;  %v2573_v57 = vmax.f32 %v2572_v30, %v2140_v55  ;;  %v1789_v58 = vpop.f32.mrb[71].mxu0  ;;  %v2142_v59 = vpop.f32.mrb[71].mxu1 }
 0x2b6   : > { %v2510_v60 = vmax.f32 %v2509_v34, %v1789_v58  ;;  %v2636_v61 = vmax.f32 %v2635_v43, %v2142_v59 }
 0x2b7   : > { %2052 = vmatmul.mubr.bf16.gmra.mrb[176].mxu0 %v5229_v39  ;;  %2405 = vmatmul.mubr.bf16.gmra.mrb[176].mxu1 %v5229_v39 }
 0x2b8   : > { %2061 = vmatprep.mubr.bf16.mxu0 %v4544_v31  ;;  %2414 = vmatprep.mubr.bf16.mxu1 %v4544_v31 }
 0x2ba   : > { %v1793_v62 = vpop.f32.mrb[72].mxu0  ;;  %v2146_v36 = vpop.f32.mrb[72].mxu1 }
 0x2bb   : > { %v2448_v37 = vmax.f32 %v2447_v56, %v1793_v62  ;;  %v2574_v20 = vmax.f32 %v2573_v57, %v2146_v36  ;;  %v1795_v3 = vpop.f32.mrb[73].mxu0  ;;  %v2148_v4 = vpop.f32.mrb[73].mxu1 }
 0x2bc   : > { %v2511_v5 = vmax.f32 %v2510_v60, %v1795_v3  ;;  %v2637_v7 = vmax.f32 %v2636_v61, %v2148_v4  ;;  %v1797_v10 = vpop.f32.mrb[74].mxu0  ;;  %v2150_v11 = vpop.f32.mrb[74].mxu1 }
 0x2bd   : > { %v2449_v14 = vmax.f32 %v2448_v37, %v1797_v10  ;;  %v2575_v15 = vmax.f32 %v2574_v20, %v2150_v11  ;;  %v1799_v18 = vpop.f32.mrb[75].mxu0  ;;  %v2152_v19 = vpop.f32.mrb[75].mxu1 }
 0x2be   : > { %v2512_v24 = vmax.f32 %v2511_v5, %v1799_v18  ;;  %v2638_v25 = vmax.f32 %v2637_v7, %v2152_v19 }
 0x2bf   : > { %2062 = vmatmul.mubr.bf16.gmra.mrb[180].mxu0 %v5227_v35  ;;  %2415 = vmatmul.mubr.bf16.gmra.mrb[180].mxu1 %v5227_v35 }
 0x2c0   : > { %2071 = vmatprep.mubr.bf16.mxu0 %v4544_v31  ;;  %2424 = vmatprep.mubr.bf16.mxu1 %v4544_v31 }
 0x2c2   : > { %v1803_v26 = vpop.f32.mrb[76].mxu0  ;;  %v2156_v27 = vpop.f32.mrb[76].mxu1 }
 0x2c3   : > { %v2450_v30 = vmax.f32 %v2449_v14, %v1803_v26  ;;  %v2576_v32 = vmax.f32 %v2575_v15, %v2156_v27  ;;  %v1805_v33 = vpop.f32.mrb[77].mxu0  ;;  %v2158_v34 = vpop.f32.mrb[77].mxu1 }
 0x2c4   : > { %v2513_v43 = vmax.f32 %v2512_v24, %v1805_v33  ;;  %v2639_v44 = vmax.f32 %v2638_v25, %v2158_v34  ;;  %v1807_v55 = vpop.f32.mrb[78].mxu0  ;;  %v2160_v56 = vpop.f32.mrb[78].mxu1 }
 0x2c5   : > { %v2451_v57 = vmax.f32 %v2450_v30, %v1807_v55  ;;  %v2577_v58 = vmax.f32 %v2576_v32, %v2160_v56  ;;  %v1809_v59 = vpop.f32.mrb[79].mxu0  ;;  %v2162_v60 = vpop.f32.mrb[79].mxu1 }
 0x2c6   : > { %v2514_v61 = vmax.f32 %v2513_v43, %v1809_v59  ;;  %v2640_v62 = vmax.f32 %v2639_v44, %v2162_v60 }
 0x2c7   : > { %2072 = vmatmul.mubr.bf16.gmra.mrb[184].mxu0 %v5241_v50  ;;  %2425 = vmatmul.mubr.bf16.gmra.mrb[184].mxu1 %v5241_v50 }
 0x2c8   : > { %2081 = vmatprep.mubr.bf16.mxu0 %v4544_v31  ;;  %2434 = vmatprep.mubr.bf16.mxu1 %v4544_v31 }
 0x2ca   : > { %v1813_v36 = vpop.f32.mrb[80].mxu0  ;;  %v2166_v37 = vpop.f32.mrb[80].mxu1 }
 0x2cb   : > { %v2452_v20 = vmax.f32 %v2451_v57, %v1813_v36  ;;  %v2578_v3 = vmax.f32 %v2577_v58, %v2166_v37  ;;  %v1815_v4 = vpop.f32.mrb[81].mxu0  ;;  %v2168_v5 = vpop.f32.mrb[81].mxu1 }
 0x2cc   : > { %v2515_v7 = vmax.f32 %v2514_v61, %v1815_v4  ;;  %v2641_v10 = vmax.f32 %v2640_v62, %v2168_v5  ;;  %v1817_v11 = vpop.f32.mrb[82].mxu0  ;;  %v2170_v14 = vpop.f32.mrb[82].mxu1 }
 0x2cd   : > { %v2453_v15 = vmax.f32 %v2452_v20, %v1817_v11  ;;  %v2579_v18 = vmax.f32 %v2578_v3, %v2170_v14  ;;  %v1819_v19 = vpop.f32.mrb[83].mxu0  ;;  %v2172_v24 = vpop.f32.mrb[83].mxu1 }
 0x2ce   : > { %v2516_v25 = vmax.f32 %v2515_v7, %v1819_v19  ;;  %v2642_v26 = vmax.f32 %v2641_v10, %v2172_v24 }
 0x2cf   : > { %2082 = vmatmul.mubr.bf16.gmra.mrb[188].mxu0 %v5239_v46  ;;  %2435 = vmatmul.mubr.bf16.gmra.mrb[188].mxu1 %v5239_v46 }
 0x2d0   : > { %2933 = vmatprep.mubr.bf16.mxu0 %v4544_v31  ;;  %3286 = vmatprep.mubr.bf16.mxu1 %v4544_v31 }
 0x2d2   : > { %v1823_v27 = vpop.f32.mrb[84].mxu0  ;;  %v2176_v30 = vpop.f32.mrb[84].mxu1 }
 0x2d3   : > { %v2454_v32 = vmax.f32 %v2453_v15, %v1823_v27  ;;  %v2580_v33 = vmax.f32 %v2579_v18, %v2176_v30  ;;  %v1825_v34 = vpop.f32.mrb[85].mxu0  ;;  %v2178_v43 = vpop.f32.mrb[85].mxu1 }
 0x2d4   : > { %v2517_v44 = vmax.f32 %v2516_v25, %v1825_v34  ;;  %v2643_v55 = vmax.f32 %v2642_v26, %v2178_v43  ;;  %v1827_v56 = vpop.f32.mrb[86].mxu0  ;;  %v2180_v57 = vpop.f32.mrb[86].mxu1 }
 0x2d5   : > { %v2455_v58 = vmax.f32 %v2454_v32, %v1827_v56  ;;  %v2581_v59 = vmax.f32 %v2580_v33, %v2180_v57  ;;  %v1829_v60 = vpop.f32.mrb[87].mxu0  ;;  %v2182_v61 = vpop.f32.mrb[87].mxu1 }
 0x2d6   : > { %v2518_v62 = vmax.f32 %v2517_v44, %v1829_v60  ;;  %v2644_v36 = vmax.f32 %v2643_v55, %v2182_v61 }
 0x2d7   : > { %2934 = vmatmul.mubr.bf16.vlgmr.msra.gmra.mrb[192].mxu0 %v4983_v45  ;;  %3287 = vmatmul.mubr.bf16.vlgmr.msra.gmra.mrb[192].mxu1 %v4983_v45 }
 0x2d8   : > { %2943 = vmatprep.mubr.bf16.mxu0 %v4544_v31  ;;  %3296 = vmatprep.mubr.bf16.mxu1 %v4544_v31 }
 0x2da   : > { %v1833_v37 = vpop.f32.mrb[88].mxu0  ;;  %v2186_v20 = vpop.f32.mrb[88].mxu1 }
 0x2db   : > { %v2456_v3 = vmax.f32 %v2455_v58, %v1833_v37  ;;  %v2582_v4 = vmax.f32 %v2581_v59, %v2186_v20  ;;  %v1835_v5 = vpop.f32.mrb[89].mxu0  ;;  %v2188_v7 = vpop.f32.mrb[89].mxu1 }
 0x2dc   : > { %v2519_v10 = vmax.f32 %v2518_v62, %v1835_v5  ;;  %v2645_v11 = vmax.f32 %v2644_v36, %v2188_v7  ;;  %v1837_v14 = vpop.f32.mrb[90].mxu0  ;;  %v2190_v15 = vpop.f32.mrb[90].mxu1 }
 0x2dd   : > { %v2457_v18 = vmax.f32 %v2456_v3, %v1837_v14  ;;  %v2583_v19 = vmax.f32 %v2582_v4, %v2190_v15  ;;  %v1839_v24 = vpop.f32.mrb[91].mxu0  ;;  %v2192_v25 = vpop.f32.mrb[91].mxu1 }
 0x2de   : > { %v2520_v26 = vmax.f32 %v2519_v10, %v1839_v24  ;;  %v2646_v45 = vmax.f32 %v2645_v11, %v2192_v25 }
 0x2df   : > { %2944 = vmatmul.mubr.bf16.gmra.mrb[196].mxu0 %v4981_v41  ;;  %3297 = vmatmul.mubr.bf16.gmra.mrb[196].mxu1 %v4981_v41 }
 0x2e0   : > { %2953 = vmatprep.mubr.bf16.mxu0 %v4544_v31  ;;  %3306 = vmatprep.mubr.bf16.mxu1 %v4544_v31 }
 0x2e2   : > { %v1843_v27 = vpop.f32.mrb[92].mxu0  ;;  %v2196_v30 = vpop.f32.mrb[92].mxu1 }
 0x2e3   : > { %v2458_v32 = vmax.f32 %v2457_v18, %v1843_v27  ;;  %v2584_v33 = vmax.f32 %v2583_v19, %v2196_v30  ;;  %v1845_v34 = vpop.f32.mrb[93].mxu0  ;;  %v2198_v43 = vpop.f32.mrb[93].mxu1 }
 0x2e4   : > { %v2521_v44 = vmax.f32 %v2520_v26, %v1845_v34  ;;  %v2647_v55 = vmax.f32 %v2646_v45, %v2198_v43  ;;  %v1847_v56 = vpop.f32.mrb[94].mxu0  ;;  %v2200_v57 = vpop.f32.mrb[94].mxu1 }
 0x2e5   : > { %v2459_v58 = vmax.f32 %v2458_v32, %v1847_v56  ;;  %v2585_v59 = vmax.f32 %v2584_v33, %v2200_v57  ;;  %v1849_v60 = vpop.f32.mrb[95].mxu0  ;;  %v2202_v61 = vpop.f32.mrb[95].mxu1 }
 0x2e6   : > { %v2522_v62 = vmax.f32 %v2521_v44, %v1849_v60  ;;  %v2648_v41 = vmax.f32 %v2647_v55, %v2202_v61 }
 0x2e7   : > { %2954 = vmatmul.mubr.bf16.gmra.mrb[200].mxu0 %v5025_v2  ;;  %3307 = vmatmul.mubr.bf16.gmra.mrb[200].mxu1 %v5025_v2 }
 0x2e8   : > { %2963 = vmatprep.mubr.bf16.mxu0 %v4544_v31  ;;  %3316 = vmatprep.mubr.bf16.mxu1 %v4544_v31 }
 0x2ea   : > { %v1853_v36 = vpop.f32.mrb[96].mxu0  ;;  %v2206_v37 = vpop.f32.mrb[96].mxu1 }
 0x2eb   : > { %v2460_v20 = vmax.f32 %v2459_v58, %v1853_v36  ;;  %v2586_v3 = vmax.f32 %v2585_v59, %v2206_v37  ;;  %v1855_v4 = vpop.f32.mrb[97].mxu0  ;;  %v2208_v5 = vpop.f32.mrb[97].mxu1 }
 0x2ec   : > { %v2523_v7 = vmax.f32 %v2522_v62, %v1855_v4  ;;  %v2649_v10 = vmax.f32 %v2648_v41, %v2208_v5  ;;  %v1857_v11 = vpop.f32.mrb[98].mxu0  ;;  %v2210_v14 = vpop.f32.mrb[98].mxu1 }
 0x2ed   : > { %v2461_v15 = vmax.f32 %v2460_v20, %v1857_v11  ;;  %v2587_v18 = vmax.f32 %v2586_v3, %v2210_v14  ;;  %v1859_v19 = vpop.f32.mrb[99].mxu0  ;;  %v2212_v24 = vpop.f32.mrb[99].mxu1 }
 0x2ee   : > { %v2524_v25 = vmax.f32 %v2523_v7, %v1859_v19  ;;  %v2650_v2 = vmax.f32 %v2649_v10, %v2212_v24 }
 0x2ef   : > { %2964 = vmatmul.mubr.bf16.gmra.mrb[204].mxu0 %v5023_v1  ;;  %3317 = vmatmul.mubr.bf16.gmra.mrb[204].mxu1 %v5023_v1 }
 0x2f0   : > { %2973 = vmatprep.mubr.bf16.mxu0 %v4544_v31  ;;  %3326 = vmatprep.mubr.bf16.mxu1 %v4544_v31 }
 0x2f2   : > { %v1863_v26 = vpop.f32.mrb[100].mxu0  ;;  %v2216_v45 = vpop.f32.mrb[100].mxu1 }
 0x2f3   : > { %v2462_v27 = vmax.f32 %v2461_v15, %v1863_v26  ;;  %v2588_v30 = vmax.f32 %v2587_v18, %v2216_v45  ;;  %v1865_v32 = vpop.f32.mrb[101].mxu0  ;;  %v2218_v33 = vpop.f32.mrb[101].mxu1 }
 0x2f4   : > { %v2525_v34 = vmax.f32 %v2524_v25, %v1865_v32  ;;  %v2651_v43 = vmax.f32 %v2650_v2, %v2218_v33  ;;  %v1867_v44 = vpop.f32.mrb[102].mxu0  ;;  %v2220_v55 = vpop.f32.mrb[102].mxu1 }
 0x2f5   : > { %v2463_v56 = vmax.f32 %v2462_v27, %v1867_v44  ;;  %v2589_v57 = vmax.f32 %v2588_v30, %v2220_v55  ;;  %v1869_v58 = vpop.f32.mrb[103].mxu0  ;;  %v2222_v59 = vpop.f32.mrb[103].mxu1 }
 0x2f6   : > { %v2526_v60 = vmax.f32 %v2525_v34, %v1869_v58  ;;  %v2652_v1 = vmax.f32 %v2651_v43, %v2222_v59 }
 0x2f7   : > { %2974 = vmatmul.mubr.bf16.gmra.mrb[208].mxu0 %v5049_v29  ;;  %3327 = vmatmul.mubr.bf16.gmra.mrb[208].mxu1 %v5049_v29 }
 0x2f8   : > { %2983 = vmatprep.mubr.bf16.mxu0 %v4544_v31  ;;  %3336 = vmatprep.mubr.bf16.mxu1 %v4544_v31 }
 0x2fa   : > { %v1873_v61 = vpop.f32.mrb[104].mxu0  ;;  %v2226_v62 = vpop.f32.mrb[104].mxu1 }
 0x2fb   : > { %v2464_v41 = vmax.f32 %v2463_v56, %v1873_v61  ;;  %v2590_v36 = vmax.f32 %v2589_v57, %v2226_v62  ;;  %v1875_v37 = vpop.f32.mrb[105].mxu0  ;;  %v2228_v20 = vpop.f32.mrb[105].mxu1 }
 0x2fc   : > { %v2527_v3 = vmax.f32 %v2526_v60, %v1875_v37  ;;  %v2653_v4 = vmax.f32 %v2652_v1, %v2228_v20  ;;  %v1877_v5 = vpop.f32.mrb[106].mxu0  ;;  %v2230_v7 = vpop.f32.mrb[106].mxu1 }
 0x2fd   : > { %v2465_v10 = vmax.f32 %v2464_v41, %v1877_v5  ;;  %v2591_v11 = vmax.f32 %v2590_v36, %v2230_v7  ;;  %v1879_v14 = vpop.f32.mrb[107].mxu0  ;;  %v2232_v15 = vpop.f32.mrb[107].mxu1 }
 0x2fe   : > { %v2528_v18 = vmax.f32 %v2527_v3, %v1879_v14  ;;  %v2654_v29 = vmax.f32 %v2653_v4, %v2232_v15 }
 0x2ff   : > { %2984 = vmatmul.mubr.bf16.gmra.mrb[212].mxu0 %v5047_v28  ;;  %3337 = vmatmul.mubr.bf16.gmra.mrb[212].mxu1 %v5047_v28 }
 0x300   : > { %2993 = vmatprep.mubr.bf16.mxu0 %v4544_v31  ;;  %3346 = vmatprep.mubr.bf16.mxu1 %v4544_v31 }
 0x302   : > { %v1883_v19 = vpop.f32.mrb[108].mxu0  ;;  %v2236_v24 = vpop.f32.mrb[108].mxu1 }
 0x303   : > { %v2466_v25 = vmax.f32 %v2465_v10, %v1883_v19  ;;  %v2592_v2 = vmax.f32 %v2591_v11, %v2236_v24  ;;  %v1885_v26 = vpop.f32.mrb[109].mxu0  ;;  %v2238_v45 = vpop.f32.mrb[109].mxu1 }
 0x304   : > { %v2529_v27 = vmax.f32 %v2528_v18, %v1885_v26  ;;  %v2655_v30 = vmax.f32 %v2654_v29, %v2238_v45  ;;  %v1887_v32 = vpop.f32.mrb[110].mxu0  ;;  %v2240_v33 = vpop.f32.mrb[110].mxu1 }
 0x305   : > { %v2467_v34 = vmax.f32 %v2466_v25, %v1887_v32  ;;  %v2593_v43 = vmax.f32 %v2592_v2, %v2240_v33  ;;  %v1889_v44 = vpop.f32.mrb[111].mxu0  ;;  %v2242_v55 = vpop.f32.mrb[111].mxu1 }
 0x306   : > { %v2530_v56 = vmax.f32 %v2529_v27, %v1889_v44  ;;  %v2656_v28 = vmax.f32 %v2655_v30, %v2242_v55 }
 0x307   : > { %2994 = vmatmul.mubr.bf16.gmra.mrb[216].mxu0 %v5061_v54  ;;  %3347 = vmatmul.mubr.bf16.gmra.mrb[216].mxu1 %v5061_v54 }
 0x308   : > { %3003 = vmatprep.mubr.bf16.mxu0 %v4544_v31  ;;  %3356 = vmatprep.mubr.bf16.mxu1 %v4544_v31 }
 0x30a   : > { %v1893_v57 = vpop.f32.mrb[112].mxu0  ;;  %v2246_v58 = vpop.f32.mrb[112].mxu1 }
 0x30b   : > { %v2468_v59 = vmax.f32 %v2467_v34, %v1893_v57  ;;  %v2594_v60 = vmax.f32 %v2593_v43, %v2246_v58  ;;  %v1895_v1 = vpop.f32.mrb[113].mxu0  ;;  %v2248_v61 = vpop.f32.mrb[113].mxu1 }
 0x30c   : > { %v2531_v62 = vmax.f32 %v2530_v56, %v1895_v1  ;;  %v2657_v41 = vmax.f32 %v2656_v28, %v2248_v61  ;;  %v1897_v36 = vpop.f32.mrb[114].mxu0  ;;  %v2250_v37 = vpop.f32.mrb[114].mxu1 }
 0x30d   : > { %v2469_v20 = vmax.f32 %v2468_v59, %v1897_v36  ;;  %v2595_v3 = vmax.f32 %v2594_v60, %v2250_v37  ;;  %v1899_v4 = vpop.f32.mrb[115].mxu0  ;;  %v2252_v5 = vpop.f32.mrb[115].mxu1 }
 0x30e   : > { %v2532_v7 = vmax.f32 %v2531_v62, %v1899_v4  ;;  %v2658_v54 = vmax.f32 %v2657_v41, %v2252_v5 }
 0x30f   : > { %3004 = vmatmul.mubr.bf16.gmra.mrb[220].mxu0 %v5059_v53  ;;  %3357 = vmatmul.mubr.bf16.gmra.mrb[220].mxu1 %v5059_v53 }
 0x310   : > { %3013 = vmatprep.mubr.bf16.mxu0 %v4544_v31  ;;  %3366 = vmatprep.mubr.bf16.mxu1 %v4544_v31 }
 0x312   : > { %v1903_v10 = vpop.f32.mrb[116].mxu0  ;;  %v2256_v11 = vpop.f32.mrb[116].mxu1 }
 0x313   : > { %v2470_v14 = vmax.f32 %v2469_v20, %v1903_v10  ;;  %v2596_v15 = vmax.f32 %v2595_v3, %v2256_v11  ;;  %v1905_v18 = vpop.f32.mrb[117].mxu0  ;;  %v2258_v29 = vpop.f32.mrb[117].mxu1 }
 0x314   : > { %v2533_v19 = vmax.f32 %v2532_v7, %v1905_v18  ;;  %v2659_v24 = vmax.f32 %v2658_v54, %v2258_v29  ;;  %v1907_v25 = vpop.f32.mrb[118].mxu0  ;;  %v2260_v2 = vpop.f32.mrb[118].mxu1 }
 0x315   : > { %v2471_v26 = vmax.f32 %v2470_v14, %v1907_v25  ;;  %v2597_v45 = vmax.f32 %v2596_v15, %v2260_v2  ;;  %v1909_v27 = vpop.f32.mrb[119].mxu0  ;;  %v2262_v30 = vpop.f32.mrb[119].mxu1 }
 0x316   : > { %v2534_v32 = vmax.f32 %v2533_v19, %v1909_v27  ;;  %v2660_v53 = vmax.f32 %v2659_v24, %v2262_v30 }
 0x317   : > { %3014 = vmatmul.mubr.bf16.gmra.mrb[224].mxu0 %v5085_v9  ;;  %3367 = vmatmul.mubr.bf16.gmra.mrb[224].mxu1 %v5085_v9 }
 0x318   : > { %3023 = vmatprep.mubr.bf16.mxu0 %v4544_v31  ;;  %3376 = vmatprep.mubr.bf16.mxu1 %v4544_v31 }
 0x31a   : > { %v1913_v33 = vpop.f32.mrb[120].mxu0  ;;  %v2266_v34 = vpop.f32.mrb[120].mxu1 }
 0x31b   : > { %v2472_v43 = vmax.f32 %v2471_v26, %v1913_v33  ;;  %v2598_v44 = vmax.f32 %v2597_v45, %v2266_v34  ;;  %v1915_v55 = vpop.f32.mrb[121].mxu0  ;;  %v2268_v56 = vpop.f32.mrb[121].mxu1 }
 0x31c   : > { %v2535_v28 = vmax.f32 %v2534_v32, %v1915_v55  ;;  %v2661_v57 = vmax.f32 %v2660_v53, %v2268_v56  ;;  %v1917_v58 = vpop.f32.mrb[122].mxu0  ;;  %v2270_v59 = vpop.f32.mrb[122].mxu1 }
 0x31d   : > { %v2473_v60 = vmax.f32 %v2472_v43, %v1917_v58  ;;  %v2599_v1 = vmax.f32 %v2598_v44, %v2270_v59  ;;  %v1919_v61 = vpop.f32.mrb[123].mxu0  ;;  %v2272_v62 = vpop.f32.mrb[123].mxu1 }
 0x31e   : > { %v2536_v41 = vmax.f32 %v2535_v28, %v1919_v61  ;;  %v2662_v9 = vmax.f32 %v2661_v57, %v2272_v62 }
 0x31f   : > { %3024 = vmatmul.mubr.bf16.gmra.mrb[228].mxu0 %v5083_v8  ;;  %3377 = vmatmul.mubr.bf16.gmra.mrb[228].mxu1 %v5083_v8 }
 0x320   : > { %3033 = vmatprep.mubr.bf16.mxu0 %v4544_v31  ;;  %3386 = vmatprep.mubr.bf16.mxu1 %v4544_v31 }
 0x322   : > { %v1923_v36 = vpop.f32.mrb[124].mxu0  ;;  %v2276_v37 = vpop.f32.mrb[124].mxu1 }
 0x323   : > { %v2474_v20 = vmax.f32 %v2473_v60, %v1923_v36  ;;  %v2600_v3 = vmax.f32 %v2599_v1, %v2276_v37  ;;  %v1925_v4 = vpop.f32.mrb[125].mxu0  ;;  %v2278_v5 = vpop.f32.mrb[125].mxu1 }
 0x324   : > { %v2537_v7 = vmax.f32 %v2536_v41, %v1925_v4  ;;  %v2663_v54 = vmax.f32 %v2662_v9, %v2278_v5  ;;  %v1927_v10 = vpop.f32.mrb[126].mxu0  ;;  %v2280_v11 = vpop.f32.mrb[126].mxu1 }
 0x325   : > { %v2475_v14 = vmax.f32 %v2474_v20, %v1927_v10  ;;  %v2601_v15 = vmax.f32 %v2600_v3, %v2280_v11  ;;  %v1929_v18 = vpop.f32.mrb[127].mxu0  ;;  %v2282_v29 = vpop.f32.mrb[127].mxu1 }
 0x326   : > { %v2538_v19 = vmax.f32 %v2537_v7, %v1929_v18  ;;  %v2664_v8 = vmax.f32 %v2663_v54, %v2282_v29 }
 0x327   : > { %3034 = vmatmul.mubr.bf16.gmra.mrb[232].mxu0 %v5097_v6  ;;  %3387 = vmatmul.mubr.bf16.gmra.mrb[232].mxu1 %v5097_v6 }
 0x328   : > { %3043 = vmatprep.mubr.bf16.mxu0 %v4544_v31  ;;  %3396 = vmatprep.mubr.bf16.mxu1 %v4544_v31 }
 0x32a   : > { %v1933_v24 = vpop.f32.mrb[128].mxu0  ;;  %v2286_v25 = vpop.f32.mrb[128].mxu1 }
 0x32b   : > { %v2476_v2 = vmax.f32 %v2475_v14, %v1933_v24  ;;  %v2602_v26 = vmax.f32 %v2601_v15, %v2286_v25  ;;  %v1935_v45 = vpop.f32.mrb[129].mxu0  ;;  %v2288_v27 = vpop.f32.mrb[129].mxu1 }
 0x32c   : > { %v2539_v30 = vmax.f32 %v2538_v19, %v1935_v45  ;;  %v2665_v32 = vmax.f32 %v2664_v8, %v2288_v27  ;;  %v1937_v53 = vpop.f32.mrb[130].mxu0  ;;  %v2290_v33 = vpop.f32.mrb[130].mxu1 }
 0x32d   : > { %v2477_v34 = vmax.f32 %v2476_v2, %v1937_v53  ;;  %v2603_v43 = vmax.f32 %v2602_v26, %v2290_v33  ;;  %v1939_v44 = vpop.f32.mrb[131].mxu0  ;;  %v2292_v55 = vpop.f32.mrb[131].mxu1 }
 0x32e   : > { %v2540_v56 = vmax.f32 %v2539_v30, %v1939_v44  ;;  %v2666_v6 = vmax.f32 %v2665_v32, %v2292_v55 }
 0x32f   : > { %3044 = vmatmul.mubr.bf16.gmra.mrb[236].mxu0 %v5095_v23  ;;  %3397 = vmatmul.mubr.bf16.gmra.mrb[236].mxu1 %v5095_v23 }
 0x330   : > { %3053 = vmatprep.mubr.bf16.mxu0 %v4544_v31  ;;  %3406 = vmatprep.mubr.bf16.mxu1 %v4544_v31 }
 0x332   : > { %v1943_v28 = vpop.f32.mrb[132].mxu0  ;;  %v2296_v57 = vpop.f32.mrb[132].mxu1 }
 0x333   : > { %v2478_v58 = vmax.f32 %v2477_v34, %v1943_v28  ;;  %v2604_v59 = vmax.f32 %v2603_v43, %v2296_v57  ;;  %v1945_v60 = vpop.f32.mrb[133].mxu0  ;;  %v2298_v1 = vpop.f32.mrb[133].mxu1 }
 0x334   : > { %v2541_v61 = vmax.f32 %v2540_v56, %v1945_v60  ;;  %v2667_v62 = vmax.f32 %v2666_v6, %v2298_v1  ;;  %v1947_v41 = vpop.f32.mrb[134].mxu0  ;;  %v2300_v9 = vpop.f32.mrb[134].mxu1 }
 0x335   : > { %v2479_v36 = vmax.f32 %v2478_v58, %v1947_v41  ;;  %v2605_v37 = vmax.f32 %v2604_v59, %v2300_v9  ;;  %v1949_v20 = vpop.f32.mrb[135].mxu0  ;;  %v2302_v3 = vpop.f32.mrb[135].mxu1 }
 0x336   : > { %v2542_v4 = vmax.f32 %v2541_v61, %v1949_v20  ;;  %v2668_v23 = vmax.f32 %v2667_v62, %v2302_v3 }
 0x337   : > { %3054 = vmatmul.mubr.bf16.gmra.mrb[240].mxu0 %v5109_v51  ;;  %3407 = vmatmul.mubr.bf16.gmra.mrb[240].mxu1 %v5109_v51 }
 0x338   : > { %3063 = vmatprep.mubr.bf16.mxu0 %v4544_v31  ;;  %3416 = vmatprep.mubr.bf16.mxu1 %v4544_v31 }
 0x33a   : > { %v1953_v5 = vpop.f32.mrb[136].mxu0  ;;  %v2306_v7 = vpop.f32.mrb[136].mxu1 }
 0x33b   : > { %v2480_v54 = vmax.f32 %v2479_v36, %v1953_v5  ;;  %v2606_v10 = vmax.f32 %v2605_v37, %v2306_v7  ;;  %v1955_v11 = vpop.f32.mrb[137].mxu0  ;;  %v2308_v14 = vpop.f32.mrb[137].mxu1 }
 0x33c   : > { %v2543_v15 = vmax.f32 %v2542_v4, %v1955_v11  ;;  %v2669_v18 = vmax.f32 %v2668_v23, %v2308_v14  ;;  %v1957_v29 = vpop.f32.mrb[138].mxu0  ;;  %v2310_v19 = vpop.f32.mrb[138].mxu1 }
 0x33d   : > { %v2481_v8 = vmax.f32 %v2480_v54, %v1957_v29  ;;  %v2607_v24 = vmax.f32 %v2606_v10, %v2310_v19  ;;  %v1959_v25 = vpop.f32.mrb[139].mxu0  ;;  %v2312_v2 = vpop.f32.mrb[139].mxu1 }
 0x33e   : > { %v2544_v26 = vmax.f32 %v2543_v15, %v1959_v25  ;;  %v2670_v51 = vmax.f32 %v2669_v18, %v2312_v2 }
 0x33f   : > { %3064 = vmatmul.mubr.bf16.gmra.mrb[244].mxu0 %v5107_v49  ;;  %3417 = vmatmul.mubr.bf16.gmra.mrb[244].mxu1 %v5107_v49 }
 0x340   : > { %3073 = vmatprep.mubr.bf16.mxu0 %v4544_v31  ;;  %3426 = vmatprep.mubr.bf16.mxu1 %v4544_v31 }
 0x342   : > { %v1963_v45 = vpop.f32.mrb[140].mxu0  ;;  %v2316_v27 = vpop.f32.mrb[140].mxu1 }
 0x343   : > { %v2482_v30 = vmax.f32 %v2481_v8, %v1963_v45  ;;  %v2608_v32 = vmax.f32 %v2607_v24, %v2316_v27  ;;  %v1965_v53 = vpop.f32.mrb[141].mxu0  ;;  %v2318_v33 = vpop.f32.mrb[141].mxu1 }
 0x344   : > { %v2545_v34 = vmax.f32 %v2544_v26, %v1965_v53  ;;  %v2671_v43 = vmax.f32 %v2670_v51, %v2318_v33  ;;  %v1967_v44 = vpop.f32.mrb[142].mxu0  ;;  %v2320_v55 = vpop.f32.mrb[142].mxu1 }
 0x345   : > { %v2483_v56 = vmax.f32 %v2482_v30, %v1967_v44  ;;  %v2609_v6 = vmax.f32 %v2608_v32, %v2320_v55  ;;  %v1969_v28 = vpop.f32.mrb[143].mxu0  ;;  %v2322_v57 = vpop.f32.mrb[143].mxu1 }
 0x346   : > { %v2546_v58 = vmax.f32 %v2545_v34, %v1969_v28  ;;  %v2672_v49 = vmax.f32 %v2671_v43, %v2322_v57 }
 0x347   : > { %3074 = vmatmul.mubr.bf16.gmra.mrb[248].mxu0 %v5121_v0  ;;  %3427 = vmatmul.mubr.bf16.gmra.mrb[248].mxu1 %v5121_v0 }
 0x348   : > { %3083 = vmatprep.mubr.bf16.mxu0 %v4544_v31  ;;  %3436 = vmatprep.mubr.bf16.mxu1 %v4544_v31 }
 0x34a   : > { %v1973_v59 = vpop.f32.mrb[144].mxu0  ;;  %v2326_v60 = vpop.f32.mrb[144].mxu1 }
 0x34b   : > { %v2484_v1 = vmax.f32 %v2483_v56, %v1973_v59  ;;  %v2610_v61 = vmax.f32 %v2609_v6, %v2326_v60  ;;  %v1975_v62 = vpop.f32.mrb[145].mxu0  ;;  %v2328_v41 = vpop.f32.mrb[145].mxu1 }
 0x34c   : > { %v2547_v9 = vmax.f32 %v2546_v58, %v1975_v62  ;;  %v2673_v36 = vmax.f32 %v2672_v49, %v2328_v41  ;;  %v1977_v37 = vpop.f32.mrb[146].mxu0  ;;  %v2330_v20 = vpop.f32.mrb[146].mxu1 }
 0x34d   : > { %v2485_v3 = vmax.f32 %v2484_v1, %v1977_v37  ;;  %v2611_v4 = vmax.f32 %v2610_v61, %v2330_v20  ;;  %v1979_v23 = vpop.f32.mrb[147].mxu0  ;;  %v2332_v5 = vpop.f32.mrb[147].mxu1 }
 0x34e   : > { %v2548_v7 = vmax.f32 %v2547_v9, %v1979_v23  ;;  %v2674_v0 = vmax.f32 %v2673_v36, %v2332_v5 }
 0x34f   : > { %3084 = vmatmul.mubr.bf16.gmra.mrb[252].mxu0 %v5119_v63  ;;  %3437 = vmatmul.mubr.bf16.gmra.mrb[252].mxu1 %v5119_v63 }
 0x350   : > { %3093 = vmatprep.mubr.bf16.mxu0 %v4544_v31  ;;  %3446 = vmatprep.mubr.bf16.mxu1 %v4544_v31 }
 0x352   : > { %v1983_v54 = vpop.f32.mrb[148].mxu0  ;;  %v2336_v10 = vpop.f32.mrb[148].mxu1 }
 0x353   : > { %v2486_v11 = vmax.f32 %v2485_v3, %v1983_v54  ;;  %v2612_v14 = vmax.f32 %v2611_v4, %v2336_v10  ;;  %v1985_v15 = vpop.f32.mrb[149].mxu0  ;;  %v2338_v18 = vpop.f32.mrb[149].mxu1 }
 0x354   : > { %v2549_v29 = vmax.f32 %v2548_v7, %v1985_v15  ;;  %v2675_v19 = vmax.f32 %v2674_v0, %v2338_v18  ;;  %v1987_v8 = vpop.f32.mrb[150].mxu0  ;;  %v2340_v24 = vpop.f32.mrb[150].mxu1 }
 0x355   : > { %v2487_v25 = vmax.f32 %v2486_v11, %v1987_v8  ;;  %v2613_v2 = vmax.f32 %v2612_v14, %v2340_v24  ;;  %v1989_v26 = vpop.f32.mrb[151].mxu0  ;;  %v2342_v51 = vpop.f32.mrb[151].mxu1 }
 0x356   : > { %v2550_v45 = vmax.f32 %v2549_v29, %v1989_v26  ;;  %v2676_v63 = vmax.f32 %v2675_v19, %v2342_v51 }
 0x357   : > { %3094 = vmatmul.mubr.bf16.gmra.mrb[0].mxu0 %v5145_v22  ;;  %3447 = vmatmul.mubr.bf16.gmra.mrb[0].mxu1 %v5145_v22 }
 0x358   : > { %3103 = vmatprep.mubr.bf16.mxu0 %v4544_v31  ;;  %3456 = vmatprep.mubr.bf16.mxu1 %v4544_v31 }
 0x35a   : > { %v1993_v27 = vpop.f32.mrb[152].mxu0  ;;  %v2346_v30 = vpop.f32.mrb[152].mxu1 }
 0x35b   : > { %v2488_v32 = vmax.f32 %v2487_v25, %v1993_v27  ;;  %v2614_v53 = vmax.f32 %v2613_v2, %v2346_v30  ;;  %v1995_v33 = vpop.f32.mrb[153].mxu0  ;;  %v2348_v34 = vpop.f32.mrb[153].mxu1 }
 0x35c   : > { %v2551_v43 = vmax.f32 %v2550_v45, %v1995_v33  ;;  %v2677_v44 = vmax.f32 %v2676_v63, %v2348_v34  ;;  %v1997_v55 = vpop.f32.mrb[154].mxu0  ;;  %v2350_v56 = vpop.f32.mrb[154].mxu1 }
 0x35d   : > { %v2489_v6 = vmax.f32 %v2488_v32, %v1997_v55  ;;  %v2615_v28 = vmax.f32 %v2614_v53, %v2350_v56  ;;  %v1999_v57 = vpop.f32.mrb[155].mxu0  ;;  %v2352_v58 = vpop.f32.mrb[155].mxu1 }
 0x35e   : > { %v2552_v49 = vmax.f32 %v2551_v43, %v1999_v57  ;;  %v2678_v22 = vmax.f32 %v2677_v44, %v2352_v58 }
 0x35f   : > { %3104 = vmatmul.mubr.bf16.gmra.mrb[4].mxu0 %v5143_v21  ;;  %3457 = vmatmul.mubr.bf16.gmra.mrb[4].mxu1 %v5143_v21 }
 0x360   : > { %3113 = vmatprep.mubr.bf16.mxu0 %v4544_v31  ;;  %3466 = vmatprep.mubr.bf16.mxu1 %v4544_v31 }
 0x362   : > { %v2003_v59 = vpop.f32.mrb[156].mxu0  ;;  %v2356_v60 = vpop.f32.mrb[156].mxu1 }
 0x363   : > { %v2490_v1 = vmax.f32 %v2489_v6, %v2003_v59  ;;  %v2616_v61 = vmax.f32 %v2615_v28, %v2356_v60  ;;  %v2005_v62 = vpop.f32.mrb[157].mxu0  ;;  %v2358_v41 = vpop.f32.mrb[157].mxu1 }
 0x364   : > { %v2553_v9 = vmax.f32 %v2552_v49, %v2005_v62  ;;  %v2679_v36 = vmax.f32 %v2678_v22, %v2358_v41  ;;  %v2007_v37 = vpop.f32.mrb[158].mxu0  ;;  %v2360_v20 = vpop.f32.mrb[158].mxu1 }
 0x365   : > { %v2491_v3 = vmax.f32 %v2490_v1, %v2007_v37  ;;  %v2617_v4 = vmax.f32 %v2616_v61, %v2360_v20  ;;  %v2009_v23 = vpop.f32.mrb[159].mxu0  ;;  %v2362_v5 = vpop.f32.mrb[159].mxu1 }
 0x366   : > { %v2554_v7 = vmax.f32 %v2553_v9, %v2009_v23  ;;  %v2680_v21 = vmax.f32 %v2679_v36, %v2362_v5 }
 0x367   : > { %3114 = vmatmul.mubr.bf16.gmra.mrb[8].mxu0 %v5157_v40  ;;  %3467 = vmatmul.mubr.bf16.gmra.mrb[8].mxu1 %v5157_v40 }
 0x368   : > { %3123 = vmatprep.mubr.bf16.mxu0 %v4544_v31  ;;  %3476 = vmatprep.mubr.bf16.mxu1 %v4544_v31 }
 0x36a   : > { %v2013_v0 = vpop.f32.mrb[160].mxu0  ;;  %v2366_v54 = vpop.f32.mrb[160].mxu1 }
 0x36b   : > { %v2492_v10 = vmax.f32 %v2491_v3, %v2013_v0  ;;  %v2618_v11 = vmax.f32 %v2617_v4, %v2366_v54  ;;  %v2015_v14 = vpop.f32.mrb[161].mxu0  ;;  %v2368_v15 = vpop.f32.mrb[161].mxu1 }
 0x36c   : > { %v2555_v18 = vmax.f32 %v2554_v7, %v2015_v14  ;;  %v2681_v29 = vmax.f32 %v2680_v21, %v2368_v15  ;;  %v2017_v19 = vpop.f32.mrb[162].mxu0  ;;  %v2370_v8 = vpop.f32.mrb[162].mxu1 }
 0x36d   : > { %v2493_v24 = vmax.f32 %v2492_v10, %v2017_v19  ;;  %v2619_v25 = vmax.f32 %v2618_v11, %v2370_v8  ;;  %v2019_v2 = vpop.f32.mrb[163].mxu0  ;;  %v2372_v26 = vpop.f32.mrb[163].mxu1 }
 0x36e   : > { %v2556_v51 = vmax.f32 %v2555_v18, %v2019_v2  ;;  %v2682_v40 = vmax.f32 %v2681_v29, %v2372_v26 }
 0x36f   : > { %3124 = vmatmul.mubr.bf16.gmra.mrb[12].mxu0 %v5155_v52  ;;  %3477 = vmatmul.mubr.bf16.gmra.mrb[12].mxu1 %v5155_v52 }
 0x370   : > { %3133 = vmatprep.mubr.bf16.mxu0 %v4544_v31  ;;  %3486 = vmatprep.mubr.bf16.mxu1 %v4544_v31 }
 0x372   : > { %v2023_v45 = vpop.f32.mrb[164].mxu0  ;;  %v2376_v63 = vpop.f32.mrb[164].mxu1 }
 0x373   : > { %v2494_v27 = vmax.f32 %v2493_v24, %v2023_v45  ;;  %v2620_v30 = vmax.f32 %v2619_v25, %v2376_v63  ;;  %v2025_v32 = vpop.f32.mrb[165].mxu0  ;;  %v2378_v53 = vpop.f32.mrb[165].mxu1 }
 0x374   : > { %v2557_v33 = vmax.f32 %v2556_v51, %v2025_v32  ;;  %v2683_v34 = vmax.f32 %v2682_v40, %v2378_v53  ;;  %v2027_v43 = vpop.f32.mrb[166].mxu0  ;;  %v2380_v44 = vpop.f32.mrb[166].mxu1 }
 0x375   : > { %v2495_v55 = vmax.f32 %v2494_v27, %v2027_v43  ;;  %v2621_v56 = vmax.f32 %v2620_v30, %v2380_v44  ;;  %v2029_v6 = vpop.f32.mrb[167].mxu0  ;;  %v2382_v28 = vpop.f32.mrb[167].mxu1 }
 0x376   : > { %v2558_v57 = vmax.f32 %v2557_v33, %v2029_v6  ;;  %v2684_v52 = vmax.f32 %v2683_v34, %v2382_v28 }
 0x377   : > { %3134 = vmatmul.mubr.bf16.gmra.mrb[16].mxu0 %v5169_v42  ;;  %3487 = vmatmul.mubr.bf16.gmra.mrb[16].mxu1 %v5169_v42 }
 0x378   : > { %3143 = vmatprep.mubr.bf16.mxu0 %v4544_v31  ;;  %3496 = vmatprep.mubr.bf16.mxu1 %v4544_v31 }
 0x37a   : > { %v2033_v58 = vpop.f32.mrb[168].mxu0  ;;  %v2386_v49 = vpop.f32.mrb[168].mxu1 }
 0x37b   : > { %v2496_v22 = vmax.f32 %v2495_v55, %v2033_v58  ;;  %v2622_v59 = vmax.f32 %v2621_v56, %v2386_v49  ;;  %v2035_v60 = vpop.f32.mrb[169].mxu0  ;;  %v2388_v1 = vpop.f32.mrb[169].mxu1 }
 0x37c   : > { %v2559_v61 = vmax.f32 %v2558_v57, %v2035_v60  ;;  %v2685_v62 = vmax.f32 %v2684_v52, %v2388_v1  ;;  %v2037_v41 = vpop.f32.mrb[170].mxu0  ;;  %v2390_v9 = vpop.f32.mrb[170].mxu1 }
 0x37d   : > { %v2497_v36 = vmax.f32 %v2496_v22, %v2037_v41  ;;  %v2623_v37 = vmax.f32 %v2622_v59, %v2390_v9  ;;  %v2039_v20 = vpop.f32.mrb[171].mxu0  ;;  %v2392_v3 = vpop.f32.mrb[171].mxu1 }
 0x37e   : > { %v2560_v4 = vmax.f32 %v2559_v61, %v2039_v20  ;;  %v2686_v42 = vmax.f32 %v2685_v62, %v2392_v3 }
 0x37f   : > { %3144 = vmatmul.mubr.bf16.gmra.mrb[20].mxu0 %v5167_v38  ;;  %3497 = vmatmul.mubr.bf16.gmra.mrb[20].mxu1 %v5167_v38 }
 0x380   : > { %3153 = vmatprep.mubr.bf16.mxu0 %v4544_v31  ;;  %3506 = vmatprep.mubr.bf16.mxu1 %v4544_v31 }
 0x382   : > { %v2043_v23 = vpop.f32.mrb[172].mxu0  ;;  %v2396_v5 = vpop.f32.mrb[172].mxu1 }
 0x383   : > { %v2498_v7 = vmax.f32 %v2497_v36, %v2043_v23  ;;  %v2624_v21 = vmax.f32 %v2623_v37, %v2396_v5  ;;  %v2045_v0 = vpop.f32.mrb[173].mxu0  ;;  %v2398_v54 = vpop.f32.mrb[173].mxu1 }
 0x384   : > { %v2561_v10 = vmax.f32 %v2560_v4, %v2045_v0  ;;  %v2687_v11 = vmax.f32 %v2686_v42, %v2398_v54  ;;  %v2047_v14 = vpop.f32.mrb[174].mxu0  ;;  %v2400_v15 = vpop.f32.mrb[174].mxu1 }
 0x385   : > { %v2499_v18 = vmax.f32 %v2498_v7, %v2047_v14  ;;  %v2625_v29 = vmax.f32 %v2624_v21, %v2400_v15  ;;  %v2049_v19 = vpop.f32.mrb[175].mxu0  ;;  %v2402_v8 = vpop.f32.mrb[175].mxu1 }
 0x386   : > { %v2562_v24 = vmax.f32 %v2561_v10, %v2049_v19  ;;  %v2688_v38 = vmax.f32 %v2687_v11, %v2402_v8 }
 0x387   : > { %3154 = vmatmul.mubr.bf16.gmra.mrb[24].mxu0 %v5181_v17  ;;  %3507 = vmatmul.mubr.bf16.gmra.mrb[24].mxu1 %v5181_v17 }
 0x388   : > { %3163 = vmatprep.mubr.bf16.mxu0 %v4544_v31  ;;  %3516 = vmatprep.mubr.bf16.mxu1 %v4544_v31 }
 0x38a   : > { %v2053_v25 = vpop.f32.mrb[176].mxu0  ;;  %v2406_v2 = vpop.f32.mrb[176].mxu1 }
 0x38b   : > { %v2500_v26 = vmax.f32 %v2499_v18, %v2053_v25  ;;  %v2626_v51 = vmax.f32 %v2625_v29, %v2406_v2  ;;  %v2055_v40 = vpop.f32.mrb[177].mxu0  ;;  %v2408_v45 = vpop.f32.mrb[177].mxu1 }
 0x38c   : > { %v2563_v63 = vmax.f32 %v2562_v24, %v2055_v40  ;;  %v2689_v27 = vmax.f32 %v2688_v38, %v2408_v45  ;;  %v2057_v30 = vpop.f32.mrb[178].mxu0  ;;  %v2410_v32 = vpop.f32.mrb[178].mxu1 }
 0x38d   : > { %v2501_v53 = vmax.f32 %v2500_v26, %v2057_v30  ;;  %v2627_v33 = vmax.f32 %v2626_v51, %v2410_v32  ;;  %v2059_v34 = vpop.f32.mrb[179].mxu0  ;;  %v2412_v43 = vpop.f32.mrb[179].mxu1 }
 0x38e   : > { %v2564_v44 = vmax.f32 %v2563_v63, %v2059_v34  ;;  %v2690_v17 = vmax.f32 %v2689_v27, %v2412_v43 }
 0x38f   : > { %3164 = vmatmul.mubr.bf16.gmra.mrb[28].mxu0 %v5179_v16  ;;  %3517 = vmatmul.mubr.bf16.gmra.mrb[28].mxu1 %v5179_v16 }
 0x390   : > { %3173 = vmatprep.mubr.bf16.mxu0 %v4544_v31  ;;  %3526 = vmatprep.mubr.bf16.mxu1 %v4544_v31 }
 0x392   : > { %v2063_v55 = vpop.f32.mrb[180].mxu0  ;;  %v2416_v56 = vpop.f32.mrb[180].mxu1 }
 0x393   : > { %v2502_v6 = vmax.f32 %v2501_v53, %v2063_v55  ;;  %v2628_v28 = vmax.f32 %v2627_v33, %v2416_v56  ;;  %v2065_v57 = vpop.f32.mrb[181].mxu0  ;;  %v2418_v52 = vpop.f32.mrb[181].mxu1 }
 0x394   : > { %v2565_v58 = vmax.f32 %v2564_v44, %v2065_v57  ;;  %v2691_v49 = vmax.f32 %v2690_v17, %v2418_v52  ;;  %v2067_v22 = vpop.f32.mrb[182].mxu0  ;;  %v2420_v59 = vpop.f32.mrb[182].mxu1 }
 0x395   : > { %v2503_v60 = vmax.f32 %v2502_v6, %v2067_v22  ;;  %v2629_v1 = vmax.f32 %v2628_v28, %v2420_v59  ;;  %v2069_v61 = vpop.f32.mrb[183].mxu0  ;;  %v2422_v62 = vpop.f32.mrb[183].mxu1 }
 0x396   : > { %v2566_v41 = vmax.f32 %v2565_v58, %v2069_v61  ;;  %v2692_v16 = vmax.f32 %v2691_v49, %v2422_v62 }
 0x397   : > { %3174 = vmatmul.mubr.bf16.gmra.mrb[32].mxu0 %v5193_v48  ;;  %3527 = vmatmul.mubr.bf16.gmra.mrb[32].mxu1 %v5193_v48 }
 0x398   : > { %3183 = vmatprep.mubr.bf16.mxu0 %v4544_v31  ;;  %3536 = vmatprep.mubr.bf16.mxu1 %v4544_v31 }
 0x39a   : > { %v2073_v9 = vpop.f32.mrb[184].mxu0  ;;  %v2426_v36 = vpop.f32.mrb[184].mxu1 }
 0x39b   : > { %v2504_v37 = vmax.f32 %v2503_v60, %v2073_v9  ;;  %v2630_v20 = vmax.f32 %v2629_v1, %v2426_v36  ;;  %v2075_v3 = vpop.f32.mrb[185].mxu0  ;;  %v2428_v4 = vpop.f32.mrb[185].mxu1 }
 0x39c   : > { %v2567_v42 = vmax.f32 %v2566_v41, %v2075_v3  ;;  %v2693_v23 = vmax.f32 %v2692_v16, %v2428_v4  ;;  %v2077_v5 = vpop.f32.mrb[186].mxu0  ;;  %v2430_v7 = vpop.f32.mrb[186].mxu1 }
 0x39d   : > { %v2505_v21 = vmax.f32 %v2504_v37, %v2077_v5  ;;  %v2631_v0 = vmax.f32 %v2630_v20, %v2430_v7  ;;  %v2079_v54 = vpop.f32.mrb[187].mxu0  ;;  %v2432_v48 = vpop.f32.mrb[187].mxu1 }
 0x39e   : > { %v2568_v10 = vmax.f32 %v2567_v42, %v2079_v54  ;;  %v2694_v11 = vmax.f32 %v2693_v23, %v2432_v48 }
 0x39f   : > { %3184 = vmatmul.mubr.bf16.gmra.mrb[36].mxu0 %v5191_v47  ;;  %3537 = vmatmul.mubr.bf16.gmra.mrb[36].mxu1 %v5191_v47 }
 0x3a0   : > { %3193 = vmatprep.mubr.bf16.mxu0 %v4544_v31  ;;  %3546 = vmatprep.mubr.bf16.mxu1 %v4544_v31 }
 0x3a2   : > { %v2083_v14 = vpop.f32.mrb[188].mxu0  ;;  %v2436_v15 = vpop.f32.mrb[188].mxu1 }
 0x3a3   : > { %v2506_v18 = vmax.f32 %v2505_v21, %v2083_v14  ;;  %v2632_v29 = vmax.f32 %v2631_v0, %v2436_v15  ;;  %v2085_v19 = vpop.f32.mrb[189].mxu0  ;;  %v2438_v8 = vpop.f32.mrb[189].mxu1 }
 0x3a4   : > { %v2569_v24 = vmax.f32 %v2568_v10, %v2085_v19  ;;  %v2695_v38 = vmax.f32 %v2694_v11, %v2438_v8  ;;  %v2087_v25 = vpop.f32.mrb[190].mxu0  ;;  %v2440_v2 = vpop.f32.mrb[190].mxu1 }
 0x3a5   : > { %v2507_v26 = vmax.f32 %v2506_v18, %v2087_v25  ;;  %v2633_v51 = vmax.f32 %v2632_v29, %v2440_v2  ;;  %v2089_v40 = vpop.f32.mrb[191].mxu0  ;;  %v2442_v47 = vpop.f32.mrb[191].mxu1 }
 0x3a6   : > { %v2570_v45 = vmax.f32 %v2569_v24, %v2089_v40  ;;  %v2696_v63 = vmax.f32 %v2695_v38, %v2442_v47 }
 0x3a7   : > { %3882 = vst [vmem:[%s5418_s20] sm:$0xff] %v2507_v26  ;;  %3884 = vst [vmem:[%s5418_s20 + $0x10] sm:$0xff] %v2633_v51  ;;  %3194 = vmatmul.mubr.bf16.gmra.mrb[40].mxu0 %v5217_v13  ;;  %3547 = vmatmul.mubr.bf16.gmra.mrb[40].mxu1 %v5217_v13 }
 0x3a8   : > { %3883 = vst [vmem:[%s5418_s20 + $0x8] sm:$0xff] %v2570_v45  ;;  %3885 = vst [vmem:[%s5418_s20 + $0x18] sm:$0xff] %v2696_v63  ;;  %3203 = vmatprep.mubr.bf16.mxu0 %v4544_v31  ;;  %3556 = vmatprep.mubr.bf16.mxu1 %v4544_v31 }
 0x3aa   : > { %v2935_v27 = vpop.f32.mrb[192].mxu0  ;;  %v3288_v30 = vpop.f32.mrb[192].mxu1 }
 0x3ab   : > { %v2937_v32 = vpop.f32.mrb[193].mxu0  ;;  %v3290_v53 = vpop.f32.mrb[193].mxu1 }
 0x3ac   : > { %v2939_v33 = vpop.f32.mrb[194].mxu0  ;;  %v3292_v34 = vpop.f32.mrb[194].mxu1 }
 0x3ad   : > { %v3607_v43 = vmax.f32 %v2935_v27, %v2939_v33  ;;  %v3733_v44 = vmax.f32 %v3288_v30, %v3292_v34  ;;  %v2941_v17 = vpop.f32.mrb[195].mxu0  ;;  %v3294_v55 = vpop.f32.mrb[195].mxu1 }
 0x3ae   : > { %v3670_v56 = vmax.f32 %v2937_v32, %v2941_v17  ;;  %v3796_v6 = vmax.f32 %v3290_v53, %v3294_v55 }
 0x3af   : > { %3204 = vmatmul.mubr.bf16.gmra.mrb[44].mxu0 %v5215_v12  ;;  %3557 = vmatmul.mubr.bf16.gmra.mrb[44].mxu1 %v5215_v12 }
 0x3b0   : > { %3213 = vmatprep.mubr.bf16.mxu0 %v4544_v31  ;;  %3566 = vmatprep.mubr.bf16.mxu1 %v4544_v31 }
 0x3b2   : > { %v2945_v13 = vpop.f32.mrb[196].mxu0  ;;  %v3298_v28 = vpop.f32.mrb[196].mxu1 }
 0x3b3   : > { %v3608_v57 = vmax.f32 %v3607_v43, %v2945_v13  ;;  %v3734_v52 = vmax.f32 %v3733_v44, %v3298_v28  ;;  %v2947_v58 = vpop.f32.mrb[197].mxu0  ;;  %v3300_v49 = vpop.f32.mrb[197].mxu1 }
 0x3b4   : > { %v3671_v22 = vmax.f32 %v3670_v56, %v2947_v58  ;;  %v3797_v59 = vmax.f32 %v3796_v6, %v3300_v49  ;;  %v2949_v60 = vpop.f32.mrb[198].mxu0  ;;  %v3302_v1 = vpop.f32.mrb[198].mxu1 }
 0x3b5   : > { %v3609_v61 = vmax.f32 %v3608_v57, %v2949_v60  ;;  %v3735_v62 = vmax.f32 %v3734_v52, %v3302_v1  ;;  %v2951_v41 = vpop.f32.mrb[199].mxu0  ;;  %v3304_v16 = vpop.f32.mrb[199].mxu1 }
 0x3b6   : > { %v3672_v9 = vmax.f32 %v3671_v22, %v2951_v41  ;;  %v3798_v12 = vmax.f32 %v3797_v59, %v3304_v16 }
 0x3b7   : > { %3214 = vmatmul.mubr.bf16.gmra.mrb[48].mxu0 %v5229_v39  ;;  %3567 = vmatmul.mubr.bf16.gmra.mrb[48].mxu1 %v5229_v39 }
 0x3b8   : > { %3223 = vmatprep.mubr.bf16.mxu0 %v4544_v31  ;;  %3576 = vmatprep.mubr.bf16.mxu1 %v4544_v31 }
 0x3ba   : > { %v2955_v36 = vpop.f32.mrb[200].mxu0  ;;  %v3308_v37 = vpop.f32.mrb[200].mxu1 }
 0x3bb   : > { %v3610_v20 = vmax.f32 %v3609_v61, %v2955_v36  ;;  %v3736_v3 = vmax.f32 %v3735_v62, %v3308_v37  ;;  %v2957_v4 = vpop.f32.mrb[201].mxu0  ;;  %v3310_v42 = vpop.f32.mrb[201].mxu1 }
 0x3bc   : > { %v3673_v23 = vmax.f32 %v3672_v9, %v2957_v4  ;;  %v3799_v5 = vmax.f32 %v3798_v12, %v3310_v42  ;;  %v2959_v7 = vpop.f32.mrb[202].mxu0  ;;  %v3312_v21 = vpop.f32.mrb[202].mxu1 }
 0x3bd   : > { %v3611_v0 = vmax.f32 %v3610_v20, %v2959_v7  ;;  %v3737_v54 = vmax.f32 %v3736_v3, %v3312_v21  ;;  %v2961_v48 = vpop.f32.mrb[203].mxu0  ;;  %v3314_v10 = vpop.f32.mrb[203].mxu1 }
 0x3be   : > { %v3674_v11 = vmax.f32 %v3673_v23, %v2961_v48  ;;  %v3800_v39 = vmax.f32 %v3799_v5, %v3314_v10 }
 0x3bf   : > { %3224 = vmatmul.mubr.bf16.gmra.mrb[52].mxu0 %v5227_v35  ;;  %3577 = vmatmul.mubr.bf16.gmra.mrb[52].mxu1 %v5227_v35 }
 0x3c0   : > { %3233 = vmatprep.mubr.bf16.mxu0 %v4544_v31  ;;  %3586 = vmatprep.mubr.bf16.mxu1 %v4544_v31 }
 0x3c2   : > { %v2965_v14 = vpop.f32.mrb[204].mxu0  ;;  %v3318_v15 = vpop.f32.mrb[204].mxu1 }
 0x3c3   : > { %v3612_v18 = vmax.f32 %v3611_v0, %v2965_v14  ;;  %v3738_v29 = vmax.f32 %v3737_v54, %v3318_v15  ;;  %v2967_v19 = vpop.f32.mrb[205].mxu0  ;;  %v3320_v8 = vpop.f32.mrb[205].mxu1 }
 0x3c4   : > { %v3675_v24 = vmax.f32 %v3674_v11, %v2967_v19  ;;  %v3801_v38 = vmax.f32 %v3800_v39, %v3320_v8  ;;  %v2969_v25 = vpop.f32.mrb[206].mxu0  ;;  %v3322_v2 = vpop.f32.mrb[206].mxu1 }
 0x3c5   : > { %v3613_v26 = vmax.f32 %v3612_v18, %v2969_v25  ;;  %v3739_v51 = vmax.f32 %v3738_v29, %v3322_v2  ;;  %v2971_v40 = vpop.f32.mrb[207].mxu0  ;;  %v3324_v47 = vpop.f32.mrb[207].mxu1 }
 0x3c6   : > { %v3676_v45 = vmax.f32 %v3675_v24, %v2971_v40  ;;  %v3802_v35 = vmax.f32 %v3801_v38, %v3324_v47 }
 0x3c7   : > { %3234 = vmatmul.mubr.bf16.gmra.mrb[56].mxu0 %v5241_v50  ;;  %3587 = vmatmul.mubr.bf16.gmra.mrb[56].mxu1 %v5241_v50 }
 0x3c8   : > { %3243 = vmatprep.mubr.bf16.mxu0 %v4544_v31  ;;  %3596 = vmatprep.mubr.bf16.mxu1 %v4544_v31 }
 0x3ca   : > { %v2975_v63 = vpop.f32.mrb[208].mxu0  ;;  %v3328_v27 = vpop.f32.mrb[208].mxu1 }
 0x3cb   : > { %v3614_v30 = vmax.f32 %v3613_v26, %v2975_v63  ;;  %v3740_v32 = vmax.f32 %v3739_v51, %v3328_v27  ;;  %v2977_v53 = vpop.f32.mrb[209].mxu0  ;;  %v3330_v33 = vpop.f32.mrb[209].mxu1 }
 0x3cc   : > { %v3677_v34 = vmax.f32 %v3676_v45, %v2977_v53  ;;  %v3803_v43 = vmax.f32 %v3802_v35, %v3330_v33  ;;  %v2979_v44 = vpop.f32.mrb[210].mxu0  ;;  %v3332_v17 = vpop.f32.mrb[210].mxu1 }
 0x3cd   : > { %v3615_v55 = vmax.f32 %v3614_v30, %v2979_v44  ;;  %v3741_v56 = vmax.f32 %v3740_v32, %v3332_v17  ;;  %v2981_v6 = vpop.f32.mrb[211].mxu0  ;;  %v3334_v13 = vpop.f32.mrb[211].mxu1 }
 0x3ce   : > { %v3678_v28 = vmax.f32 %v3677_v34, %v2981_v6  ;;  %v3804_v50 = vmax.f32 %v3803_v43, %v3334_v13 }
 0x3cf   : > { %3244 = vmatmul.mubr.bf16.gmra.mrb[60].mxu0 %v5239_v46  ;;  %3597 = vmatmul.mubr.bf16.gmra.mrb[60].mxu1 %v5239_v46 }
 0x3d2   : > { %v2985_v31 = vpop.f32.mrb[212].mxu0  ;;  %v3338_v57 = vpop.f32.mrb[212].mxu1 }
 0x3d3   : > { %v3616_v52 = vmax.f32 %v3615_v55, %v2985_v31  ;;  %v3742_v58 = vmax.f32 %v3741_v56, %v3338_v57  ;;  %v2987_v49 = vpop.f32.mrb[213].mxu0  ;;  %v3340_v22 = vpop.f32.mrb[213].mxu1 }
 0x3d4   : > { %v3679_v59 = vmax.f32 %v3678_v28, %v2987_v49  ;;  %v3805_v60 = vmax.f32 %v3804_v50, %v3340_v22  ;;  %v2989_v1 = vpop.f32.mrb[214].mxu0  ;;  %v3342_v61 = vpop.f32.mrb[214].mxu1 }
 0x3d5   : > { %v3617_v62 = vmax.f32 %v3616_v52, %v2989_v1  ;;  %v3743_v41 = vmax.f32 %v3742_v58, %v3342_v61  ;;  %v2991_v16 = vpop.f32.mrb[215].mxu0  ;;  %v3344_v9 = vpop.f32.mrb[215].mxu1 }
 0x3d6   : > { %v3680_v12 = vmax.f32 %v3679_v59, %v2991_v16  ;;  %v3806_v36 = vmax.f32 %v3805_v60, %v3344_v9 }
 0x3da   : > { %v2995_v37 = vpop.f32.mrb[216].mxu0  ;;  %v3348_v20 = vpop.f32.mrb[216].mxu1 }
 0x3db   : > { %v3618_v3 = vmax.f32 %v3617_v62, %v2995_v37  ;;  %v3744_v46 = vmax.f32 %v3743_v41, %v3348_v20  ;;  %v2997_v4 = vpop.f32.mrb[217].mxu0  ;;  %v3350_v42 = vpop.f32.mrb[217].mxu1 }
 0x3dc   : > { %v3681_v23 = vmax.f32 %v3680_v12, %v2997_v4  ;;  %v3807_v5 = vmax.f32 %v3806_v36, %v3350_v42  ;;  %v2999_v7 = vpop.f32.mrb[218].mxu0  ;;  %v3352_v21 = vpop.f32.mrb[218].mxu1 }
 0x3dd   : > { %v3619_v0 = vmax.f32 %v3618_v3, %v2999_v7  ;;  %v3745_v54 = vmax.f32 %v3744_v46, %v3352_v21  ;;  %v3001_v48 = vpop.f32.mrb[219].mxu0  ;;  %v3354_v10 = vpop.f32.mrb[219].mxu1 }
 0x3de   : > { %v3682_v11 = vmax.f32 %v3681_v23, %v3001_v48  ;;  %v3808_v39 = vmax.f32 %v3807_v5, %v3354_v10 }
 0x3e2   : > { %v3005_v14 = vpop.f32.mrb[220].mxu0  ;;  %v3358_v15 = vpop.f32.mrb[220].mxu1 }
 0x3e3   : > { %v3620_v18 = vmax.f32 %v3619_v0, %v3005_v14  ;;  %v3746_v29 = vmax.f32 %v3745_v54, %v3358_v15  ;;  %v3007_v19 = vpop.f32.mrb[221].mxu0  ;;  %v3360_v8 = vpop.f32.mrb[221].mxu1 }
 0x3e4   : > { %v3683_v24 = vmax.f32 %v3682_v11, %v3007_v19  ;;  %v3809_v38 = vmax.f32 %v3808_v39, %v3360_v8  ;;  %v3009_v25 = vpop.f32.mrb[222].mxu0  ;;  %v3362_v2 = vpop.f32.mrb[222].mxu1 }
 0x3e5   : > { %v3621_v26 = vmax.f32 %v3620_v18, %v3009_v25  ;;  %v3747_v51 = vmax.f32 %v3746_v29, %v3362_v2  ;;  %v3011_v40 = vpop.f32.mrb[223].mxu0  ;;  %v3364_v47 = vpop.f32.mrb[223].mxu1 }
 0x3e6   : > { %v3684_v45 = vmax.f32 %v3683_v24, %v3011_v40  ;;  %v3810_v35 = vmax.f32 %v3809_v38, %v3364_v47 }
 0x3ea   : > { %v3015_v63 = vpop.f32.mrb[224].mxu0  ;;  %v3368_v27 = vpop.f32.mrb[224].mxu1 }
 0x3eb   : > { %v3622_v30 = vmax.f32 %v3621_v26, %v3015_v63  ;;  %v3748_v32 = vmax.f32 %v3747_v51, %v3368_v27  ;;  %v3017_v53 = vpop.f32.mrb[225].mxu0  ;;  %v3370_v33 = vpop.f32.mrb[225].mxu1 }
 0x3ec   : > { %v3685_v34 = vmax.f32 %v3684_v45, %v3017_v53  ;;  %v3811_v43 = vmax.f32 %v3810_v35, %v3370_v33  ;;  %v3019_v44 = vpop.f32.mrb[226].mxu0  ;;  %v3372_v17 = vpop.f32.mrb[226].mxu1 }
 0x3ed   : > { %v3623_v55 = vmax.f32 %v3622_v30, %v3019_v44  ;;  %v3749_v56 = vmax.f32 %v3748_v32, %v3372_v17  ;;  %v3021_v6 = vpop.f32.mrb[227].mxu0  ;;  %v3374_v13 = vpop.f32.mrb[227].mxu1 }
 0x3ee   : > { %v3686_v28 = vmax.f32 %v3685_v34, %v3021_v6  ;;  %v3812_v50 = vmax.f32 %v3811_v43, %v3374_v13 }
 0x3f2   : > { %v3025_v31 = vpop.f32.mrb[228].mxu0  ;;  %v3378_v57 = vpop.f32.mrb[228].mxu1 }
 0x3f3   : > { %v3624_v52 = vmax.f32 %v3623_v55, %v3025_v31  ;;  %v3750_v58 = vmax.f32 %v3749_v56, %v3378_v57  ;;  %v3027_v49 = vpop.f32.mrb[229].mxu0  ;;  %v3380_v22 = vpop.f32.mrb[229].mxu1 }
 0x3f4   : > { %v3687_v59 = vmax.f32 %v3686_v28, %v3027_v49  ;;  %v3813_v60 = vmax.f32 %v3812_v50, %v3380_v22  ;;  %v3029_v1 = vpop.f32.mrb[230].mxu0  ;;  %v3382_v61 = vpop.f32.mrb[230].mxu1 }
 0x3f5   : > { %v3625_v62 = vmax.f32 %v3624_v52, %v3029_v1  ;;  %v3751_v41 = vmax.f32 %v3750_v58, %v3382_v61  ;;  %v3031_v16 = vpop.f32.mrb[231].mxu0  ;;  %v3384_v9 = vpop.f32.mrb[231].mxu1 }
 0x3f6   : > { %v3688_v12 = vmax.f32 %v3687_v59, %v3031_v16  ;;  %v3814_v36 = vmax.f32 %v3813_v60, %v3384_v9 }
 0x3fa   : > { %v3035_v37 = vpop.f32.mrb[232].mxu0  ;;  %v3388_v20 = vpop.f32.mrb[232].mxu1 }
 0x3fb   : > { %v3626_v3 = vmax.f32 %v3625_v62, %v3035_v37  ;;  %v3752_v46 = vmax.f32 %v3751_v41, %v3388_v20  ;;  %v3037_v4 = vpop.f32.mrb[233].mxu0  ;;  %v3390_v42 = vpop.f32.mrb[233].mxu1 }
 0x3fc   : > { %v3689_v23 = vmax.f32 %v3688_v12, %v3037_v4  ;;  %v3815_v5 = vmax.f32 %v3814_v36, %v3390_v42  ;;  %v3039_v7 = vpop.f32.mrb[234].mxu0  ;;  %v3392_v21 = vpop.f32.mrb[234].mxu1 }
 0x3fd   : > { %v3627_v0 = vmax.f32 %v3626_v3, %v3039_v7  ;;  %v3753_v54 = vmax.f32 %v3752_v46, %v3392_v21  ;;  %v3041_v48 = vpop.f32.mrb[235].mxu0  ;;  %v3394_v10 = vpop.f32.mrb[235].mxu1 }
 0x3fe   : > { %v3690_v11 = vmax.f32 %v3689_v23, %v3041_v48  ;;  %v3816_v39 = vmax.f32 %v3815_v5, %v3394_v10 }
 0x402   : > { %v3045_v14 = vpop.f32.mrb[236].mxu0  ;;  %v3398_v15 = vpop.f32.mrb[236].mxu1 }
 0x403   : > { %v3628_v18 = vmax.f32 %v3627_v0, %v3045_v14  ;;  %v3754_v29 = vmax.f32 %v3753_v54, %v3398_v15  ;;  %v3047_v19 = vpop.f32.mrb[237].mxu0  ;;  %v3400_v8 = vpop.f32.mrb[237].mxu1 }
 0x404   : > { %v3691_v24 = vmax.f32 %v3690_v11, %v3047_v19  ;;  %v3817_v38 = vmax.f32 %v3816_v39, %v3400_v8  ;;  %v3049_v25 = vpop.f32.mrb[238].mxu0  ;;  %v3402_v2 = vpop.f32.mrb[238].mxu1 }
 0x405   : > { %v3629_v26 = vmax.f32 %v3628_v18, %v3049_v25  ;;  %v3755_v51 = vmax.f32 %v3754_v29, %v3402_v2  ;;  %v3051_v40 = vpop.f32.mrb[239].mxu0  ;;  %v3404_v47 = vpop.f32.mrb[239].mxu1 }
 0x406   : > { %v3692_v45 = vmax.f32 %v3691_v24, %v3051_v40  ;;  %v3818_v35 = vmax.f32 %v3817_v38, %v3404_v47 }
 0x40a   : > { %v3055_v63 = vpop.f32.mrb[240].mxu0  ;;  %v3408_v27 = vpop.f32.mrb[240].mxu1 }
 0x40b   : > { %v3630_v30 = vmax.f32 %v3629_v26, %v3055_v63  ;;  %v3756_v32 = vmax.f32 %v3755_v51, %v3408_v27  ;;  %v3057_v53 = vpop.f32.mrb[241].mxu0  ;;  %v3410_v33 = vpop.f32.mrb[241].mxu1 }
 0x40c   : > { %v3693_v34 = vmax.f32 %v3692_v45, %v3057_v53  ;;  %v3819_v43 = vmax.f32 %v3818_v35, %v3410_v33  ;;  %v3059_v44 = vpop.f32.mrb[242].mxu0  ;;  %v3412_v17 = vpop.f32.mrb[242].mxu1 }
 0x40d   : > { %v3631_v55 = vmax.f32 %v3630_v30, %v3059_v44  ;;  %v3757_v56 = vmax.f32 %v3756_v32, %v3412_v17  ;;  %v3061_v6 = vpop.f32.mrb[243].mxu0  ;;  %v3414_v13 = vpop.f32.mrb[243].mxu1 }
 0x40e   : > { %v3694_v28 = vmax.f32 %v3693_v34, %v3061_v6  ;;  %v3820_v50 = vmax.f32 %v3819_v43, %v3414_v13 }
 0x412   : > { %v3065_v31 = vpop.f32.mrb[244].mxu0  ;;  %v3418_v57 = vpop.f32.mrb[244].mxu1 }
 0x413   : > { %v3632_v52 = vmax.f32 %v3631_v55, %v3065_v31  ;;  %v3758_v58 = vmax.f32 %v3757_v56, %v3418_v57  ;;  %v3067_v49 = vpop.f32.mrb[245].mxu0  ;;  %v3420_v22 = vpop.f32.mrb[245].mxu1 }
 0x414   : > { %v3695_v59 = vmax.f32 %v3694_v28, %v3067_v49  ;;  %v3821_v60 = vmax.f32 %v3820_v50, %v3420_v22  ;;  %v3069_v1 = vpop.f32.mrb[246].mxu0  ;;  %v3422_v61 = vpop.f32.mrb[246].mxu1 }
 0x415   : > { %v3633_v62 = vmax.f32 %v3632_v52, %v3069_v1  ;;  %v3759_v41 = vmax.f32 %v3758_v58, %v3422_v61  ;;  %v3071_v16 = vpop.f32.mrb[247].mxu0  ;;  %v3424_v9 = vpop.f32.mrb[247].mxu1 }
 0x416   : > { %v3696_v12 = vmax.f32 %v3695_v59, %v3071_v16  ;;  %v3822_v36 = vmax.f32 %v3821_v60, %v3424_v9 }
 0x41a   : > { %v3075_v37 = vpop.f32.mrb[248].mxu0  ;;  %v3428_v20 = vpop.f32.mrb[248].mxu1 }
 0x41b   : > { %v3634_v3 = vmax.f32 %v3633_v62, %v3075_v37  ;;  %v3760_v46 = vmax.f32 %v3759_v41, %v3428_v20  ;;  %v3077_v4 = vpop.f32.mrb[249].mxu0  ;;  %v3430_v42 = vpop.f32.mrb[249].mxu1 }
 0x41c   : > { %v3697_v23 = vmax.f32 %v3696_v12, %v3077_v4  ;;  %v3823_v5 = vmax.f32 %v3822_v36, %v3430_v42  ;;  %v3079_v7 = vpop.f32.mrb[250].mxu0  ;;  %v3432_v21 = vpop.f32.mrb[250].mxu1 }
 0x41d   : > { %v3635_v0 = vmax.f32 %v3634_v3, %v3079_v7  ;;  %v3761_v54 = vmax.f32 %v3760_v46, %v3432_v21  ;;  %v3081_v48 = vpop.f32.mrb[251].mxu0  ;;  %v3434_v10 = vpop.f32.mrb[251].mxu1 }
 0x41e   : > { %v3698_v11 = vmax.f32 %v3697_v23, %v3081_v48  ;;  %v3824_v39 = vmax.f32 %v3823_v5, %v3434_v10 }
 0x422   : > { %v3085_v14 = vpop.f32.mrb[252].mxu0  ;;  %v3438_v15 = vpop.f32.mrb[252].mxu1 }
 0x423   : > { %v3636_v18 = vmax.f32 %v3635_v0, %v3085_v14  ;;  %v3762_v29 = vmax.f32 %v3761_v54, %v3438_v15  ;;  %v3087_v19 = vpop.f32.mrb[253].mxu0  ;;  %v3440_v8 = vpop.f32.mrb[253].mxu1 }
 0x424   : > { %v3699_v24 = vmax.f32 %v3698_v11, %v3087_v19  ;;  %v3825_v38 = vmax.f32 %v3824_v39, %v3440_v8  ;;  %v3089_v25 = vpop.f32.mrb[254].mxu0  ;;  %v3442_v2 = vpop.f32.mrb[254].mxu1 }
 0x425   : > { %v3637_v26 = vmax.f32 %v3636_v18, %v3089_v25  ;;  %v3763_v51 = vmax.f32 %v3762_v29, %v3442_v2  ;;  %v3091_v40 = vpop.f32.mrb[255].mxu0  ;;  %v3444_v47 = vpop.f32.mrb[255].mxu1 }
 0x426   : > { %v3700_v45 = vmax.f32 %v3699_v24, %v3091_v40  ;;  %v3826_v35 = vmax.f32 %v3825_v38, %v3444_v47 }
 0x42a   : > { %v3095_v63 = vpop.f32.mrb[0].mxu0  ;;  %v3448_v27 = vpop.f32.mrb[0].mxu1 }
 0x42b   : > { %v3638_v30 = vmax.f32 %v3637_v26, %v3095_v63  ;;  %v3764_v32 = vmax.f32 %v3763_v51, %v3448_v27  ;;  %v3097_v53 = vpop.f32.mrb[1].mxu0  ;;  %v3450_v33 = vpop.f32.mrb[1].mxu1 }
 0x42c   : > { %v3701_v34 = vmax.f32 %v3700_v45, %v3097_v53  ;;  %v3827_v43 = vmax.f32 %v3826_v35, %v3450_v33  ;;  %v3099_v44 = vpop.f32.mrb[2].mxu0  ;;  %v3452_v17 = vpop.f32.mrb[2].mxu1 }
 0x42d   : > { %v3639_v55 = vmax.f32 %v3638_v30, %v3099_v44  ;;  %v3765_v56 = vmax.f32 %v3764_v32, %v3452_v17  ;;  %v3101_v6 = vpop.f32.mrb[3].mxu0  ;;  %v3454_v13 = vpop.f32.mrb[3].mxu1 }
 0x42e   : > { %v3702_v28 = vmax.f32 %v3701_v34, %v3101_v6  ;;  %v3828_v50 = vmax.f32 %v3827_v43, %v3454_v13 }
 0x432   : > { %v3105_v31 = vpop.f32.mrb[4].mxu0  ;;  %v3458_v57 = vpop.f32.mrb[4].mxu1 }
 0x433   : > { %v3640_v52 = vmax.f32 %v3639_v55, %v3105_v31  ;;  %v3766_v58 = vmax.f32 %v3765_v56, %v3458_v57  ;;  %v3107_v49 = vpop.f32.mrb[5].mxu0  ;;  %v3460_v22 = vpop.f32.mrb[5].mxu1 }
 0x434   : > { %v3703_v59 = vmax.f32 %v3702_v28, %v3107_v49  ;;  %v3829_v60 = vmax.f32 %v3828_v50, %v3460_v22  ;;  %v3109_v1 = vpop.f32.mrb[6].mxu0  ;;  %v3462_v61 = vpop.f32.mrb[6].mxu1 }
 0x435   : > { %v3641_v62 = vmax.f32 %v3640_v52, %v3109_v1  ;;  %v3767_v41 = vmax.f32 %v3766_v58, %v3462_v61  ;;  %v3111_v16 = vpop.f32.mrb[7].mxu0  ;;  %v3464_v9 = vpop.f32.mrb[7].mxu1 }
 0x436   : > { %v3704_v12 = vmax.f32 %v3703_v59, %v3111_v16  ;;  %v3830_v36 = vmax.f32 %v3829_v60, %v3464_v9 }
 0x43a   : > { %v3115_v37 = vpop.f32.mrb[8].mxu0  ;;  %v3468_v20 = vpop.f32.mrb[8].mxu1 }
 0x43b   : > { %v3642_v3 = vmax.f32 %v3641_v62, %v3115_v37  ;;  %v3768_v46 = vmax.f32 %v3767_v41, %v3468_v20  ;;  %v3117_v4 = vpop.f32.mrb[9].mxu0  ;;  %v3470_v42 = vpop.f32.mrb[9].mxu1 }
 0x43c   : > { %v3705_v23 = vmax.f32 %v3704_v12, %v3117_v4  ;;  %v3831_v5 = vmax.f32 %v3830_v36, %v3470_v42  ;;  %v3119_v7 = vpop.f32.mrb[10].mxu0  ;;  %v3472_v21 = vpop.f32.mrb[10].mxu1 }
 0x43d   : > { %v3643_v0 = vmax.f32 %v3642_v3, %v3119_v7  ;;  %v3769_v54 = vmax.f32 %v3768_v46, %v3472_v21  ;;  %v3121_v48 = vpop.f32.mrb[11].mxu0  ;;  %v3474_v10 = vpop.f32.mrb[11].mxu1 }
 0x43e   : > { %v3706_v11 = vmax.f32 %v3705_v23, %v3121_v48  ;;  %v3832_v39 = vmax.f32 %v3831_v5, %v3474_v10 }
 0x442   : > { %v3125_v14 = vpop.f32.mrb[12].mxu0  ;;  %v3478_v15 = vpop.f32.mrb[12].mxu1 }
 0x443   : > { %v3644_v18 = vmax.f32 %v3643_v0, %v3125_v14  ;;  %v3770_v29 = vmax.f32 %v3769_v54, %v3478_v15  ;;  %v3127_v19 = vpop.f32.mrb[13].mxu0  ;;  %v3480_v8 = vpop.f32.mrb[13].mxu1 }
 0x444   : > { %v3707_v24 = vmax.f32 %v3706_v11, %v3127_v19  ;;  %v3833_v38 = vmax.f32 %v3832_v39, %v3480_v8  ;;  %v3129_v25 = vpop.f32.mrb[14].mxu0  ;;  %v3482_v2 = vpop.f32.mrb[14].mxu1 }
 0x445   : > { %v3645_v26 = vmax.f32 %v3644_v18, %v3129_v25  ;;  %v3771_v51 = vmax.f32 %v3770_v29, %v3482_v2  ;;  %v3131_v40 = vpop.f32.mrb[15].mxu0  ;;  %v3484_v47 = vpop.f32.mrb[15].mxu1 }
 0x446   : > { %v3708_v45 = vmax.f32 %v3707_v24, %v3131_v40  ;;  %v3834_v35 = vmax.f32 %v3833_v38, %v3484_v47 }
 0x44a   : > { %v3135_v63 = vpop.f32.mrb[16].mxu0  ;;  %v3488_v27 = vpop.f32.mrb[16].mxu1 }
 0x44b   : > { %v3646_v30 = vmax.f32 %v3645_v26, %v3135_v63  ;;  %v3772_v32 = vmax.f32 %v3771_v51, %v3488_v27  ;;  %v3137_v53 = vpop.f32.mrb[17].mxu0  ;;  %v3490_v33 = vpop.f32.mrb[17].mxu1 }
 0x44c   : > { %v3709_v34 = vmax.f32 %v3708_v45, %v3137_v53  ;;  %v3835_v43 = vmax.f32 %v3834_v35, %v3490_v33  ;;  %v3139_v44 = vpop.f32.mrb[18].mxu0  ;;  %v3492_v17 = vpop.f32.mrb[18].mxu1 }
 0x44d   : > { %v3647_v55 = vmax.f32 %v3646_v30, %v3139_v44  ;;  %v3773_v56 = vmax.f32 %v3772_v32, %v3492_v17  ;;  %v3141_v6 = vpop.f32.mrb[19].mxu0  ;;  %v3494_v13 = vpop.f32.mrb[19].mxu1 }
 0x44e   : > { %v3710_v28 = vmax.f32 %v3709_v34, %v3141_v6  ;;  %v3836_v50 = vmax.f32 %v3835_v43, %v3494_v13 }
 0x452   : > { %v3145_v31 = vpop.f32.mrb[20].mxu0  ;;  %v3498_v57 = vpop.f32.mrb[20].mxu1 }
 0x453   : > { %v3648_v52 = vmax.f32 %v3647_v55, %v3145_v31  ;;  %v3774_v58 = vmax.f32 %v3773_v56, %v3498_v57  ;;  %v3147_v49 = vpop.f32.mrb[21].mxu0  ;;  %v3500_v22 = vpop.f32.mrb[21].mxu1 }
 0x454   : > { %v3711_v59 = vmax.f32 %v3710_v28, %v3147_v49  ;;  %v3837_v60 = vmax.f32 %v3836_v50, %v3500_v22  ;;  %v3149_v1 = vpop.f32.mrb[22].mxu0  ;;  %v3502_v61 = vpop.f32.mrb[22].mxu1 }
 0x455   : > { %v3649_v62 = vmax.f32 %v3648_v52, %v3149_v1  ;;  %v3775_v41 = vmax.f32 %v3774_v58, %v3502_v61  ;;  %v3151_v16 = vpop.f32.mrb[23].mxu0  ;;  %v3504_v9 = vpop.f32.mrb[23].mxu1 }
 0x456   : > { %v3712_v12 = vmax.f32 %v3711_v59, %v3151_v16  ;;  %v3838_v36 = vmax.f32 %v3837_v60, %v3504_v9 }
 0x45a   : > { %v3155_v37 = vpop.f32.mrb[24].mxu0  ;;  %v3508_v20 = vpop.f32.mrb[24].mxu1 }
 0x45b   : > { %v3650_v3 = vmax.f32 %v3649_v62, %v3155_v37  ;;  %v3776_v46 = vmax.f32 %v3775_v41, %v3508_v20  ;;  %v3157_v4 = vpop.f32.mrb[25].mxu0  ;;  %v3510_v42 = vpop.f32.mrb[25].mxu1 }
 0x45c   : > { %v3713_v23 = vmax.f32 %v3712_v12, %v3157_v4  ;;  %v3839_v5 = vmax.f32 %v3838_v36, %v3510_v42  ;;  %v3159_v7 = vpop.f32.mrb[26].mxu0  ;;  %v3512_v21 = vpop.f32.mrb[26].mxu1 }
 0x45d   : > { %v3651_v0 = vmax.f32 %v3650_v3, %v3159_v7  ;;  %v3777_v54 = vmax.f32 %v3776_v46, %v3512_v21  ;;  %v3161_v48 = vpop.f32.mrb[27].mxu0  ;;  %v3514_v10 = vpop.f32.mrb[27].mxu1 }
 0x45e   : > { %v3714_v11 = vmax.f32 %v3713_v23, %v3161_v48  ;;  %v3840_v39 = vmax.f32 %v3839_v5, %v3514_v10 }
 0x462   : > { %v3165_v14 = vpop.f32.mrb[28].mxu0  ;;  %v3518_v15 = vpop.f32.mrb[28].mxu1 }
 0x463   : > { %v3652_v18 = vmax.f32 %v3651_v0, %v3165_v14  ;;  %v3778_v29 = vmax.f32 %v3777_v54, %v3518_v15  ;;  %v3167_v19 = vpop.f32.mrb[29].mxu0  ;;  %v3520_v8 = vpop.f32.mrb[29].mxu1 }
 0x464   : > { %v3715_v24 = vmax.f32 %v3714_v11, %v3167_v19  ;;  %v3841_v38 = vmax.f32 %v3840_v39, %v3520_v8  ;;  %v3169_v25 = vpop.f32.mrb[30].mxu0  ;;  %v3522_v2 = vpop.f32.mrb[30].mxu1 }
 0x465   : > { %v3653_v26 = vmax.f32 %v3652_v18, %v3169_v25  ;;  %v3779_v51 = vmax.f32 %v3778_v29, %v3522_v2  ;;  %v3171_v40 = vpop.f32.mrb[31].mxu0  ;;  %v3524_v47 = vpop.f32.mrb[31].mxu1 }
 0x466   : > { %v3716_v45 = vmax.f32 %v3715_v24, %v3171_v40  ;;  %v3842_v35 = vmax.f32 %v3841_v38, %v3524_v47 }
 0x46a   : > { %v3175_v63 = vpop.f32.mrb[32].mxu0  ;;  %v3528_v27 = vpop.f32.mrb[32].mxu1 }
 0x46b   : > { %v3654_v30 = vmax.f32 %v3653_v26, %v3175_v63  ;;  %v3780_v32 = vmax.f32 %v3779_v51, %v3528_v27  ;;  %v3177_v53 = vpop.f32.mrb[33].mxu0  ;;  %v3530_v33 = vpop.f32.mrb[33].mxu1 }
 0x46c   : > { %v3717_v34 = vmax.f32 %v3716_v45, %v3177_v53  ;;  %v3843_v43 = vmax.f32 %v3842_v35, %v3530_v33  ;;  %v3179_v44 = vpop.f32.mrb[34].mxu0  ;;  %v3532_v17 = vpop.f32.mrb[34].mxu1 }
 0x46d   : > { %v3655_v55 = vmax.f32 %v3654_v30, %v3179_v44  ;;  %v3781_v56 = vmax.f32 %v3780_v32, %v3532_v17  ;;  %v3181_v6 = vpop.f32.mrb[35].mxu0  ;;  %v3534_v13 = vpop.f32.mrb[35].mxu1 }
 0x46e   : > { %v3718_v28 = vmax.f32 %v3717_v34, %v3181_v6  ;;  %v3844_v50 = vmax.f32 %v3843_v43, %v3534_v13 }
 0x472   : > { %v3185_v31 = vpop.f32.mrb[36].mxu0  ;;  %v3538_v57 = vpop.f32.mrb[36].mxu1 }
 0x473   : > { %v3656_v52 = vmax.f32 %v3655_v55, %v3185_v31  ;;  %v3782_v58 = vmax.f32 %v3781_v56, %v3538_v57  ;;  %v3187_v49 = vpop.f32.mrb[37].mxu0  ;;  %v3540_v22 = vpop.f32.mrb[37].mxu1 }
 0x474   : > { %v3719_v59 = vmax.f32 %v3718_v28, %v3187_v49  ;;  %v3845_v60 = vmax.f32 %v3844_v50, %v3540_v22  ;;  %v3189_v1 = vpop.f32.mrb[38].mxu0  ;;  %v3542_v61 = vpop.f32.mrb[38].mxu1 }
 0x475   : > { %v3657_v62 = vmax.f32 %v3656_v52, %v3189_v1  ;;  %v3783_v41 = vmax.f32 %v3782_v58, %v3542_v61  ;;  %v3191_v16 = vpop.f32.mrb[39].mxu0  ;;  %v3544_v9 = vpop.f32.mrb[39].mxu1 }
 0x476   : > { %v3720_v12 = vmax.f32 %v3719_v59, %v3191_v16  ;;  %v3846_v36 = vmax.f32 %v3845_v60, %v3544_v9 }
 0x47a   : > { %v3195_v37 = vpop.f32.mrb[40].mxu0  ;;  %v3548_v20 = vpop.f32.mrb[40].mxu1 }
 0x47b   : > { %v3658_v3 = vmax.f32 %v3657_v62, %v3195_v37  ;;  %v3784_v46 = vmax.f32 %v3783_v41, %v3548_v20  ;;  %v3197_v4 = vpop.f32.mrb[41].mxu0  ;;  %v3550_v42 = vpop.f32.mrb[41].mxu1 }
 0x47c   : > { %v3721_v23 = vmax.f32 %v3720_v12, %v3197_v4  ;;  %v3847_v5 = vmax.f32 %v3846_v36, %v3550_v42  ;;  %v3199_v7 = vpop.f32.mrb[42].mxu0  ;;  %v3552_v21 = vpop.f32.mrb[42].mxu1 }
 0x47d   : > { %v3659_v0 = vmax.f32 %v3658_v3, %v3199_v7  ;;  %v3785_v54 = vmax.f32 %v3784_v46, %v3552_v21  ;;  %v3201_v48 = vpop.f32.mrb[43].mxu0  ;;  %v3554_v10 = vpop.f32.mrb[43].mxu1 }
 0x47e   : > { %v3722_v11 = vmax.f32 %v3721_v23, %v3201_v48  ;;  %v3848_v39 = vmax.f32 %v3847_v5, %v3554_v10 }
 0x482   : > { %v3205_v14 = vpop.f32.mrb[44].mxu0  ;;  %v3558_v15 = vpop.f32.mrb[44].mxu1 }
 0x483   : > { %v3660_v18 = vmax.f32 %v3659_v0, %v3205_v14  ;;  %v3786_v29 = vmax.f32 %v3785_v54, %v3558_v15  ;;  %v3207_v19 = vpop.f32.mrb[45].mxu0  ;;  %v3560_v8 = vpop.f32.mrb[45].mxu1 }
 0x484   : > { %v3723_v24 = vmax.f32 %v3722_v11, %v3207_v19  ;;  %v3849_v38 = vmax.f32 %v3848_v39, %v3560_v8  ;;  %v3209_v25 = vpop.f32.mrb[46].mxu0  ;;  %v3562_v2 = vpop.f32.mrb[46].mxu1 }
 0x485   : > { %v3661_v26 = vmax.f32 %v3660_v18, %v3209_v25  ;;  %v3787_v51 = vmax.f32 %v3786_v29, %v3562_v2  ;;  %v3211_v40 = vpop.f32.mrb[47].mxu0  ;;  %v3564_v47 = vpop.f32.mrb[47].mxu1 }
 0x486   : > { %v3724_v45 = vmax.f32 %v3723_v24, %v3211_v40  ;;  %v3850_v35 = vmax.f32 %v3849_v38, %v3564_v47 }
 0x48a   : > { %v3215_v63 = vpop.f32.mrb[48].mxu0  ;;  %v3568_v27 = vpop.f32.mrb[48].mxu1 }
 0x48b   : > { %v3662_v30 = vmax.f32 %v3661_v26, %v3215_v63  ;;  %v3788_v32 = vmax.f32 %v3787_v51, %v3568_v27  ;;  %v3217_v53 = vpop.f32.mrb[49].mxu0  ;;  %v3570_v33 = vpop.f32.mrb[49].mxu1 }
 0x48c   : > { %v3725_v34 = vmax.f32 %v3724_v45, %v3217_v53  ;;  %v3851_v43 = vmax.f32 %v3850_v35, %v3570_v33  ;;  %v3219_v44 = vpop.f32.mrb[50].mxu0  ;;  %v3572_v17 = vpop.f32.mrb[50].mxu1 }
 0x48d   : > { %v3663_v55 = vmax.f32 %v3662_v30, %v3219_v44  ;;  %v3789_v56 = vmax.f32 %v3788_v32, %v3572_v17  ;;  %v3221_v6 = vpop.f32.mrb[51].mxu0  ;;  %v3574_v13 = vpop.f32.mrb[51].mxu1 }
 0x48e   : > { %v3726_v28 = vmax.f32 %v3725_v34, %v3221_v6  ;;  %v3852_v50 = vmax.f32 %v3851_v43, %v3574_v13 }
 0x492   : > { %v3225_v31 = vpop.f32.mrb[52].mxu0  ;;  %v3578_v57 = vpop.f32.mrb[52].mxu1 }
 0x493   : > { %v3664_v52 = vmax.f32 %v3663_v55, %v3225_v31  ;;  %v3790_v58 = vmax.f32 %v3789_v56, %v3578_v57  ;;  %v3227_v49 = vpop.f32.mrb[53].mxu0  ;;  %v3580_v22 = vpop.f32.mrb[53].mxu1 }
 0x494   : > { %v3727_v59 = vmax.f32 %v3726_v28, %v3227_v49  ;;  %v3853_v60 = vmax.f32 %v3852_v50, %v3580_v22  ;;  %v3229_v1 = vpop.f32.mrb[54].mxu0  ;;  %v3582_v61 = vpop.f32.mrb[54].mxu1 }
 0x495   : > { %v3665_v62 = vmax.f32 %v3664_v52, %v3229_v1  ;;  %v3791_v41 = vmax.f32 %v3790_v58, %v3582_v61  ;;  %v3231_v16 = vpop.f32.mrb[55].mxu0  ;;  %v3584_v9 = vpop.f32.mrb[55].mxu1 }
 0x496   : > { %v3728_v12 = vmax.f32 %v3727_v59, %v3231_v16  ;;  %v3854_v36 = vmax.f32 %v3853_v60, %v3584_v9 }
 0x49a   : > { %v3235_v37 = vpop.f32.mrb[56].mxu0  ;;  %v3588_v20 = vpop.f32.mrb[56].mxu1 }
 0x49b   : > { %v3666_v3 = vmax.f32 %v3665_v62, %v3235_v37  ;;  %v3792_v46 = vmax.f32 %v3791_v41, %v3588_v20  ;;  %v3237_v4 = vpop.f32.mrb[57].mxu0  ;;  %v3590_v42 = vpop.f32.mrb[57].mxu1 }
 0x49c   : > { %v3729_v23 = vmax.f32 %v3728_v12, %v3237_v4  ;;  %v3855_v5 = vmax.f32 %v3854_v36, %v3590_v42  ;;  %v3239_v7 = vpop.f32.mrb[58].mxu0  ;;  %v3592_v21 = vpop.f32.mrb[58].mxu1 }
 0x49d   : > { %v3667_v0 = vmax.f32 %v3666_v3, %v3239_v7  ;;  %v3793_v54 = vmax.f32 %v3792_v46, %v3592_v21  ;;  %v3241_v48 = vpop.f32.mrb[59].mxu0  ;;  %v3594_v10 = vpop.f32.mrb[59].mxu1 }
 0x49e   : > { %v3730_v11 = vmax.f32 %v3729_v23, %v3241_v48  ;;  %v3856_v39 = vmax.f32 %v3855_v5, %v3594_v10 }
 0x4a2   : > { %v3245_v14 = vpop.f32.mrb[60].mxu0  ;;  %v3598_v15 = vpop.f32.mrb[60].mxu1 }
 0x4a3   : > { %v3668_v18 = vmax.f32 %v3667_v0, %v3245_v14  ;;  %v3794_v29 = vmax.f32 %v3793_v54, %v3598_v15  ;;  %v3247_v19 = vpop.f32.mrb[61].mxu0  ;;  %v3600_v8 = vpop.f32.mrb[61].mxu1 }
 0x4a4   : > { %v3731_v24 = vmax.f32 %v3730_v11, %v3247_v19  ;;  %v3857_v38 = vmax.f32 %v3856_v39, %v3600_v8  ;;  %v3249_v25 = vpop.f32.mrb[62].mxu0  ;;  %v3602_v2 = vpop.f32.mrb[62].mxu1 }
 0x4a5   : > { %v3669_v26 = vmax.f32 %v3668_v18, %v3249_v25  ;;  %v3795_v51 = vmax.f32 %v3794_v29, %v3602_v2  ;;  %v3251_v40 = vpop.f32.mrb[63].mxu0  ;;  %v3604_v47 = vpop.f32.mrb[63].mxu1 }
 0x4a6   : > { %v3732_v45 = vmax.f32 %v3731_v24, %v3251_v40  ;;  %v3858_v35 = vmax.f32 %v3857_v38, %v3604_v47 }
 0x4a7   : > { %3886 = vst [vmem:[%s5418_s20 + $0x20] sm:$0xff] %v3669_v26  ;;  %3888 = vst [vmem:[%s5418_s20 + $0x30] sm:$0xff] %v3795_v51 }
 0x4a8   : > { %3887 = vst [vmem:[%s5418_s20 + $0x28] sm:$0xff] %v3732_v45  ;;  %3889 = vst [vmem:[%s5418_s20 + $0x38] sm:$0xff] %v3858_v35 }
 0x4a9   : > { %4477 = shalt.err (!%p4474_p5)
}
 0x4aa   : > { %s4478_s16 = scalar_lea.hbm %s5451_s11, 1024  ;;  %s4482_s19 = scalar_lea.hbm %s5510_s6, 2048 }
 0x4ab   : > { %p4479_p6 = scmp.ne.s32.totalorder %s5451_s11, %s4478_s16  ;;  %p4483_p10 = scmp.lt.u32.totalorder %s5451_s11, %s5510_s6 }
 0x4ac   : > { %p4484_p11 = scmp.lt.u32.totalorder %s4482_s19, %s4478_s16  ;;  %p4486_p13 = scmp.lt.u32.totalorder %s4478_s16, %s5451_s11 }
 0x4ad   : > { %p4480_p7 = pnand %p4479_p6, %p4621_p4 }
 0x4ae   : > { %p4485_p12 = por %p4484_p11, %p4483_p10 }
 0x4af   : > { %p4481_p9 = pneg %p4480_p7 }
 0x4b0   : > { %p4487_p0 = por %p4486_p13, %p4485_p12 }
 0x4b2   : > { %p4488_p1 = pnand %p4487_p0, %p4481_p9 }
 0x4b4   : > { %4491 = shalt.err (!%p4488_p1)
}
 0x4b5   : > { %4372 = dma.vmem_to_hbm [thread:$0]  (%p4621_p4), %s5453_s28, 1024, %s5451_s11, %s3891_s24  }
 0x4b6 PF: > { %p4378_p2 = scmp.ge.s32.totalorder %s4542_s26, 2  ;;  %s3918_s30 = sand.u32 1, %s4522_s21  }
 0x4b7   : > { %s3919_s8 = scalar_lea.sflag [#allocation4], %s3918_s30 }
 0x4b8   : > { %p4375_p3 = pnand %p4378_p2, %p4628_p8 }
 0x4ba   : > { %4517 = dma.done.wait (!%p4375_p3), %s3919_s8, 1024  }
 0x4bb   : > { %4519 = vsyncadd (!%p4375_p3), %s3919_s8, 4294966272  ;;  %s19_s26 = sadd.s32 1, %s4542_s26   ;;  %s5513_s21 = smov %s4526_s22 }
 0x4bc   : > { %p16_p5 = scmp.ge.s32.totalorder %s19_s26, 4   ;;  %s5514_s22 = smov %s4530_s23 }
 0x4bd   : > { %s5515_s23 = smov %s4634_s10  ;;  %s5516_s24 = smov %s4538_s25 }
 0x4be   : > { %s5517_s25 = smov %s5519_s29  ;;  %18 = sbr.rel (!%p16_p5) target bundleno = 4 (0x4), region = 87 }
 0x4c5   :  { %3924 = vsyncpa [#allocation4], 1 }
 0x4c6   :  { %3926 = vsyncpa [#allocation4 + $0x1], 1 }

</bundles_post_ra>
